<compile_context>
chip_gen: v7x
topology: tpu7x:2x2x1
jax: 0.10.0
libtpu: 0.0.40
codegen_flags: <defaults>
</compile_context>

<pallas_src>
import numpy as np
import jax
import jax.numpy as jnp
from jax.experimental import pallas as pl
from jax.experimental.pallas import tpu as pltpu

# ---- hyperparameters implied by TransformerMemoryUpdater.__init__ ----
DIM_IN = 16        # dim_in   (per-mail raw feature dim)
DIM_OUT = 32       # dim_out  (memory / hidden dim)
DIM_TIME = 16      # dim_time (TimeEncode dim)
ATT_H = 2          # memory_param['attention_head']
MAILBOX = 4        # memory_param['mailbox_size']
D_HEAD = DIM_OUT // ATT_H

N_NODES = 512      # num_src_nodes() of the single MFG block (demo size)
TN = 256           # nodes per grid step == lane width of every tile


def _tmu_kernel(mem_ref, mails_ref, dt_ref, w_ref, aux_ref, out_ref, v_sc):
    """Feature-major forward: every tile is (feature_rows, TN_node_lanes)."""
    f32, bf16 = jnp.float32, jnp.bfloat16
    dot = lambda a, b: jnp.dot(a, b, preferred_element_type=f32)
    tn = mem_ref.shape[1]

    # Packed transposed weights (bf16 MXU operands): rows [wq^T | wk^T | wv^T | wm^T].
    wq = w_ref[0 * DIM_OUT:1 * DIM_OUT, :]                 # (32, 32)
    wkv = w_ref[1 * DIM_OUT:3 * DIM_OUT, :]                # (64, 32) fused K|V weights
    wm = w_ref[3 * DIM_OUT:4 * DIM_OUT, :]                 # (32, 32)

    # Packed f32 column-vector params: columns [bq bk bv bm gamma beta tw tb].
    aux = aux_ref[...]                                     # (32, 8)
    bq, bk, bv, bm = aux[:, 0:1], aux[:, 1:2], aux[:, 2:3], aux[:, 3:4]
    gamma, beta = aux[:, 4:5], aux[:, 5:6]
    tw, tb = aux[0:DIM_TIME, 6:7], aux[0:DIM_TIME, 7:8]    # (DIM_TIME, 1)

    # Hoisted broadcasts (JAX does not CSE broadcast_in_dim inside the unrolled loop).
    tw_b = jnp.broadcast_to(tw, (DIM_TIME, tn))
    tb_b = jnp.broadcast_to(tb, (DIM_TIME, tn))

    # Q = w_q(mem)^T ; only the dot sees bf16, bias add stays f32.
    q = dot(wq, mem_ref[...].astype(bf16)) + bq                          # (32, tn) f32

    # Mail-independent logit part: sum_d q_d * bk_d, per head (bk fold).
    qbk_h = (q * bk).reshape(ATT_H, D_HEAD, tn).sum(axis=1)              # (2, tn)

    # ---- mail loop: one fused K/V matmul per mail; V parked in VMEM scratch ----
    logits = []                                                          # MAILBOX x (2, tn)
    for m in range(MAILBOX):
        feat = mails_ref[m * DIM_IN:(m + 1) * DIM_IN, :]                 # (16, tn) bf16
        dt_m = dt_ref[m:m + 1, :]                                        # (1, tn) f32
        tfeat = jnp.cos(dt_m * tw_b + tb_b)                              # TimeEncode (16, tn)
        full = jnp.concatenate([feat, tfeat.astype(bf16)], axis=0)       # [mail | time] (32, tn) bf16
        kv = dot(wkv, full)                                              # (64, tn) f32
        v_sc[m] = kv[DIM_OUT:2 * DIM_OUT, :]                             # raw V -> scratch (no bv yet)
        s = (q * kv[0:DIM_OUT, :]).reshape(ATT_H, D_HEAD, tn).sum(axis=1) + qbk_h
        logits.append(jnp.where(s > 0, s, 0.2 * s))                      # LeakyReLU(0.2)

    # ---- softmax over the mailbox dim, per (node, head); att_dropout = identity ----
    m_max = logits[0]
    for m in range(1, MAILBOX):
        m_max = jnp.maximum(m_max, logits[m])
    es = [jnp.exp(s - m_max) for s in logits]
    denom = es[0]
    for m in range(1, MAILBOX):
        denom = denom + es[m]
    inv = pl.reciprocal(denom, approx=False)       # exact: feeds recurrent memory state
    att = [e * inv for e in es]                    # MAILBOX x (2, tn)

    # ---- weighted V sum per head; bv folded in once (sum(att) == 1) ----
    accs = [None] * ATT_H
    for m in range(MAILBOX):
        v_m = v_sc[m]                                                    # (32, tn) from VMEM
        for h in range(ATT_H):
            c = att[m][h:h + 1, :] * v_m[h * D_HEAD:(h + 1) * D_HEAD, :]
            accs[h] = c if accs[h] is None else accs[h] + c
    rst = jnp.concatenate(accs, axis=0) + bv + mem_ref[...]              # + residual memory

    # ---- LayerNorm(dim_out), eps=1e-5 (feature dim = sublane axis) ----
    mu = jnp.mean(rst, axis=0, keepdims=True)
    xc = rst - mu
    var = jnp.mean(xc * xc, axis=0, keepdims=True)
    xn = xc * jax.lax.rsqrt(var + 1e-5) * gamma + beta

    # ---- mlp -> dropout(identity, eval) -> relu ----
    o = dot(wm, xn.astype(bf16)) + bm
    out_ref[...] = jnp.maximum(o, 0.0)


def transformer_memory_updater(mem, mem_input, ts, mail_ts, params, *, tn=TN):
    """Pallas forward. Returns h (= last_updated_memory), node-major (N, DIM_OUT).
    last_updated_{nid,ts} bookkeeping is a trivial caller-side copy."""
    N = mem.shape[0]
    f32, bf16 = jnp.float32, jnp.bfloat16
    n_blk = pl.cdiv(N, tn)
    Np = n_blk * tn
    pad = Np - N

    # Feature-major (transposed) node data, node axis padded to a multiple of tn.
    # TODO(synk): at production scale keep memory/mailbox persistently feature-major
    # (and consume the (DIM_OUT, N) output directly) so these transpose/pad passes do
    # not re-stream the dominant arrays through HBM before/after every call.
    mem_T = jnp.pad(mem.astype(f32).T, ((0, 0), (0, pad)))                       # (32, Np) f32
    mails = mem_input.astype(bf16).reshape(N, MAILBOX, DIM_IN).transpose(1, 2, 0)
    mails_T = jnp.pad(mails.reshape(MAILBOX * DIM_IN, N), ((0, 0), (0, pad)))    # (64, Np) bf16
    delta = (ts[:, None] - mail_ts).T.astype(f32)                                # (4, N)
    delta_T = jnp.pad(delta, ((0, 8 - MAILBOX), (0, pad)))                       # (8, Np) sublane-aligned

    # Packed parameters: one bf16 weight slab + one f32 vector slab.
    W = jnp.concatenate([params["wq"].T, params["wk"].T,
                         params["wv"].T, params["wm"].T], axis=0).astype(bf16)   # (128, 32)

    def col(v):
        v = jnp.reshape(v, (-1,)).astype(f32)
        return jnp.pad(v, (0, DIM_OUT - v.shape[0]))[:, None]
    aux = jnp.concatenate([col(params["bq"]), col(params["bk"]), col(params["bv"]),
                           col(params["bm"]), col(params["gamma"]), col(params["beta"]),
                           col(params["tw"]), col(params["tb"])], axis=1)        # (32, 8)

    # Advisory cost estimate (per node: 1x q dot + MAILBOX fused kv dots + 1x mlp dot).
    flops_per_node = (2 * DIM_OUT * DIM_OUT                      # q
                      + MAILBOX * 2 * (2 * DIM_OUT) * DIM_OUT    # fused k|v
                      + 2 * DIM_OUT * DIM_OUT                    # mlp
                      + 40 * DIM_OUT)                            # vector epilogue
    transc_per_node = MAILBOX * DIM_TIME + MAILBOX * ATT_H + 3   # cos + exp + rsqrt/recip
    bytes_per_node = DIM_OUT * 4 + MAILBOX * DIM_IN * 2 + 8 * 4 + DIM_OUT * 4
    cost = pl.CostEstimate(flops=Np * flops_per_node,
                           transcendentals=Np * transc_per_node,
                           bytes_accessed=Np * bytes_per_node + W.size * 2 + aux.size * 4)

    out_T = pl.pallas_call(
        _tmu_kernel,
        out_shape=jax.ShapeDtypeStruct((DIM_OUT, Np), f32),
        grid_spec=pltpu.PrefetchScalarGridSpec(
            num_scalar_prefetch=0,
            grid=(n_blk,),
            in_specs=[
                pl.BlockSpec((DIM_OUT, tn), lambda i: (0, i)),             # mem^T (f32)
                pl.BlockSpec((MAILBOX * DIM_IN, tn), lambda i: (0, i)),    # mailbox^T (bf16)
                pl.BlockSpec((8, tn), lambda i: (0, i)),                   # delta ts^T (padded to 8 rows)
                pl.BlockSpec((4 * DIM_OUT, DIM_OUT), lambda i: (0, 0)),    # packed weights (bf16)
                pl.BlockSpec((DIM_OUT, 8), lambda i: (0, 0)),              # packed bias/affine/time-enc
            ],
            out_specs=pl.BlockSpec((DIM_OUT, tn), lambda i: (0, i)),
            scratch_shapes=[pltpu.VMEM((MAILBOX, DIM_OUT, tn), f32)],      # V parking (kills spills)
        ),
        compiler_params=pltpu.CompilerParams(dimension_semantics=("parallel",)),
        cost_estimate=cost,
    )(mem_T, mails_T, delta_T, W, aux)

    return out_T[:, :N].T                                                 # back to node-major


def reference(mem, mem_input, ts, mail_ts, p):
    """Pure-JAX f32 transcription of the PyTorch forward (eval mode)."""
    N = mem.shape[0]
    q = (mem @ p["wq"] + p["bq"]).reshape(N, ATT_H, D_HEAD)
    mails = mem_input.reshape(N, MAILBOX, DIM_IN)
    delta = (ts[:, None] - mail_ts).reshape(-1, 1)
    tf = jnp.cos(delta * p["tw"] + p["tb"]).reshape(N, MAILBOX, DIM_TIME)
    mails = jnp.concatenate([mails, tf], axis=2)
    k = (mails @ p["wk"] + p["bk"]).reshape(N, MAILBOX, ATT_H, D_HEAD)
    v = (mails @ p["wv"] + p["bv"]).reshape(N, MAILBOX, ATT_H, D_HEAD)
    att = (q[:, None] * k).sum(-1)
    att = jnp.where(att > 0, att, 0.2 * att)
    att = jax.nn.softmax(att, axis=1)
    rst = (att[..., None] * v).sum(1).reshape(N, -1)
    rst = rst + mem
    mu = rst.mean(-1, keepdims=True)
    var = ((rst - mu) ** 2).mean(-1, keepdims=True)
    rst = (rst - mu) / jnp.sqrt(var + 1e-5) * p["gamma"] + p["beta"]
    return jnp.maximum(rst @ p["wm"] + p["bm"], 0.0)


if __name__ == "__main__":
    key = jax.random.PRNGKey(0)
    ks = jax.random.split(key, 16)
    w = lambda k, s: 0.1 * jax.random.normal(k, s, jnp.float32)

    params = {
        # Linear weights stored already transposed for the x @ W + b convention
        "wq": w(ks[0], (DIM_OUT, DIM_OUT)), "bq": w(ks[1], (1, DIM_OUT)),
        "wk": w(ks[2], (DIM_IN + DIM_TIME, DIM_OUT)), "bk": w(ks[3], (1, DIM_OUT)),
        "wv": w(ks[4], (DIM_IN + DIM_TIME, DIM_OUT)), "bv": w(ks[5], (1, DIM_OUT)),
        "wm": w(ks[6], (DIM_OUT, DIM_OUT)), "bm": w(ks[7], (1, DIM_OUT)),
        # LayerNorm affine params (PyTorch default init)
        "gamma": jnp.ones((1, DIM_OUT), jnp.float32),
        "beta": jnp.zeros((1, DIM_OUT), jnp.float32),
        # TimeEncode params (fixed TGN-style init)
        "tw": jnp.asarray((1.0 / 10 ** np.linspace(0, 9, DIM_TIME))
                          .astype(np.float32).reshape(1, DIM_TIME)),
        "tb": jnp.zeros((1, DIM_TIME), jnp.float32),
    }

    # srcdata of the single MFG block
    mem = jax.random.normal(ks[8], (N_NODES, DIM_OUT), jnp.float32)
    mem_input = jax.random.normal(ks[9], (N_NODES, MAILBOX * DIM_IN), jnp.float32)
    ts = jax.random.uniform(ks[10], (N_NODES,), jnp.float32, 0.0, 10.0)
    mail_ts = jax.random.uniform(ks[11], (N_NODES, MAILBOX), jnp.float32, 0.0, 10.0)
    # TODO(synk): dropout / att_dropout are identity in eval mode; training-time RNG
    # masking and last_updated_{nid,ts} detach/clone bookkeeping are not kernel work.

    out = jax.block_until_ready(
        transformer_memory_updater(mem, mem_input, ts, mail_ts, params))

    # Reference is pure f32 except it sees the same bf16-quantized mailbox the kernel
    # streams from HBM. Tolerance covers the (intentional) bf16 MXU operands
    # (weights + memT/tfeat/xn casts); measured error is well under 1e-2.
    mem_input_q = mem_input.astype(jnp.bfloat16).astype(jnp.float32)
    ref = jax.block_until_ready(reference(mem, mem_input_q, ts, mail_ts, params))
    np.testing.assert_allclose(np.asarray(out), np.asarray(ref), atol=2.5e-2, rtol=2e-2)

    print("KERNEL_OK")
</pallas_src>

<mosaic_0001>
module attributes {stable_mosaic.version = 11 : i64} {
  func.func @_tmu_kernel(%arg0: i32, %arg1: memref<32x256xf32, #tpu.memory_space<vmem>>, %arg2: memref<64x256xbf16, #tpu.memory_space<vmem>>, %arg3: memref<8x256xf32, #tpu.memory_space<vmem>>, %arg4: memref<128x32xbf16, #tpu.memory_space<vmem>>, %arg5: memref<32x8xf32, #tpu.memory_space<vmem>>, %arg6: memref<32x256xf32, #tpu.memory_space<vmem>>, %arg7: memref<4x32x256xf32, #tpu.memory_space<vmem>>) attributes {dimension_semantics = [#tpu.dimension_semantics<parallel>], iteration_bounds = array<i64: 2>, scalar_prefetch = 0 : i64, scratch_operands = 1 : i64, tpu.core_type = #tpu.core_type<tc>, window_params = [{transform_indices = @transform_0, window_bounds = array<i64: 32, 256>}, {transform_indices = @transform_1, window_bounds = array<i64: 64, 256>}, {transform_indices = @transform_2, window_bounds = array<i64: 8, 256>}, {pipeline_mode = #tpu.pipeline_mode<synchronous>, transform_indices = @transform_3, window_bounds = array<i64: 128, 32>}, {pipeline_mode = #tpu.pipeline_mode<synchronous>, transform_indices = @transform_4, window_bounds = array<i64: 32, 8>}, {transform_indices = @transform_5, window_bounds = array<i64: 32, 256>}]} {
    %c0 = arith.constant 0 : index
    %c0_0 = arith.constant 0 : index
    %0 = vector.load %arg4[%c0, %c0_0] : memref<128x32xbf16, #tpu.memory_space<vmem>>, vector<32x32xbf16>
    %c32 = arith.constant 32 : index
    %c0_1 = arith.constant 0 : index
    %1 = vector.load %arg4[%c32, %c0_1] : memref<128x32xbf16, #tpu.memory_space<vmem>>, vector<64x32xbf16>
    %c96 = arith.constant 96 : index
    %c0_2 = arith.constant 0 : index
    %2 = vector.load %arg4[%c96, %c0_2] : memref<128x32xbf16, #tpu.memory_space<vmem>>, vector<32x32xbf16>
    %c0_3 = arith.constant 0 : index
    %c0_4 = arith.constant 0 : index
    %3 = vector.load %arg5[%c0_3, %c0_4] : memref<32x8xf32, #tpu.memory_space<vmem>>, vector<32x8xf32>
    %4 = vector.extract_strided_slice %3 {offsets = [0, 0], sizes = [32, 1], strides = [1, 1]} : vector<32x8xf32> to vector<32x1xf32>
    %5 = vector.extract_strided_slice %3 {offsets = [0, 1], sizes = [32, 1], strides = [1, 1]} : vector<32x8xf32> to vector<32x1xf32>
    %6 = vector.extract_strided_slice %3 {offsets = [0, 2], sizes = [32, 1], strides = [1, 1]} : vector<32x8xf32> to vector<32x1xf32>
    %7 = vector.extract_strided_slice %3 {offsets = [0, 3], sizes = [32, 1], strides = [1, 1]} : vector<32x8xf32> to vector<32x1xf32>
    %8 = vector.extract_strided_slice %3 {offsets = [0, 4], sizes = [32, 1], strides = [1, 1]} : vector<32x8xf32> to vector<32x1xf32>
    %9 = vector.extract_strided_slice %3 {offsets = [0, 5], sizes = [32, 1], strides = [1, 1]} : vector<32x8xf32> to vector<32x1xf32>
    %10 = vector.extract_strided_slice %3 {offsets = [0, 6], sizes = [16, 1], strides = [1, 1]} : vector<32x8xf32> to vector<16x1xf32>
    %11 = vector.extract_strided_slice %3 {offsets = [0, 7], sizes = [16, 1], strides = [1, 1]} : vector<32x8xf32> to vector<16x1xf32>
    %12 = vector.shape_cast %10 : vector<16x1xf32> to vector<16x1xf32>
    %13 = vector.broadcast %12 : vector<16x1xf32> to vector<16x256xf32>
    %14 = vector.shape_cast %11 : vector<16x1xf32> to vector<16x1xf32>
    %15 = vector.broadcast %14 : vector<16x1xf32> to vector<16x256xf32>
    %c0_5 = arith.constant 0 : index
    %c0_6 = arith.constant 0 : index
    %16 = vector.load %arg1[%c0_5, %c0_6] : memref<32x256xf32, #tpu.memory_space<vmem>>, vector<32x256xf32>
    %17 = arith.truncf %16 : vector<32x256xf32> to vector<32x256xbf16>
    %cst = arith.constant dense<0.000000e+00> : vector<32x256xf32>
    %18 = tpu.matmul %0, %17, %cst {dimension_numbers = #tpu.dot_dimension_numbers<[1], [0], [0], [1], [0, 0, 1, 1], [], []>} : vector<32x32xbf16>, vector<32x256xbf16>, vector<32x256xf32> -> vector<32x256xf32>
    %19 = vector.broadcast %4 : vector<32x1xf32> to vector<32x256xf32>
    %20 = arith.addf %18, %19 : vector<32x256xf32>
    %21 = vector.broadcast %5 : vector<32x1xf32> to vector<32x256xf32>
    %22 = arith.mulf %20, %21 : vector<32x256xf32>
    %23 = vector.shape_cast %22 : vector<32x256xf32> to vector<2x16x256xf32>
    %cst_7 = arith.constant dense<0.000000e+00> : vector<2x256xf32>
    %24 = vector.multi_reduction <add>, %23, %cst_7 [1] : vector<2x16x256xf32> to vector<2x256xf32>
    %c0_8 = arith.constant 0 : index
    %c0_9 = arith.constant 0 : index
    %25 = vector.load %arg2[%c0_8, %c0_9] : memref<64x256xbf16, #tpu.memory_space<vmem>>, vector<16x256xbf16>
    %c0_10 = arith.constant 0 : index
    %c0_11 = arith.constant 0 : index
    %26 = vector.load %arg3[%c0_10, %c0_11] : memref<8x256xf32, #tpu.memory_space<vmem>>, vector<1x256xf32>
    %27 = vector.broadcast %26 : vector<1x256xf32> to vector<16x256xf32>
    %28 = arith.mulf %27, %13 : vector<16x256xf32>
    %29 = arith.addf %28, %15 : vector<16x256xf32>
    %30 = math.cos %29 : vector<16x256xf32>
    %31 = arith.truncf %30 : vector<16x256xf32> to vector<16x256xbf16>
    %32 = tpu.concatenate %25, %31 in 0 : vector<16x256xbf16>, vector<16x256xbf16> -> vector<32x256xbf16>
    %cst_12 = arith.constant dense<0.000000e+00> : vector<64x256xf32>
    %33 = tpu.matmul %1, %32, %cst_12 {dimension_numbers = #tpu.dot_dimension_numbers<[1], [0], [0], [1], [0, 0, 1, 1], [], []>} : vector<64x32xbf16>, vector<32x256xbf16>, vector<64x256xf32> -> vector<64x256xf32>
    %34 = vector.extract_strided_slice %33 {offsets = [32, 0], sizes = [32, 256], strides = [1, 1]} : vector<64x256xf32> to vector<32x256xf32>
    %c0_13 = arith.constant 0 : index
    %c0_14 = arith.constant 0 : index
    %c0_15 = arith.constant 0 : index
    %35 = vector.load %arg7[%c0_13, %c0_14, %c0_15] : memref<4x32x256xf32, #tpu.memory_space<vmem>>, vector<1x32x256xf32>
    %36 = vector.shape_cast %35 : vector<1x32x256xf32> to vector<32x256xf32>
    %37 = vector.shape_cast %34 : vector<32x256xf32> to vector<1x32x256xf32>
    tpu.vector_store %arg7[%c0_13, %c0_14, %c0_15], %37 {strides = array<i32>} : memref<4x32x256xf32, #tpu.memory_space<vmem>>, vector<1x32x256xf32>,
    %38 = vector.extract_strided_slice %33 {offsets = [0, 0], sizes = [32, 256], strides = [1, 1]} : vector<64x256xf32> to vector<32x256xf32>
    %39 = arith.mulf %20, %38 : vector<32x256xf32>
    %40 = vector.shape_cast %39 : vector<32x256xf32> to vector<2x16x256xf32>
    %cst_16 = arith.constant dense<0.000000e+00> : vector<2x256xf32>
    %41 = vector.multi_reduction <add>, %40, %cst_16 [1] : vector<2x16x256xf32> to vector<2x256xf32>
    %42 = arith.addf %41, %24 : vector<2x256xf32>
    %cst_17 = arith.constant 0.000000e+00 : f32
    %43 = vector.broadcast %cst_17 : f32 to vector<2x256xf32>
    %44 = arith.cmpf ogt, %42, %43 : vector<2x256xf32>
    %cst_18 = arith.constant 2.000000e-01 : f32
    %45 = vector.broadcast %cst_18 : f32 to vector<2x256xf32>
    %46 = arith.mulf %45, %42 : vector<2x256xf32>
    %47 = arith.select %44, %42, %46 : vector<2x256xi1>, vector<2x256xf32>
    %c16 = arith.constant 16 : index
    %c0_19 = arith.constant 0 : index
    %48 = vector.load %arg2[%c16, %c0_19] : memref<64x256xbf16, #tpu.memory_space<vmem>>, vector<16x256xbf16>
    %c1 = arith.constant 1 : index
    %c0_20 = arith.constant 0 : index
    %49 = vector.load %arg3[%c1, %c0_20] : memref<8x256xf32, #tpu.memory_space<vmem>>, vector<1x256xf32>
    %50 = vector.broadcast %49 : vector<1x256xf32> to vector<16x256xf32>
    %51 = arith.mulf %50, %13 : vector<16x256xf32>
    %52 = arith.addf %51, %15 : vector<16x256xf32>
    %53 = math.cos %52 : vector<16x256xf32>
    %54 = arith.truncf %53 : vector<16x256xf32> to vector<16x256xbf16>
    %55 = tpu.concatenate %48, %54 in 0 : vector<16x256xbf16>, vector<16x256xbf16> -> vector<32x256xbf16>
    %cst_21 = arith.constant dense<0.000000e+00> : vector<64x256xf32>
    %56 = tpu.matmul %1, %55, %cst_21 {dimension_numbers = #tpu.dot_dimension_numbers<[1], [0], [0], [1], [0, 0, 1, 1], [], []>} : vector<64x32xbf16>, vector<32x256xbf16>, vector<64x256xf32> -> vector<64x256xf32>
    %57 = vector.extract_strided_slice %56 {offsets = [32, 0], sizes = [32, 256], strides = [1, 1]} : vector<64x256xf32> to vector<32x256xf32>
    %c1_22 = arith.constant 1 : index
    %c0_23 = arith.constant 0 : index
    %c0_24 = arith.constant 0 : index
    %58 = vector.load %arg7[%c1_22, %c0_23, %c0_24] : memref<4x32x256xf32, #tpu.memory_space<vmem>>, vector<1x32x256xf32>
    %59 = vector.shape_cast %58 : vector<1x32x256xf32> to vector<32x256xf32>
    %60 = vector.shape_cast %57 : vector<32x256xf32> to vector<1x32x256xf32>
    tpu.vector_store %arg7[%c1_22, %c0_23, %c0_24], %60 {strides = array<i32>} : memref<4x32x256xf32, #tpu.memory_space<vmem>>, vector<1x32x256xf32>,
    %61 = vector.extract_strided_slice %56 {offsets = [0, 0], sizes = [32, 256], strides = [1, 1]} : vector<64x256xf32> to vector<32x256xf32>
    %62 = arith.mulf %20, %61 : vector<32x256xf32>
    %63 = vector.shape_cast %62 : vector<32x256xf32> to vector<2x16x256xf32>
    %cst_25 = arith.constant dense<0.000000e+00> : vector<2x256xf32>
    %64 = vector.multi_reduction <add>, %63, %cst_25 [1] : vector<2x16x256xf32> to vector<2x256xf32>
    %65 = arith.addf %64, %24 : vector<2x256xf32>
    %cst_26 = arith.constant 0.000000e+00 : f32
    %66 = vector.broadcast %cst_26 : f32 to vector<2x256xf32>
    %67 = arith.cmpf ogt, %65, %66 : vector<2x256xf32>
    %cst_27 = arith.constant 2.000000e-01 : f32
    %68 = vector.broadcast %cst_27 : f32 to vector<2x256xf32>
    %69 = arith.mulf %68, %65 : vector<2x256xf32>
    %70 = arith.select %67, %65, %69 : vector<2x256xi1>, vector<2x256xf32>
    %c32_28 = arith.constant 32 : index
    %c0_29 = arith.constant 0 : index
    %71 = vector.load %arg2[%c32_28, %c0_29] : memref<64x256xbf16, #tpu.memory_space<vmem>>, vector<16x256xbf16>
    %c2 = arith.constant 2 : index
    %c0_30 = arith.constant 0 : index
    %72 = vector.load %arg3[%c2, %c0_30] : memref<8x256xf32, #tpu.memory_space<vmem>>, vector<1x256xf32>
    %73 = vector.broadcast %72 : vector<1x256xf32> to vector<16x256xf32>
    %74 = arith.mulf %73, %13 : vector<16x256xf32>
    %75 = arith.addf %74, %15 : vector<16x256xf32>
    %76 = math.cos %75 : vector<16x256xf32>
    %77 = arith.truncf %76 : vector<16x256xf32> to vector<16x256xbf16>
    %78 = tpu.concatenate %71, %77 in 0 : vector<16x256xbf16>, vector<16x256xbf16> -> vector<32x256xbf16>
    %cst_31 = arith.constant dense<0.000000e+00> : vector<64x256xf32>
    %79 = tpu.matmul %1, %78, %cst_31 {dimension_numbers = #tpu.dot_dimension_numbers<[1], [0], [0], [1], [0, 0, 1, 1], [], []>} : vector<64x32xbf16>, vector<32x256xbf16>, vector<64x256xf32> -> vector<64x256xf32>
    %80 = vector.extract_strided_slice %79 {offsets = [32, 0], sizes = [32, 256], strides = [1, 1]} : vector<64x256xf32> to vector<32x256xf32>
    %c2_32 = arith.constant 2 : index
    %c0_33 = arith.constant 0 : index
    %c0_34 = arith.constant 0 : index
    %81 = vector.load %arg7[%c2_32, %c0_33, %c0_34] : memref<4x32x256xf32, #tpu.memory_space<vmem>>, vector<1x32x256xf32>
    %82 = vector.shape_cast %81 : vector<1x32x256xf32> to vector<32x256xf32>
    %83 = vector.shape_cast %80 : vector<32x256xf32> to vector<1x32x256xf32>
    tpu.vector_store %arg7[%c2_32, %c0_33, %c0_34], %83 {strides = array<i32>} : memref<4x32x256xf32, #tpu.memory_space<vmem>>, vector<1x32x256xf32>,
    %84 = vector.extract_strided_slice %79 {offsets = [0, 0], sizes = [32, 256], strides = [1, 1]} : vector<64x256xf32> to vector<32x256xf32>
    %85 = arith.mulf %20, %84 : vector<32x256xf32>
    %86 = vector.shape_cast %85 : vector<32x256xf32> to vector<2x16x256xf32>
    %cst_35 = arith.constant dense<0.000000e+00> : vector<2x256xf32>
    %87 = vector.multi_reduction <add>, %86, %cst_35 [1] : vector<2x16x256xf32> to vector<2x256xf32>
    %88 = arith.addf %87, %24 : vector<2x256xf32>
    %cst_36 = arith.constant 0.000000e+00 : f32
    %89 = vector.broadcast %cst_36 : f32 to vector<2x256xf32>
    %90 = arith.cmpf ogt, %88, %89 : vector<2x256xf32>
    %cst_37 = arith.constant 2.000000e-01 : f32
    %91 = vector.broadcast %cst_37 : f32 to vector<2x256xf32>
    %92 = arith.mulf %91, %88 : vector<2x256xf32>
    %93 = arith.select %90, %88, %92 : vector<2x256xi1>, vector<2x256xf32>
    %c48 = arith.constant 48 : index
    %c0_38 = arith.constant 0 : index
    %94 = vector.load %arg2[%c48, %c0_38] : memref<64x256xbf16, #tpu.memory_space<vmem>>, vector<16x256xbf16>
    %c3 = arith.constant 3 : index
    %c0_39 = arith.constant 0 : index
    %95 = vector.load %arg3[%c3, %c0_39] : memref<8x256xf32, #tpu.memory_space<vmem>>, vector<1x256xf32>
    %96 = vector.broadcast %95 : vector<1x256xf32> to vector<16x256xf32>
    %97 = arith.mulf %96, %13 : vector<16x256xf32>
    %98 = arith.addf %97, %15 : vector<16x256xf32>
    %99 = math.cos %98 : vector<16x256xf32>
    %100 = arith.truncf %99 : vector<16x256xf32> to vector<16x256xbf16>
    %101 = tpu.concatenate %94, %100 in 0 : vector<16x256xbf16>, vector<16x256xbf16> -> vector<32x256xbf16>
    %cst_40 = arith.constant dense<0.000000e+00> : vector<64x256xf32>
    %102 = tpu.matmul %1, %101, %cst_40 {dimension_numbers = #tpu.dot_dimension_numbers<[1], [0], [0], [1], [0, 0, 1, 1], [], []>} : vector<64x32xbf16>, vector<32x256xbf16>, vector<64x256xf32> -> vector<64x256xf32>
    %103 = vector.extract_strided_slice %102 {offsets = [32, 0], sizes = [32, 256], strides = [1, 1]} : vector<64x256xf32> to vector<32x256xf32>
    %c3_41 = arith.constant 3 : index
    %c0_42 = arith.constant 0 : index
    %c0_43 = arith.constant 0 : index
    %104 = vector.load %arg7[%c3_41, %c0_42, %c0_43] : memref<4x32x256xf32, #tpu.memory_space<vmem>>, vector<1x32x256xf32>
    %105 = vector.shape_cast %104 : vector<1x32x256xf32> to vector<32x256xf32>
    %106 = vector.shape_cast %103 : vector<32x256xf32> to vector<1x32x256xf32>
    tpu.vector_store %arg7[%c3_41, %c0_42, %c0_43], %106 {strides = array<i32>} : memref<4x32x256xf32, #tpu.memory_space<vmem>>, vector<1x32x256xf32>,
    %107 = vector.extract_strided_slice %102 {offsets = [0, 0], sizes = [32, 256], strides = [1, 1]} : vector<64x256xf32> to vector<32x256xf32>
    %108 = arith.mulf %20, %107 : vector<32x256xf32>
    %109 = vector.shape_cast %108 : vector<32x256xf32> to vector<2x16x256xf32>
    %cst_44 = arith.constant dense<0.000000e+00> : vector<2x256xf32>
    %110 = vector.multi_reduction <add>, %109, %cst_44 [1] : vector<2x16x256xf32> to vector<2x256xf32>
    %111 = arith.addf %110, %24 : vector<2x256xf32>
    %cst_45 = arith.constant 0.000000e+00 : f32
    %112 = vector.broadcast %cst_45 : f32 to vector<2x256xf32>
    %113 = arith.cmpf ogt, %111, %112 : vector<2x256xf32>
    %cst_46 = arith.constant 2.000000e-01 : f32
    %114 = vector.broadcast %cst_46 : f32 to vector<2x256xf32>
    %115 = arith.mulf %114, %111 : vector<2x256xf32>
    %116 = arith.select %113, %111, %115 : vector<2x256xi1>, vector<2x256xf32>
    %117 = arith.maximumf %47, %70 : vector<2x256xf32>
    %118 = arith.maximumf %117, %93 : vector<2x256xf32>
    %119 = arith.maximumf %118, %116 : vector<2x256xf32>
    %120 = arith.subf %47, %119 : vector<2x256xf32>
    %121 = math.exp %120 : vector<2x256xf32>
    %122 = arith.subf %70, %119 : vector<2x256xf32>
    %123 = math.exp %122 : vector<2x256xf32>
    %124 = arith.subf %93, %119 : vector<2x256xf32>
    %125 = math.exp %124 : vector<2x256xf32>
    %126 = arith.subf %116, %119 : vector<2x256xf32>
    %127 = math.exp %126 : vector<2x256xf32>
    %128 = arith.addf %121, %123 : vector<2x256xf32>
    %129 = arith.addf %128, %125 : vector<2x256xf32>
    %130 = arith.addf %129, %127 : vector<2x256xf32>
    %131 = tpu.reciprocal %130 : vector<2x256xf32> -> vector<2x256xf32>
    %132 = arith.mulf %121, %131 : vector<2x256xf32>
    %133 = arith.mulf %123, %131 : vector<2x256xf32>
    %134 = arith.mulf %125, %131 : vector<2x256xf32>
    %135 = arith.mulf %127, %131 : vector<2x256xf32>
    %c0_47 = arith.constant 0 : index
    %c0_48 = arith.constant 0 : index
    %c0_49 = arith.constant 0 : index
    %136 = vector.load %arg7[%c0_47, %c0_48, %c0_49] : memref<4x32x256xf32, #tpu.memory_space<vmem>>, vector<1x32x256xf32>
    %137 = vector.shape_cast %136 : vector<1x32x256xf32> to vector<32x256xf32>
    %138 = vector.extract_strided_slice %132 {offsets = [0, 0], sizes = [1, 256], strides = [1, 1]} : vector<2x256xf32> to vector<1x256xf32>
    %139 = vector.extract_strided_slice %137 {offsets = [0, 0], sizes = [16, 256], strides = [1, 1]} : vector<32x256xf32> to vector<16x256xf32>
    %140 = vector.broadcast %138 : vector<1x256xf32> to vector<16x256xf32>
    %141 = arith.mulf %140, %139 : vector<16x256xf32>
    %142 = vector.extract_strided_slice %132 {offsets = [1, 0], sizes = [1, 256], strides = [1, 1]} : vector<2x256xf32> to vector<1x256xf32>
    %143 = vector.extract_strided_slice %137 {offsets = [16, 0], sizes = [16, 256], strides = [1, 1]} : vector<32x256xf32> to vector<16x256xf32>
    %144 = vector.broadcast %142 : vector<1x256xf32> to vector<16x256xf32>
    %145 = arith.mulf %144, %143 : vector<16x256xf32>
    %c1_50 = arith.constant 1 : index
    %c0_51 = arith.constant 0 : index
    %c0_52 = arith.constant 0 : index
    %146 = vector.load %arg7[%c1_50, %c0_51, %c0_52] : memref<4x32x256xf32, #tpu.memory_space<vmem>>, vector<1x32x256xf32>
    %147 = vector.shape_cast %146 : vector<1x32x256xf32> to vector<32x256xf32>
    %148 = vector.extract_strided_slice %133 {offsets = [0, 0], sizes = [1, 256], strides = [1, 1]} : vector<2x256xf32> to vector<1x256xf32>
    %149 = vector.extract_strided_slice %147 {offsets = [0, 0], sizes = [16, 256], strides = [1, 1]} : vector<32x256xf32> to vector<16x256xf32>
    %150 = vector.broadcast %148 : vector<1x256xf32> to vector<16x256xf32>
    %151 = arith.mulf %150, %149 : vector<16x256xf32>
    %152 = arith.addf %141, %151 : vector<16x256xf32>
    %153 = vector.extract_strided_slice %133 {offsets = [1, 0], sizes = [1, 256], strides = [1, 1]} : vector<2x256xf32> to vector<1x256xf32>
    %154 = vector.extract_strided_slice %147 {offsets = [16, 0], sizes = [16, 256], strides = [1, 1]} : vector<32x256xf32> to vector<16x256xf32>
    %155 = vector.broadcast %153 : vector<1x256xf32> to vector<16x256xf32>
    %156 = arith.mulf %155, %154 : vector<16x256xf32>
    %157 = arith.addf %145, %156 : vector<16x256xf32>
    %c2_53 = arith.constant 2 : index
    %c0_54 = arith.constant 0 : index
    %c0_55 = arith.constant 0 : index
    %158 = vector.load %arg7[%c2_53, %c0_54, %c0_55] : memref<4x32x256xf32, #tpu.memory_space<vmem>>, vector<1x32x256xf32>
    %159 = vector.shape_cast %158 : vector<1x32x256xf32> to vector<32x256xf32>
    %160 = vector.extract_strided_slice %134 {offsets = [0, 0], sizes = [1, 256], strides = [1, 1]} : vector<2x256xf32> to vector<1x256xf32>
    %161 = vector.extract_strided_slice %159 {offsets = [0, 0], sizes = [16, 256], strides = [1, 1]} : vector<32x256xf32> to vector<16x256xf32>
    %162 = vector.broadcast %160 : vector<1x256xf32> to vector<16x256xf32>
    %163 = arith.mulf %162, %161 : vector<16x256xf32>
    %164 = arith.addf %152, %163 : vector<16x256xf32>
    %165 = vector.extract_strided_slice %134 {offsets = [1, 0], sizes = [1, 256], strides = [1, 1]} : vector<2x256xf32> to vector<1x256xf32>
    %166 = vector.extract_strided_slice %159 {offsets = [16, 0], sizes = [16, 256], strides = [1, 1]} : vector<32x256xf32> to vector<16x256xf32>
    %167 = vector.broadcast %165 : vector<1x256xf32> to vector<16x256xf32>
    %168 = arith.mulf %167, %166 : vector<16x256xf32>
    %169 = arith.addf %157, %168 : vector<16x256xf32>
    %c3_56 = arith.constant 3 : index
    %c0_57 = arith.constant 0 : index
    %c0_58 = arith.constant 0 : index
    %170 = vector.load %arg7[%c3_56, %c0_57, %c0_58] : memref<4x32x256xf32, #tpu.memory_space<vmem>>, vector<1x32x256xf32>
    %171 = vector.shape_cast %170 : vector<1x32x256xf32> to vector<32x256xf32>
    %172 = vector.extract_strided_slice %135 {offsets = [0, 0], sizes = [1, 256], strides = [1, 1]} : vector<2x256xf32> to vector<1x256xf32>
    %173 = vector.extract_strided_slice %171 {offsets = [0, 0], sizes = [16, 256], strides = [1, 1]} : vector<32x256xf32> to vector<16x256xf32>
    %174 = vector.broadcast %172 : vector<1x256xf32> to vector<16x256xf32>
    %175 = arith.mulf %174, %173 : vector<16x256xf32>
    %176 = arith.addf %164, %175 : vector<16x256xf32>
    %177 = vector.extract_strided_slice %135 {offsets = [1, 0], sizes = [1, 256], strides = [1, 1]} : vector<2x256xf32> to vector<1x256xf32>
    %178 = vector.extract_strided_slice %171 {offsets = [16, 0], sizes = [16, 256], strides = [1, 1]} : vector<32x256xf32> to vector<16x256xf32>
    %179 = vector.broadcast %177 : vector<1x256xf32> to vector<16x256xf32>
    %180 = arith.mulf %179, %178 : vector<16x256xf32>
    %181 = arith.addf %169, %180 : vector<16x256xf32>
    %182 = tpu.concatenate %176, %181 in 0 : vector<16x256xf32>, vector<16x256xf32> -> vector<32x256xf32>
    %183 = vector.broadcast %6 : vector<32x1xf32> to vector<32x256xf32>
    %184 = arith.addf %182, %183 : vector<32x256xf32>
    %c0_59 = arith.constant 0 : index
    %c0_60 = arith.constant 0 : index
    %185 = vector.load %arg1[%c0_59, %c0_60] : memref<32x256xf32, #tpu.memory_space<vmem>>, vector<32x256xf32>
    %186 = arith.addf %184, %185 : vector<32x256xf32>
    %cst_61 = arith.constant dense<0.000000e+00> : vector<256xf32>
    %187 = vector.multi_reduction <add>, %186, %cst_61 [0] : vector<32x256xf32> to vector<256xf32>
    %188 = vector.shape_cast %187 : vector<256xf32> to vector<1x256xf32>
    %cst_62 = arith.constant 3.200000e+01 : f32
    %189 = vector.broadcast %cst_62 : f32 to vector<1x256xf32>
    %190 = arith.divf %188, %189 : vector<1x256xf32>
    %191 = vector.broadcast %190 : vector<1x256xf32> to vector<32x256xf32>
    %192 = arith.subf %186, %191 : vector<32x256xf32>
    %193 = arith.mulf %192, %192 : vector<32x256xf32>
    %cst_63 = arith.constant dense<0.000000e+00> : vector<256xf32>
    %194 = vector.multi_reduction <add>, %193, %cst_63 [0] : vector<32x256xf32> to vector<256xf32>
    %195 = vector.shape_cast %194 : vector<256xf32> to vector<1x256xf32>
    %cst_64 = arith.constant 3.200000e+01 : f32
    %196 = vector.broadcast %cst_64 : f32 to vector<1x256xf32>
    %197 = arith.divf %195, %196 : vector<1x256xf32>
    %cst_65 = arith.constant 9.99999974E-6 : f32
    %198 = vector.broadcast %cst_65 : f32 to vector<1x256xf32>
    %199 = arith.addf %197, %198 : vector<1x256xf32>
    %200 = math.rsqrt %199 : vector<1x256xf32>
    %201 = vector.broadcast %200 : vector<1x256xf32> to vector<32x256xf32>
    %202 = arith.mulf %192, %201 : vector<32x256xf32>
    %203 = vector.broadcast %8 : vector<32x1xf32> to vector<32x256xf32>
    %204 = arith.mulf %202, %203 : vector<32x256xf32>
    %205 = vector.broadcast %9 : vector<32x1xf32> to vector<32x256xf32>
    %206 = arith.addf %204, %205 : vector<32x256xf32>
    %207 = arith.truncf %206 : vector<32x256xf32> to vector<32x256xbf16>
    %cst_66 = arith.constant dense<0.000000e+00> : vector<32x256xf32>
    %208 = tpu.matmul %2, %207, %cst_66 {dimension_numbers = #tpu.dot_dimension_numbers<[1], [0], [0], [1], [0, 0, 1, 1], [], []>} : vector<32x32xbf16>, vector<32x256xbf16>, vector<32x256xf32> -> vector<32x256xf32>
    %209 = vector.broadcast %7 : vector<32x1xf32> to vector<32x256xf32>
    %210 = arith.addf %208, %209 : vector<32x256xf32>
    %cst_67 = arith.constant 0.000000e+00 : f32
    %211 = vector.broadcast %cst_67 : f32 to vector<32x256xf32>
    %212 = arith.maximumf %210, %211 : vector<32x256xf32>
    %c0_68 = arith.constant 0 : index
    %c0_69 = arith.constant 0 : index
    %213 = vector.load %arg6[%c0_68, %c0_69] : memref<32x256xf32, #tpu.memory_space<vmem>>, vector<32x256xf32>
    tpu.vector_store %arg6[%c0_68, %c0_69], %212 {strides = array<i32>} : memref<32x256xf32, #tpu.memory_space<vmem>>, vector<32x256xf32>,
    return
  }
  func.func @transform_0(%arg0: i32) -> (i32, i32) {
    %c0_i32 = arith.constant 0 : i32
    %c0_i32_0 = arith.constant 0 : i32
    return %c0_i32, %arg0 : i32, i32
  }
  func.func @transform_1(%arg0: i32) -> (i32, i32) {
    %c0_i32 = arith.constant 0 : i32
    %c0_i32_0 = arith.constant 0 : i32
    return %c0_i32, %arg0 : i32, i32
  }
  func.func @transform_2(%arg0: i32) -> (i32, i32) {
    %c0_i32 = arith.constant 0 : i32
    %c0_i32_0 = arith.constant 0 : i32
    return %c0_i32, %arg0 : i32, i32
  }
  func.func @transform_3(%arg0: i32) -> (i32, i32) {
    %c0_i32 = arith.constant 0 : i32
    %c0_i32_0 = arith.constant 0 : i32
    %c0_i32_1 = arith.constant 0 : i32
    return %c0_i32, %c0_i32_0 : i32, i32
  }
  func.func @transform_4(%arg0: i32) -> (i32, i32) {
    %c0_i32 = arith.constant 0 : i32
    %c0_i32_0 = arith.constant 0 : i32
    %c0_i32_1 = arith.constant 0 : i32
    return %c0_i32, %c0_i32_0 : i32, i32
  }
  func.func @transform_5(%arg0: i32) -> (i32, i32) {
    %c0_i32 = arith.constant 0 : i32
    %c0_i32_0 = arith.constant 0 : i32
    return %c0_i32, %arg0 : i32, i32
  }
}

</mosaic_0001>

<bundles_post_ra>
// kernel: tpu_custom_call.1
= control target key start
LH: loop header
LB: loop body
LE: loop exit
PB: predicated region body
PF: predicated region fallthrough
CT: control target
= control target key end

     0   :  { %s6354_s0 = inlined_call_operand.hbm [shape: f32[32,512], index: 0, kind: input, shape index: {}]   ;;  %s6355_s1 = inlined_call_operand.hbm [shape: bf16[64,512], index: 1, kind: input, shape index: {}]   ;;  %s6356_s2 = inlined_call_operand.vmem [shape: f32[8,512], index: 2, kind: input, shape index: {}]   ;;  %s6357_s3 = inlined_call_operand.vmem [shape: bf16[128,32], index: 3, kind: input, shape index: {}]   ;;  %s6358_s4 = inlined_call_operand.vmem [shape: f32[32,8], index: 4, kind: input, shape index: {}]   ;;  %s6359_s5 = inlined_call_operand.hbm [shape: f32[32,512], index: 5, kind: output, shape index: {}]  }
   0x1   :  { %6376 = sst [smem:[#allocation17_spill]] %s6354_s0 }
   0x2   :  { %10 = vsyncpa [#allocation4], 0 }
   0x3   :  { %12 = vsyncpa [#allocation4 + $0x1], 0 }
   0x4   :  { %13 = vsyncpa [#allocation7], 0 }
   0x5   :  { %15 = vsyncpa [#allocation7 + $0x1], 0 }
   0x6   :  { %16 = vsyncpa [#allocation5], 0 }
   0x7   :  { %18 = vsyncpa [#allocation5 + $0x1], 0  ;;  %s4018_s18 = smov 0   ;;  %s4020_s19 = smov 0  }
   0x8   :  { %s4022_s20 = smov 0   ;;  %s4024_s21 = smov 0  }
   0x9 LB: > { %s4039_s22 = sadd.s32 4294967295, %s3961_s21   ;;  %s3417_s23 = sadd.s32 4294967294, %s3961_s21   ;;  %s3961_s21 = sphi %s4024_s21, %s6446_s21   ;;  %s3957_s20 = sphi %s4022_s20, %s6445_s20   ;;  %s3953_s19 = sphi %s4020_s19, %s6444_s19   ;;  %s3949_s18 = sphi %s4018_s18, %s6443_s18  }
   0xa   : > { %s4043_s24 = sadd.s32 1, %s3961_s21   ;;  %s31_s25 = sadd.s32 1, %s3957_s20 }
   0xb   : > { %s28_s26 = ssub.s32 %s3961_s21, %s4043_s24  ;;  %p38_p0 = scmp.ne.s32.totalorder %s3957_s20, %s3953_s19 }
   0xc   : > { %p29_p1 = scmp.eq.s32.totalorder %s28_s26, 0  ;;  %p39_p2 = scmp.eq.s32.totalorder %s3961_s21, 0 }
   0xd   : > { %p44_p3 = scmp.ne.s32.totalorder %s3953_s19, %s3949_s18  ;;  %p45_p4 = scmp.eq.s32.totalorder %s4039_s22, 0 }
   0xe   : > { %s4055_s27 = scalar_select %p29_p1, %s3957_s20, %s31_s25  }
   0xf   : > { %p4057_p5 = por %p39_p2, %p38_p0  ;;  %p4061_p6 = por %p45_p4, %p44_p3 }
  0x10   : > { %p162_p7 = scmp.eq.s32.totalorder %s4039_s22, 1  ;;  %p168_p8 = scmp.eq.s32.totalorder %s3417_s23, 1 }
  0x11   : > { %s6378_s29 = scalar_select %p4061_p6, 1, 0 }
  0x12   : > { %p3624_p10 = scmp.lt.s32.totalorder %s3961_s21, 2  ;;  %p4068_p11 = por %p162_p7, %p38_p0 }
  0x13   : > { %p4072_p12 = por %p168_p8, %p44_p3  ;;  %s4077_s7 = sand.u32 1, %s3957_s20  }
  0x14   : > { %s6379_s30 = scalar_select %p4068_p11, 1, 0 }
  0x15   : > { %s6380_s6 = scalar_select %p4072_p12, 1, 0 }
  0x16   : > { %s3540_s8 = sshll.u32 %s3961_s21, 8  ;;  %s3420_s9 = sshll.u32 %s4077_s7, 6 }
  0x17   : > { %s6381_s0 = sld [smem:[#allocation17_spill]]  ;;  %s198_s13 = scalar_lea.vmem [#allocation3], %s3420_s9 }
  0x18   : > { %s205_s14 = sshll.u32 %s198_s13, 4  ;;  %p4090_p13 = pnand %p3624_p10, %p4057_p5  ;;  %s4094_s14 = int_to_ptr.vmem [resolvable:$true] %s205_s14 }
  0x19   : > { %s195_s16 = scalar_lea.sflag [#allocation4], %s4077_s7 }
  0x1a   : > { %p3833_p2 = pneg %p4090_p13 }
  0x1d   : > { %s4084_s12 = scalar_lea.hbm %s6381_s0, %s3540_s8  ;;  %s3836_s26 = scalar_lea.hbm %s6381_s0, 2048 }
  0x1e   : > { %s3831_s17 = scalar_lea.hbm %s4084_s12, 1024  ;;  %p3837_p5 = scmp.lt.u32.totalorder %s4084_s12, %s6381_s0 }
  0x1f   : > { %p3832_p1 = scmp.ne.s32.totalorder %s4084_s12, %s3831_s17  ;;  %p3838_p7 = scmp.lt.u32.totalorder %s3836_s26, %s3831_s17 }
  0x20   : > { %p3840_p10 = scmp.lt.u32.totalorder %s3831_s17, %s4084_s12 }
  0x21   : > { %p3834_p3 = pnand %p3833_p2, %p3832_p1  ;;  %p3839_p8 = por %p3838_p7, %p3837_p5 }
  0x23   : > { %p3835_p4 = pneg %p3834_p3  ;;  %p3841_p9 = por %p3840_p10, %p3839_p8 }
  0x25   : > { %p3842_p0 = pnand %p3841_p9, %p3835_p4 }
  0x27   : > { %3845 = shalt.err (!%p3842_p0)
}
  0x28   : > { %s3846_s10 = scalar_lea.vmem %s4094_s14, 1024  ;;  %s3963_s11 = smov [#allocation3]  }
  0x29   : > { %p3847_p1 = scmp.ne.s32.totalorder %s4094_s14, %s3846_s10  ;;  %s3851_s13 = sshll.u32 %s3963_s11, 4  ;;  %s3852_s13 = int_to_ptr.vmem [resolvable:$false] %s3851_s13 }
  0x2a   : > { %s3853_s23 = scalar_lea.vmem %s3852_s13, 2048  ;;  %p3854_p11 = scmp.lt.s32.totalorder %s4094_s14, %s3852_s13 }
  0x2b   : > { %p3849_p3 = pnand %p3847_p1, %p3833_p2  ;;  %p3855_p5 = scmp.lt.s32.totalorder %s3853_s23, %s3846_s10 }
  0x2d   : > { %p3850_p12 = pneg %p3849_p3  ;;  %p3856_p7 = por %p3855_p5, %p3854_p11 }
  0x2f   : > { %p3857_p8 = pnand %p3856_p7, %p3850_p12 }
  0x31   : > { %3860 = shalt.err (!%p3857_p8)
}
  0x32   : > { %s3964_s17 = smov 512   ;;  %s3965_s25 = smov 256  }
  0x33   : > { %s3966_s26 = smov 16   ;;  %p243_p9 = scmp.lt.s32.totalorder %s3961_s21, 3 }
  0x34   : > { %3616 = dma.hbm_to_vmem [thread:$0]  (!%p4090_p13), %s4084_s12, 1024, %s4094_s14, %s195_s16, %s3964_s17, %s3965_s25, %s3966_s26  }
  0x35   : > { %s3541_s28 = sshll.u32 %s3961_s21, 7  ;;  %p6383_p11 = scmp.ge.s32.totalorder %s3961_s21, 1 }
  0x36   : > { %s4137_s13 = scalar_lea.hbm %s6355_s1, %s3541_s28  ;;  %s219_s23 = scalar_lea.vmem [#allocation6], %s3420_s9 }
  0x37   : > { %p4130_p12 = pnand %p6383_p11, %p243_p9  ;;  %s226_s0 = sshll.u32 %s219_s23, 4  ;;  %s4141_s0 = int_to_ptr.vmem [resolvable:$true] %s226_s0 }
  0x38   : > { %s216_s12 = scalar_lea.sflag [#allocation7], %s4077_s7  ;;  %s3861_s14 = scalar_lea.hbm %s4137_s13, 1024 }
  0x39   : > { %p3862_p0 = scmp.ne.s32.totalorder %s4137_s13, %s3861_s14  ;;  %s3866_s26 = scalar_lea.hbm %s6355_s1, 2048 }
  0x3a   : > { %p3867_p1 = scmp.lt.u32.totalorder %s4137_s13, %s6355_s1  ;;  %p3868_p3 = scmp.lt.u32.totalorder %s3866_s26, %s3861_s14 }
  0x3b   : > { %p3864_p4 = pnand %p3862_p0, %p3833_p2  ;;  %p3870_p7 = scmp.lt.u32.totalorder %s3861_s14, %s4137_s13 }
  0x3c   : > { %p3869_p5 = por %p3868_p3, %p3867_p1 }
  0x3d   : > { %p3865_p10 = pneg %p3864_p4 }
  0x3e   : > { %p3871_p8 = por %p3870_p7, %p3869_p5 }
  0x40   : > { %p3872_p9 = pnand %p3871_p8, %p3865_p10 }
  0x42   : > { %3875 = shalt.err (!%p3872_p9)
}
  0x43   : > { %s3876_s9 = scalar_lea.vmem %s4141_s0, 1024  ;;  %s3967_s11 = smov [#allocation6]  }
  0x44   : > { %p3877_p11 = scmp.ne.s32.totalorder %s4141_s0, %s3876_s9  ;;  %s3881_s23 = sshll.u32 %s3967_s11, 4  ;;  %s3882_s23 = int_to_ptr.vmem [resolvable:$false] %s3881_s23 }
  0x45   : > { %s3883_s16 = scalar_lea.vmem %s3882_s23, 2048  ;;  %p3884_p6 = scmp.lt.s32.totalorder %s4141_s0, %s3882_s23 }
  0x46   : > { %p3879_p0 = pnand %p3877_p11, %p3833_p2  ;;  %p3885_p1 = scmp.lt.s32.totalorder %s3883_s16, %s3876_s9 }
  0x48   : > { %p3880_p4 = pneg %p3879_p0  ;;  %p3886_p3 = por %p3885_p1, %p3884_p6 }
  0x4a   : > { %p3887_p5 = pnand %p3886_p3, %p3880_p4 }
  0x4c   : > { %3890 = shalt.err (!%p3887_p5)
}
  0x4d   : > { %s3968_s14 = smov 128   ;;  %s3969_s17 = smov 8  }
  0x4e   : > { %3619 = dma.hbm_to_vmem [thread:$0]  (!%p4090_p13), %s4137_s13, 1024, %s4141_s0, %s216_s12, %s3965_s25, %s3968_s14, %s3969_s17  }
  0x4f   : > { %247 = sbr.rel (%p4130_p12) target bundleno = 1277 (0x4fd), region = 40 }
  0x56   : > { %s4173_s26 = sand.u32 1, %s3953_s19   ;;  %p6385_p6 = scmp.ne.s32.totalorder %s6378_s29, 0 }
  0x57   : > { %s4176_s28 = sshll.u32 %s4173_s26, 6  ;;  %s250_s10 = scalar_lea.sflag [#allocation4], %s4173_s26 }
  0x58   : > { %s4180_s9 = scalar_lea.vmem [#allocation3], %s4176_s28 }
  0x59   : > { %3936 = dma.done.wait (%p6385_p6), %s250_s10, 1024  }
  0x5a   : > { %3938 = vsyncadd (%p6385_p6), %s250_s10, 4294966272  ;;  %s259_s0 = scalar_lea.sflag [#allocation7], %s4173_s26  ;;  %s4188_s7 = scalar_lea.vmem [#allocation6], %s4176_s28 }
  0x5b   : > { %3940 = dma.done.wait (%p6385_p6), %s259_s0, 1024  }
  0x5c   : > { %3942 = vsyncadd (%p6385_p6), %s259_s0, 4294966272  ;;  %s3430_s15 = sshll.u32 %s4039_s22, 1  ;;  %v503_v0 = vlaneseq  ;;  %v3970_v1 = vmov 7   ;;  %v3971_v2 = vmov 6   ;;  %v325_v6 = vld [vmem:[%s6358_s4] sm:$0xff]  ;;  %v326_v7 = vld [vmem:[%s6358_s4 + $0x8] sm:$0xff] }
  0x5d   : > { %3681 = vset.pattern.permute.xlu1 %v3970_v1  ;;  %3680 = vset.pattern.permute.xlu0 %v3971_v2  ;;  %p302_p13 = scmp.lt.s32.totalorder %s3430_s15, 3  ;;  %v348_v18 = vld [vmem:[%s4180_s9 + $0x8] sm:$0xff]  ;;  %v350_v19 = vld [vmem:[%s4180_s9 + $0x18] sm:$0xff]  ;;  %v347_v20 = vld [vmem:[%s4180_s9] sm:$0xff]  ;;  %v6362_v25 = vmov 0   ;;  %vm387_vm0 = vcmask 261120  }
  0x5e   : > { %v504_v3 = vshrl.u32 %v503_v0, 7  ;;  %340 = vperm.xlu1 %3681, %v325_v6   ;;  %331 = vperm.xlu0 %3680, %v325_v6   ;;  %v356_v21 = vpack.c.bf16 %v350_v19, %v348_v18  ;;  %v349_v22 = vld [vmem:[%s4180_s9 + $0x10] sm:$0xff]  ;;  %v352_v23 = vld [vmem:[%s4180_s9 + $0x28] sm:$0xff]  ;;  %v354_v24 = vld [vmem:[%s4180_s9 + $0x38] sm:$0xff]  ;;  %s3542_s8 = sshll.u32 %s4039_s22, 8  ;;  %s3296_s22 = scalar_lea.sflag [#allocation5], %s4173_s26 }
  0x5f   : > { %s6448_s15 = smov (!%p302_p13, %s3430_s15), 3  ;;  %426 = vmatprep.mubr.bf16.mxu0 %v6362_v25  ;;  %1009 = vmatprep.mubr.bf16.mxu1 %v6362_v25  ;;  %v355_v26 = vpack.c.bf16 %v349_v22, %v347_v20  ;;  %v358_v27 = vpack.c.bf16 %v354_v24, %v352_v23  ;;  %v351_v28 = vld [vmem:[%s4180_s9 + $0x20] sm:$0xff]  ;;  %v353_v29 = vld [vmem:[%s4180_s9 + $0x30] sm:$0xff]  ;;  %v3697_v36 = vld [vmem:[%s6357_s3 + $0x8] sm:$0xff]   ;;  %v3973_v24 = vmov 683565275  }
  0x60   : > { %v505_v4 = vsub.s32 0, %v504_v3  ;;  %s3431_s25 = sshll.u32 %s6448_s15, 3  ;;  %v4195_v5 = vsub.s32 1, %v504_v3  ;;  %394 = vmatprep.subr.bf16.mxu0 %v356_v21  ;;  %v3698_v30 = vld [vmem:[%s4188_s7 + $0x4] ss:$8 sps:$4 sm:$0xff]   ;;  %v357_v31 = vpack.c.bf16 %v353_v29, %v351_v28  ;;  %p6440_p12 = scmp.ne.s32.totalorder %s6379_s30, 0 }
  0x61   : > { %s305_s12 = scalar_lea.vmem %s6356_s2, %s3431_s25  ;;  %395 = vmatpush1.bf16.msra.mxu0 %v355_v26  ;;  %v3703_v32 = vld [vmem:[%s4188_s7] ss:$8 sps:$4 sm:$0xff]   ;;  %977 = vmatprep.subr.bf16.mxu1 %v3698_v30  ;;  %v3702_v33 = vld [vmem:[%s4188_s7 + $0x14] ss:$8 sps:$4 sm:$0xff]   ;;  %v3700_v35 = vld [vmem:[%s4188_s7 + $0x10] ss:$8 sps:$4 sm:$0xff]  }
  0x62   : > { %v501_v8 = vld [vmem:[%s305_s12] ss:$8 sm:$0x3]  ;;  %v3462_v10 = vld [vmem:[%s305_s12 + $0x1] ss:$8 sm:$0x3]  ;;  %344 = vperm.xlu1 %3681, %v326_v7   ;;  %336 = vperm.xlu0 %3680, %v326_v7  }
  0x63   : > { %v4206_v9 = vrot.slane %v501_v8, %v505_v4  ;;  %v3485_v11 = vld [vmem:[%s305_s12 + $0x2] ss:$8 sm:$0x3]  ;;  %v4208_v12 = vrot.slane %v3462_v10, %v505_v4  ;;  %v3508_v15 = vld [vmem:[%s305_s12 + $0x3] ss:$8 sm:$0x3]  ;;  %396 = vmatprep.subr.bf16.mxu0 %v358_v27  ;;  %978 = vmatpush1.bf16.msra.mxu1 %v3703_v32  ;;  %v510_v38 = vrot.slane %v501_v8, %v4195_v5  ;;  %s6310_s12 = scalar_lea.hbm %s6359_s5, %s3542_s8 }
  0x64   : > { %v4210_v13 = vrot.slane %v3485_v11, %v505_v4  ;;  %v4213_v14 = vrot.slane %v3485_v11, %v4195_v5  ;;  %v4215_v16 = vrot.slane %v3508_v15, %v505_v4  ;;  %v4218_v17 = vrot.slane %v3508_v15, %v4195_v5  ;;  %v3696_v34 = vld [vmem:[%s6357_s3] sm:$0xff]   ;;  %s298_s25 = scalar_lea.vmem [#allocation8], %s4176_s28  ;;  %s3984_s11 = smov [#allocation8]  }
  0x65   : > { %397 = vmatpush1.bf16.msra.mxu0 %v357_v31  ;;  %v1122_v50 = vrot.slane %v3462_v10, %v4195_v5  ;;  %v6373_v29 = vmov 2475754826   ;;  %v6367_v31 = vmov 2131351028   ;;  %s3895_s23 = sshll.u32 %s3984_s11, 4  ;;  %s3896_s23 = int_to_ptr.vmem [resolvable:$false] %s3895_s23 }
  0x66   : > { %3683 = vset.pattern.permute.xlu1 %v6362_v25  ;;  %3682 = vset.pattern.permute.xlu0 %v6362_v25  ;;  %s3897_s16 = scalar_lea.vmem %s3896_s23, 2048 }
  0x67   : > { %364 = vperm.xlu1 %3683, %v326_v7   ;;  %360 = vperm.xlu0 %3682, %v325_v6  }
  0x68   : > { %1557 = vmatprep.subr.bf16.mxu0 %v3702_v33  ;;  %3434 = vmatmul.mubr.msk.bf16.vlgmr.msra.gmra.mrb[0].mxu0 %vm387_vm0, %v3696_v34  ;;  %v6371_v33 = vmov 2102212464   ;;  %v3977_v34 = vmov 920167782  }
  0x69   : > { %436 = vmatprep.mubr.bf16.mxu0 %v6362_v25  ;;  %1558 = vmatpush1.bf16.msra.mxu0 %v3700_v35 }
  0x70   : > { %3435 = vmatmul.mubr.msk.bf16.gmra.mrb[4].mxu0 %vm387_vm0, %v3697_v36 }
  0x71   : > { %1589 = vmatprep.mubr.bf16.mxu0 %v6362_v25 }
  0xdd   : > { %v332_v37 = vpop.permute.xlu0 %331  ;;  %v4257_v46 = vpop.permute.xlu1 %340 }
  0xde   : > { %v513_v39 = vmul.f32 %v4206_v9, %v332_v37  ;;  %v1125_v40 = vmul.f32 %v4208_v12, %v332_v37  ;;  %v1706_v41 = vmul.f32 %v4210_v13, %v332_v37  ;;  %v4251_v42 = vmul.f32 %v4213_v14, %v332_v37 }
  0xdf   : > { %v2287_v43 = vmul.f32 %v4215_v16, %v332_v37  ;;  %v4255_v44 = vmul.f32 %v4218_v17, %v332_v37  ;;  %v514_v45 = vmul.f32 %v510_v38, %v332_v37  ;;  %v1126_v55 = vmul.f32 %v1122_v50, %v332_v37 }
  0xe0   : > { %v4277_v59 = vadd.f32 %v1125_v40, %v4257_v46  ;;  %v4283_v62 = vadd.f32 %v1706_v41, %v4257_v46  ;;  %v4295_v6 = vadd.f32 %v513_v39, %v4257_v46  ;;  %v6365_v41 = vmov 1326507024  }
  0xe1   : > { %v4259_v47 = vpop.permute.xlu0 %336  ;;  %v4262_v48 = vadd.f32 %v514_v45, %v4257_v46  ;;  %v4266_v51 = vpop.permute.xlu1 %344  ;;  %v4280_v61 = vadd.f32 %v1126_v55, %v4257_v46  ;;  %v4286_v63 = vadd.f32 %v2287_v43, %v4257_v46 }
  0xe2   : > { %v516_v49 = vmul.f32 %v510_v38, %v4259_v47  ;;  %v1136_v4 = vand.u32 2139095040, %v4277_v59  ;;  %v4299_v7 = vmul.f32 %v4206_v9, %v4259_v47  ;;  %v1127_v8 = vmul.f32 %v4208_v12, %v4259_v47 }
  0xe3   : > { %v627_v52 = vand.u32 2139095040, %v4262_v48  ;;  %v624_v54 = vand.u32 2147483647, %v4262_v48  ;;  %v1239_v11 = vand.u32 2139095040, %v4280_v61  ;;  %v1717_v15 = vand.u32 2139095040, %v4283_v62 }
  0xe4   : > { %v4270_v53 = vadd.f32 %v516_v49, %v4266_v51  ;;  %v2298_v18 = vand.u32 2139095040, %v4286_v63  ;;  %v4307_v21 = vmul.f32 %v1122_v50, %v4259_v47  ;;  %v4311_v22 = vmul.f32 %v4210_v13, %v4259_v47 }
  0xe5   : > { %v628_v56 = vshrl.u32 %v627_v52, 23  ;;  %v631_v57 = vand.u32 8388607, %v624_v54  ;;  %v1240_v28 = vshrl.u32 %v1239_v11, 23 }
  0xe6   : > { %v830_v58 = vand.u32 2147483647, %v4270_v53  ;;  %v833_v1 = vand.u32 2139095040, %v4270_v53 }
  0xe7   : > { %v3440_v60 = vadd.s32 4294967169, %v628_v56  ;;  %v632_v2 = vor.u32 8388608, %v631_v57 }
  0xe8   : > { %v4291_v3 = vand.u32 8388607, %v830_v58  ;;  %v834_v5 = vshrl.u32 %v833_v1, 23 }
  0xe9   : > { %v634_v0 = vadd.s32 1, %v3440_v60  ;;  %v4313_v9 = vshll.u32 %v632_v2, 8 }
  0xea   : > { %v838_v12 = vor.u32 8388608, %v4291_v3  ;;  %v3448_v27 = vadd.s32 4294967169, %v834_v5 }
  0xeb   : > { %vm635_vm1 = vcmp.gt.s32.totalorder %v634_v0, 0 }
  0xec   : > { %v636_v10 = vsel %vm635_vm1, %v634_v0, 0  ;;  %v840_v52 = vadd.s32 1, %v3448_v27 }
  0xed   : > { %v637_v19 = vshrl.u32 %v636_v10, 5  ;;  %v638_v20 = vand.u32 31, %v636_v10 }
  0xee   : > { %vm841_vm6 = vcmp.gt.s32.totalorder %v840_v52, 0 }
  0xef   : > { %v639_v23 = vsub.s32 32, %v638_v20  ;;  %v641_v26 = vshll.u32 %v3973_v24, %v638_v20  ;;  %v644_v30 = vshll.u32 %v6373_v29, %v638_v20  ;;  %v647_v32 = vshll.u32 %v6367_v31, %v638_v20 }
  0xf0   : > { %v650_v13 = vshll.u32 %v6371_v33, %v638_v20  ;;  %v653_v35 = vshll.u32 %v3977_v34, %v638_v20  ;;  %vm656_vm2 = vcmp.lt.s32.totalorder %v637_v19, 1  ;;  %vm657_vm3 = vcmp.lt.s32.totalorder %v637_v19, 2 }
  0xf1   : > { %v642_v36 = vshrl.u32 %v6373_v29, %v639_v23  ;;  %v645_v37 = vshrl.u32 %v6367_v31, %v639_v23  ;;  %v648_v38 = vshrl.u32 %v6371_v33, %v639_v23  ;;  %v640_v39 = vshrl.u32 %v3973_v24, %v639_v23 }
  0xf2   : > { %v651_v40 = vshrl.u32 %v3977_v34, %v639_v23  ;;  %v654_v43 = vshrl.u32 %v6365_v41, %v639_v23  ;;  %vm658_vm4 = vcmp.lt.s32.totalorder %v637_v19, 3  ;;  %vm659_vm5 = vcmp.lt.s32.totalorder %v637_v19, 4 }
  0xf3   : > { %v643_v45 = vor.u32 %v642_v36, %v641_v26  ;;  %v646_v49 = vor.u32 %v645_v37, %v644_v30  ;;  %v649_v50 = vor.u32 %v648_v38, %v647_v32  ;;  %v842_v20 = vsel %vm841_vm6, %v840_v52, 0 }
  0xf4   : > { %v652_v55 = vor.u32 %v651_v40, %v650_v13  ;;  %v655_v56 = vor.u32 %v654_v43, %v653_v35  ;;  %v3467_v23 = vadd.s32 4294967169, %v1240_v28  ;;  %v4333_v32 = vshrl.u32 %v842_v20, 5 }
  0xf5   : > { %v660_v57 = vsel %vm656_vm2, %v640_v39, %v643_v45  ;;  %v661_v60 = vsel %vm659_vm5, %v649_v50, 2102212464  ;;  %v664_v0 = vsel %vm656_vm2, %v643_v45, %v646_v49  ;;  %v668_v1 = vsel %vm656_vm2, %v646_v49, %v649_v50 }
  0xf6   : > { %v662_v2 = vsel %vm658_vm4, %v646_v49, %v661_v60  ;;  %v665_v3 = vsel %vm659_vm5, %v652_v55, 920167782  ;;  %v669_v5 = vsel %vm659_vm5, %v655_v56, 1326507024  ;;  %v4346_v28 = vshrl.u32 %v1136_v4, 23 }
  0xf7   : > { %v666_v10 = vsel %vm658_vm4, %v649_v50, %v665_v3  ;;  %v670_v11 = vsel %vm658_vm4, %v652_v55, %v669_v5  ;;  %v663_v26 = vsel %vm657_vm3, %v660_v57, %v662_v2  ;;  %v4349_v38 = vadd.f32 %v1127_v8, %v4266_v51 }
  0xf8   : > { %v667_v27 = vsel %vm657_vm3, %v664_v0, %v666_v10  ;;  %v671_v30 = vsel %vm657_vm3, %v668_v1, %v670_v11  ;;  %v4353_v19 = vmul.f32 %v4213_v14, %v4259_v47  ;;  %v844_v39 = vand.u32 31, %v842_v20 }
  0xf9   : > { %v4336_v13 = vmul.u32.u64.low %v4313_v9, %v671_v30  ;;  %v4337_v35 = vmul.u32.u64.high %v4313_v9, %v671_v30, %v4336_v13  ;;  %v4340_v36 = vmul.u32.u64.low %v4313_v9, %v667_v27  ;;  %v4341_v37 = vmul.u32.u64.high %v4313_v9, %v667_v27, %v4340_v36 }
  0xfa   : > { %v4357_v40 = vmul.f32 %v4215_v16, %v4259_v47  ;;  %v679_v43 = vmul.u32 %v4313_v9, %v663_v26  ;;  %v4360_v45 = vshll.u32 %v838_v12, 8  ;;  %v1236_v49 = vand.u32 2147483647, %v4280_v61 }
  0xfb   : > { %v845_v4 = vsub.s32 32, %v844_v39  ;;  %v847_v50 = vshll.u32 %v3973_v24, %v844_v39  ;;  %vm862_vm7 = vcmp.lt.s32.totalorder %v4333_v32, 1  ;;  %v1246_v8 = vadd.s32 1, %v3467_v23 }
  0xfc   : > { %vm681_vm8 = vc.u32 %v4337_v35, %v4340_v36  ;;  %v682_v14 = vadd.s32 1, %v4341_v37  ;;  %v850_v16 = vshll.u32 %v6373_v29, %v844_v39  ;;  %v853_v52 = vshll.u32 %v6367_v31, %v844_v39 }
  0xfd   : > { %v848_v9 = vshrl.u32 %v6373_v29, %v845_v4  ;;  %v851_v12 = vshrl.u32 %v6367_v31, %v845_v4  ;;  %v854_v55 = vshrl.u32 %v6371_v33, %v845_v4  ;;  %v856_v56 = vshll.u32 %v6371_v33, %v844_v39 }
  0xfe   : > { %v683_v57 = vsel %vm681_vm8, %v682_v14, %v4341_v37  ;;  %v857_v60 = vshrl.u32 %v3977_v34, %v845_v4  ;;  %v859_v0 = vshll.u32 %v3977_v34, %v844_v39  ;;  %v860_v1 = vshrl.u32 %v6365_v41, %v845_v4 }
  0xff   : > { %v684_v2 = vadd.s32 %v683_v57, %v679_v43  ;;  %v849_v3 = vor.u32 %v848_v9, %v847_v50  ;;  %v852_v5 = vor.u32 %v851_v12, %v850_v16  ;;  %v855_v10 = vor.u32 %v854_v55, %v853_v52 }
 0x100   : > { %v858_v11 = vor.u32 %v857_v60, %v856_v56  ;;  %v861_v20 = vor.u32 %v860_v1, %v859_v0  ;;  %vm864_vm9 = vcmp.lt.s32.totalorder %v4333_v32, 3  ;;  %vm865_vm10 = vcmp.lt.s32.totalorder %v4333_v32, 4 }
 0x101   : > { %v685_v23 = vadd.s32 536870912, %v684_v2  ;;  %v846_v26 = vshrl.u32 %v3973_v24, %v845_v4  ;;  %v870_v27 = vsel %vm862_vm7, %v849_v3, %v852_v5  ;;  %vm1247_vm11 = vcmp.gt.s32.totalorder %v1246_v8, 0 }
 0x102   : > { %v867_v30 = vsel %vm865_vm10, %v855_v10, 2102212464  ;;  %v871_v13 = vsel %vm865_vm10, %v858_v11, 920167782  ;;  %v874_v37 = vsel %vm862_vm7, %v852_v5, %v855_v10  ;;  %v875_v39 = vsel %vm865_vm10, %v861_v20, 1326507024 }
 0x103   : > { %v4385_v43 = vshrl.u32 %v685_v23, 30  ;;  %vm863_vm12 = vcmp.lt.s32.totalorder %v4333_v32, 2  ;;  %v872_v50 = vsel %vm864_vm9, %v855_v10, %v871_v13  ;;  %v876_v4 = vsel %vm864_vm9, %v858_v11, %v875_v39 }
 0x104   : > { %v866_v14 = vsel %vm862_vm7, %v846_v26, %v849_v3  ;;  %v873_v16 = vsel %vm863_vm12, %v870_v27, %v872_v50  ;;  %v877_v52 = vsel %vm863_vm12, %v874_v37, %v876_v4  ;;  %v1248_v9 = vsel %vm1247_vm11, %v1246_v8, 0 }
 0x105   : > { %v687_v12 = vshll.u32 %v4385_v43, 30  ;;  %v868_v55 = vsel %vm864_vm9, %v852_v5, %v867_v30  ;;  %v4402_v56 = vmul.u32.u64.low %v4360_v45, %v877_v52  ;;  %v4403_v57 = vmul.u32.u64.high %v4360_v45, %v877_v52, %v4402_v56 }
 0x106   : > { %v4407_v60 = vshrl.u32 %v1717_v15, 23  ;;  %v4410_v0 = vmul.u32.u64.low %v4360_v45, %v873_v16  ;;  %v4411_v1 = vmul.u32.u64.high %v4360_v45, %v873_v16, %v4410_v0  ;;  %v1250_v3 = vand.u32 31, %v1248_v9 }
 0x107   : > { %v4416_v8 = vshrl.u32 %v2298_v18, 23  ;;  %v4420_v5 = vadd.f32 %v4311_v22, %v4266_v51  ;;  %v4422_v10 = vsub.s32 %v684_v2, %v687_v12  ;;  %v1243_v15 = vand.u32 8388607, %v1236_v49 }
 0x108   : > { %v1342_v11 = vand.u32 2139095040, %v4349_v38  ;;  %v4429_v20 = vmul.f32 %v4218_v17, %v4259_v47  ;;  %v869_v23 = vsel %vm863_vm12, %v866_v14, %v868_v55  ;;  %v1251_v18 = vsub.s32 32, %v1250_v3 }
 0x109   : > { %v4434_v26 = vadd.s32 4294967169, %v4346_v28  ;;  %v4438_v22 = vadd.f32 %v4357_v40, %v4266_v51  ;;  %v690_v2 = vsub.s32 0, %v4422_v10  ;;  %vm887_vm13 = vc.u32 %v4403_v57, %v4410_v0 }
 0x10a   : > { %v888_v27 = vadd.s32 1, %v4411_v1  ;;  %v1253_v17 = vshll.u32 %v3973_v24, %v1250_v3  ;;  %v1254_v47 = vshrl.u32 %v6373_v29, %v1251_v18  ;;  %v1257_v32 = vshrl.u32 %v6367_v31, %v1251_v18 }
 0x10b   : > { %v3441_v28 = vmin.u32 %v690_v2, %v4422_v10  ;;  %v885_v30 = vmul.u32 %v4360_v45, %v869_v23  ;;  %v1244_v13 = vor.u32 8388608, %v1243_v15  ;;  %v1256_v40 = vshll.u32 %v6373_v29, %v1250_v3 }
 0x10c   : > { %v4450_v37 = vshrl.u32 %v1342_v11, 23  ;;  %v889_v39 = vsel %vm887_vm13, %v888_v27, %v4411_v1  ;;  %v4453_v50 = vshrl.u32 %v1248_v9, 5  ;;  %v1255_v4 = vor.u32 %v1254_v47, %v1253_v17 }
 0x10d   : > { %v692_v14 = vclz %v3441_v28  ;;  %v890_v16 = vadd.s32 %v889_v39, %v885_v30  ;;  %v1258_v52 = vor.u32 %v1257_v32, %v1256_v40  ;;  %v1260_v12 = vshrl.u32 %v6371_v33, %v1251_v18 }
 0x10e   : > { %v1259_v55 = vshll.u32 %v6367_v31, %v1250_v3  ;;  %v1262_v56 = vshll.u32 %v6371_v33, %v1250_v3  ;;  %v1263_v45 = vshrl.u32 %v3977_v34, %v1251_v18  ;;  %v1266_v15 = vshrl.u32 %v6365_v41, %v1251_v18 }
 0x10f   : > { %v3442_v11 = vadd.s32 4294967294, %v692_v14  ;;  %v891_v23 = vadd.s32 536870912, %v890_v16  ;;  %v4462_v9 = vadd.f32 %v4307_v21, %v4266_v51  ;;  %v4464_v1 = vshll.u32 %v1244_v13, 8 }
 0x110   : > { %v680_v2 = vadd.s32 %v4340_v36, %v4337_v35  ;;  %v1261_v27 = vor.u32 %v1260_v12, %v1259_v55  ;;  %v1264_v17 = vor.u32 %v1263_v45, %v1262_v56  ;;  %v1265_v47 = vshll.u32 %v3977_v34, %v1250_v3 }
 0x111   : > { %vm3443_vm14 = vcmp.lt.s32.totalorder %v3442_v11, 0  ;;  %v4469_v32 = vshrl.u32 %v891_v23, 30  ;;  %vm1268_vm15 = vcmp.lt.s32.totalorder %v4453_v50, 1  ;;  %vm1271_vm1 = vcmp.lt.s32.totalorder %v4453_v50, 4 }
 0x112   : > { %v695_v28 = vsel %vm3443_vm14, 0, %v3442_v11  ;;  %v1267_v30 = vor.u32 %v1266_v15, %v1265_v47  ;;  %v1276_v21 = vsel %vm1268_vm15, %v1255_v4, %v1258_v52  ;;  %v1277_v13 = vsel %vm1271_vm1, %v1264_v17, 920167782 }
 0x113   : > { %v696_v35 = vsub.s32 32, %v695_v28  ;;  %v700_v36 = vsub.s32 4294967266, %v695_v28  ;;  %v893_v40 = vshll.u32 %v4469_v32, 30  ;;  %vm1270_vm2 = vcmp.lt.s32.totalorder %v4453_v50, 3 }
 0x114   : > { %v697_v3 = vshll.u32 %v4422_v10, %v695_v28  ;;  %vm1269_vm3 = vcmp.lt.s32.totalorder %v4453_v50, 2  ;;  %v1278_v39 = vsel %vm1270_vm2, %v1261_v27, %v1277_v13  ;;  %v1445_v14 = vand.u32 2139095040, %v4462_v9 }
 0x115   : > { %v698_v12 = vshrl.u32 %v680_v2, %v696_v35  ;;  %v701_v55 = vadd.s32 127, %v700_v36  ;;  %v4484_v56 = vsub.s32 %v890_v16, %v893_v40  ;;  %v1279_v45 = vsel %vm1269_vm3, %v1276_v21, %v1278_v39 }
 0x116   : > { %v1280_v15 = vsel %vm1268_vm15, %v1258_v52, %v1261_v27  ;;  %v1281_v10 = vsel %vm1271_vm1, %v1267_v30, 1326507024  ;;  %v4493_v11 = vmul.u32.u64.low %v4464_v1, %v1279_v45  ;;  %v4494_v23 = vmul.u32.u64.high %v4464_v1, %v1279_v45, %v4493_v11 }
 0x117   : > { %v699_v47 = vor.u32 %v698_v12, %v697_v3  ;;  %v702_v28 = vshll.u32 %v701_v55, 23  ;;  %v896_v2 = vsub.s32 0, %v4484_v56  ;;  %v1273_v16 = vsel %vm1271_vm1, %v1261_v27, 2102212464 }
 0x118   : > { %vm626_vm4 = vcmp.lt.s32.totalorder %v4262_v48, 0  ;;  %v1252_v21 = vshrl.u32 %v3973_v24, %v1251_v18  ;;  %v1282_v13 = vsel %vm1270_vm2, %v1264_v17, %v1281_v10  ;;  %v1446_v30 = vshrl.u32 %v1445_v14, 23 }
 0x119   : > { %v703_v35 = vor.u32 4788187, %v702_v28  ;;  %v3449_v36 = vmin.u32 %v896_v2, %v4484_v56  ;;  %v1283_v40 = vsel %vm1269_vm3, %v1280_v15, %v1282_v13  ;;  %v6364_v3 = vand.u32 2147483647, %v4462_v9 }
 0x11a   : > { %v706_v39 = vcvt.s32.f32 %v699_v47  ;;  %v710_v12 = vsub.s32 4, %v4385_v43  ;;  %v1272_v27 = vsel %vm1268_vm15, %v1252_v21, %v1255_v4  ;;  %v1274_v18 = vsel %vm1270_vm2, %v1258_v52, %v1273_v16 }
 0x11b   : > { %v704_v55 = vand.u32 2147483647, %v703_v35  ;;  %v898_v17 = vclz %v3449_v36  ;;  %v4514_v14 = vmul.u32.u64.low %v4464_v1, %v1283_v40  ;;  %v4515_v45 = vmul.u32.u64.high %v4464_v1, %v1283_v40, %v4514_v14 }
 0x11c   : > { %vm4519_vm5 = vcmp.le.f32.partialorder %v624_v54, 0.7853982  ;;  %vm4525_vm6 = vcmp.le.f32.partialorder %v830_v58, 0.7853982  ;;  %v1294_v4 = vadd.s32 1, %v4494_v23  ;;  %v3475_v52 = vadd.s32 4294967169, %v1446_v30 }
 0x11d   : > { %v707_v47 = vmul.f32 %v706_v39, %v704_v55  ;;  %v3450_v28 = vadd.s32 4294967294, %v898_v17  ;;  %v916_v2 = vsub.s32 4, %v4469_v32  ;;  %v1275_v16 = vsel %vm1269_vm3, %v1272_v27, %v1274_v18 }
 0x11e   : > { %v711_v54 = vsel %vm626_vm4, %v710_v12, %v4385_v43  ;;  %vm832_vm7 = vcmp.lt.s32.totalorder %v4270_v53, 0  ;;  %v1449_v58 = vand.u32 8388607, %v6364_v3  ;;  %v1452_v21 = vadd.s32 1, %v3475_v52 }
 0x11f   : > { %v708_v13 = vxor.u32 2147483648, %v707_v47  ;;  %v886_v30 = vadd.s32 %v4410_v0, %v4403_v57  ;;  %vm3451_vm8 = vcmp.lt.s32.totalorder %v3450_v28, 0  ;;  %vm1293_vm9 = vc.u32 %v4515_v45, %v4493_v11 }
 0x120   : > { %v901_v50 = vsel %vm3451_vm8, 0, %v3450_v28  ;;  %v1291_v35 = vmul.u32 %v4464_v1, %v1275_v16  ;;  %v1295_v36 = vsel %vm1293_vm9, %v1294_v4, %v4494_v23  ;;  %vm1453_vm10 = vcmp.gt.s32.totalorder %v1452_v21, 0 }
 0x121   : > { %v709_v43 = vsel %vm626_vm4, %v708_v13, %v707_v47  ;;  %v902_v40 = vsub.s32 32, %v901_v50  ;;  %v906_v39 = vsub.s32 4294967266, %v901_v50  ;;  %v917_v12 = vsel %vm832_vm7, %v916_v2, %v4469_v32 }
 0x122   : > { %v712_v57 = vsel %vm4519_vm5, %v4262_v48, %v709_v43  ;;  %v1296_v0 = vadd.s32 %v1295_v36, %v1291_v35  ;;  %v1454_v27 = vsel %vm1453_vm10, %v1452_v21, 0  ;;  %v524_v1 = vand.u32 2139095040, %v4295_v6 }
 0x123   : > { %3716 = vcosq.f32 %v712_v57  ;;  %v903_v23 = vshll.u32 %v4484_v56, %v901_v50  ;;  %v904_v18 = vshrl.u32 %v886_v30, %v902_v40  ;;  %v907_v55 = vadd.s32 127, %v906_v39 }
 0x124   : > { %v713_v17 = vsel %vm4519_vm5, 0, %v711_v54  ;;  %3718 = vsinq.f32 %v712_v57  ;;  %v1297_v14 = vadd.s32 536870912, %v1296_v0  ;;  %v1456_v4 = vand.u32 31, %v1454_v27 }
 0x125   : > { %v905_v32 = vor.u32 %v904_v18, %v903_v23  ;;  %v908_v52 = vshll.u32 %v907_v55, 23  ;;  %v919_v47 = vsel %vm4525_vm6, 0, %v917_v12  ;;  %v1450_v28 = vor.u32 8388608, %v1449_v58 }
 0x126   : > { %v4560_v2 = vadd.s32 4294967169, %v4407_v60  ;;  %v4562_v16 = vshrl.u32 %v1297_v14, 30  ;;  %v1457_v56 = vsub.s32 32, %v1456_v4  ;;  %v525_v21 = vshrl.u32 %v524_v1, 23 }
 0x127   : > { %v4565_v13 = vadd.s32 1, %v4434_v26  ;;  %v4567_v15 = vand.u32 3, %v713_v17  ;;  %v909_v54 = vor.u32 4788187, %v908_v52  ;;  %v4569_v30 = vshrl.u32 %v1454_v27, 5 }
 0x128   : > { %v4572_v50 = vadd.s32 4294967169, %v4450_v37  ;;  %v4574_v35 = vand.u32 3, %v919_v47  ;;  %v1299_v60 = vshll.u32 %v4562_v16, 30  ;;  %v6370_v58 = vand.u32 2147483647, %v4295_v6 }
 0x129   : > { %v910_v36 = vand.u32 2147483647, %v909_v54  ;;  %v912_v43 = vcvt.s32.f32 %v905_v32  ;;  %v4580_v26 = vadd.s32 %v4493_v11, %v4515_v45  ;;  %v4582_v40 = vshll.u32 %v1450_v28, 8 }
 0x12a   : > { %v4584_v39 = vsub.s32 %v1296_v0, %v1299_v60  ;;  %v1460_v12 = vshrl.u32 %v6373_v29, %v1457_v56  ;;  %v1463_v37 = vshrl.u32 %v6367_v31, %v1457_v56  ;;  %v3436_v57 = vadd.s32 4294967169, %v525_v21 }
 0x12b   : > { %vm722_vm11 = vcmp.eq.s32.totalorder %v4567_v15, 2  ;;  %v913_v27 = vmul.f32 %v912_v43, %v910_v36  ;;  %v1466_v1 = vshrl.u32 %v6371_v33, %v1457_v56  ;;  %v1469_v23 = vshrl.u32 %v3977_v34, %v1457_v56 }
 0x12c   : > { %vm1474_vm12 = vcmp.lt.s32.totalorder %v4569_v30, 1  ;;  %vm719_vm13 = vcmp.eq.s32.totalorder %v4567_v15, 0  ;;  %v1302_v11 = vsub.s32 0, %v4584_v39  ;;  %v1459_v45 = vshll.u32 %v3973_v24, %v1456_v4 }
 0x12d   : > { %v1462_v0 = vshll.u32 %v6373_v29, %v1456_v4  ;;  %v1472_v18 = vshrl.u32 %v6365_v41, %v1457_v56  ;;  %v3717_v55 = vpop.eup %3716  ;;  %v914_v17 = vxor.u32 2147483648, %v913_v27  ;;  %v1465_v14 = vshll.u32 %v6367_v31, %v1456_v4 }
 0x12e   : > { %v1468_v32 = vshll.u32 %v6371_v33, %v1456_v4  ;;  %v1471_v52 = vshll.u32 %v3977_v34, %v1456_v4  ;;  %v3719_v47 = vpop.eup %3718  ;;  %v3468_v28 = vmin.u32 %v1302_v11, %v4584_v39  ;;  %v1461_v21 = vor.u32 %v1460_v12, %v1459_v45 }
 0x12f   : > { %v1464_v54 = vor.u32 %v1463_v37, %v1462_v0  ;;  %vm1475_vm14 = vcmp.lt.s32.totalorder %v4569_v30, 2  ;;  %v915_v60 = vsel %vm832_vm7, %v914_v17, %v913_v27  ;;  %v1467_v36 = vor.u32 %v1466_v1, %v1465_v14 }
 0x130   : > { %v1470_v43 = vor.u32 %v1469_v23, %v1468_v32  ;;  %v1473_v25 = vor.u32 %v1472_v18, %v1471_v52  ;;  %v723_v3 = vxor.u32 2147483648, %v3717_v55  ;;  %v918_v41 = vsel %vm4525_vm6, %v4270_v53, %v915_v60 }
 0x131   : > { %v1304_v31 = vclz %v3468_v28  ;;  %v1458_v4 = vshrl.u32 %v3973_v24, %v1457_v56  ;;  %vm718_vm15 = vcmp.lt.s32.totalorder %v4567_v15, 2  ;;  %v720_v12 = vxor.u32 2147483648, %v3719_v47 }
 0x132   : > { %3720 = vcosq.f32 %v918_v41  ;;  %vm1476_vm1 = vcmp.lt.s32.totalorder %v4569_v30, 3  ;;  %vm1477_vm2 = vcmp.lt.s32.totalorder %v4569_v30, 4  ;;  %v1482_v10 = vsel %vm1474_vm12, %v1461_v21, %v1464_v54 }
 0x133   : > { %3722 = vsinq.f32 %v918_v41  ;;  %v3469_v37 = vadd.s32 4294967294, %v1304_v31  ;;  %v1478_v27 = vsel %vm1474_vm12, %v1458_v4, %v1461_v21  ;;  %v1479_v1 = vsel %vm1477_vm2, %v1467_v36, 2102212464 }
 0x134   : > { %v1483_v23 = vsel %vm1477_vm2, %v1470_v43, 920167782  ;;  %v1486_v56 = vsel %vm1474_vm12, %v1464_v54, %v1467_v36  ;;  %v1487_v11 = vsel %vm1477_vm2, %v1473_v25, 1326507024  ;;  %vm716_vm3 = vweird.f32 %v4262_v48 }
 0x135   : > { %v724_v45 = vsel %vm722_vm11, %v723_v3, %v3719_v47  ;;  %vm3470_vm4 = vcmp.lt.s32.totalorder %v3469_v37, 0  ;;  %v1484_v31 = vsel %vm1476_vm1, %v1467_v36, %v1483_v23  ;;  %v1488_v41 = vsel %vm1476_vm1, %v1470_v43, %v1487_v11 }
 0x136   : > { %v721_v0 = vsel %vm719_vm13, %v3717_v55, %v720_v12  ;;  %v1307_v18 = vsel %vm3470_vm4, 0, %v3469_v37  ;;  %v1485_v17 = vsel %vm1475_vm14, %v1482_v10, %v1484_v31  ;;  %v1489_v25 = vsel %vm1475_vm14, %v1486_v56, %v1488_v41 }
 0x137   : > { %v1308_v14 = vsub.s32 32, %v1307_v18  ;;  %v1312_v32 = vsub.s32 4294967266, %v1307_v18  ;;  %v1480_v3 = vsel %vm1476_vm1, %v1464_v54, %v1479_v1  ;;  %v531_v52 = vadd.s32 1, %v3436_v57 }
 0x138   : > { %vm924_vm5 = vcmp.lt.s32.totalorder %v4574_v35, 2  ;;  %v4634_v47 = vmul.u32.u64.low %v4582_v40, %v1489_v25  ;;  %v4635_v28 = vmul.u32.u64.high %v4582_v40, %v1489_v25, %v4634_v47  ;;  %vm922_vm6 = vweird.f32 %v4270_v53 }
 0x139   : > { %v4638_v55 = vmul.u32.u64.low %v4582_v40, %v1485_v17  ;;  %v4639_v21 = vmul.u32.u64.high %v4582_v40, %v1485_v17, %v4638_v55  ;;  %v1309_v60 = vshll.u32 %v4584_v39, %v1307_v18  ;;  %v1310_v36 = vshrl.u32 %v4580_v26, %v1308_v14 }
 0x13a   : > { %v1313_v43 = vadd.s32 127, %v1312_v32  ;;  %vm532_vm7 = vcmp.gt.s32.totalorder %v531_v52, 0  ;;  %vm925_vm8 = vcmp.eq.s32.totalorder %v4574_v35, 0  ;;  %vm928_vm9 = vcmp.eq.s32.totalorder %v4574_v35, 2 }
 0x13b   : > { %v1481_v57 = vsel %vm1475_vm14, %v1478_v27, %v1480_v3  ;;  %v533_v54 = vsel %vm532_vm7, %v531_v52, 0  ;;  %v725_v4 = vsel %vm718_vm15, %v721_v0, %v724_v45  ;;  %v1311_v12 = vor.u32 %v1310_v36, %v1309_v60 }
 0x13c   : > { %v1314_v37 = vshll.u32 %v1313_v43, 23  ;;  %v535_v10 = vand.u32 31, %v533_v54  ;;  %v3721_v1 = vpop.eup %3720  ;;  %vm1144_vm10 = vcmp.gt.s32.totalorder %v4565_v13, 0  ;;  %vm1238_vm11 = vcmp.lt.s32.totalorder %v4280_v61, 0 }
 0x13d   : > { %vm1499_vm12 = vc.u32 %v4635_v28, %v4638_v55  ;;  %v1500_v26 = vadd.s32 1, %v4639_v21  ;;  %v4658_v30 = vadd.f32 %v4299_v7, %v4266_v51  ;;  %v528_v15 = vand.u32 8388607, %v6370_v58  ;;  %v3723_v39 = vpop.eup %3722 }
 0x13e   : > { %v929_v27 = vxor.u32 2147483648, %v3721_v1  ;;  %vm4664_vm13 = vcmp.le.f32.partialorder %v1236_v49, 0.7853982  ;;  %v1315_v56 = vor.u32 4788187, %v1314_v37  ;;  %v1497_v11 = vmul.u32 %v4582_v40, %v1481_v57 }
 0x13f   : > { %v536_v45 = vsub.s32 32, %v535_v10  ;;  %v726_v31 = vsel %vm716_vm3, nan, %v725_v4  ;;  %v926_v7 = vxor.u32 2147483648, %v3723_v39  ;;  %v1322_v41 = vsub.s32 4, %v4562_v16 }
 0x140   : > { %v1501_v0 = vsel %vm1499_vm12, %v1500_v26, %v4639_v21  ;;  %v930_v18 = vsel %vm928_vm9, %v929_v27, %v3723_v39  ;;  %v1316_v17 = vand.u32 2147483647, %v1315_v56  ;;  %v1318_v49 = vcvt.s32.f32 %v1311_v12 }
 0x141   : > { %v1502_v25 = vadd.s32 %v1501_v0, %v1497_v11  ;;  %v927_v14 = vsel %vm925_vm8, %v3721_v1, %v926_v7  ;;  %v529_v32 = vor.u32 8388608, %v528_v15  ;;  %v4677_v40 = vshrl.u32 %v533_v54, 5 }
 0x142   : > { %v539_v48 = vshrl.u32 %v6373_v29, %v536_v45  ;;  %v931_v3 = vsel %vm924_vm5, %v927_v14, %v930_v18  ;;  %v1319_v52 = vmul.f32 %v1318_v49, %v1316_v17  ;;  %v545_v21 = vshrl.u32 %v6371_v33, %v536_v45 }
 0x143   : > { %v1503_v47 = vadd.s32 536870912, %v1502_v25  ;;  %v932_v60 = vsel %vm922_vm6, nan, %v931_v3  ;;  %v538_v36 = vshll.u32 %v3973_v24, %v535_v10  ;;  %v541_v43 = vshll.u32 %v6373_v29, %v535_v10 }
 0x144   : > { %v6392_v57 = vmov 2131351028   ;;  %v934_v54 = vpack.c.bf16 %v932_v60, %v726_v31  ;;  %v1320_v12 = vxor.u32 2147483648, %v1319_v52  ;;  %v547_v35 = vshll.u32 %v6371_v33, %v535_v10 }
 0x145   : > { %v542_v4 = vshrl.u32 %v6392_v57, %v536_v45  ;;  %v1504_v37 = vshrl.u32 %v1503_v47, 30  ;;  %v544_v1 = vshll.u32 %v6392_v57, %v535_v10  ;;  %v548_v26 = vshrl.u32 %v3977_v34, %v536_v45 }
 0x146   : > { %v550_v15 = vshll.u32 %v3977_v34, %v535_v10  ;;  %v6393_v39 = vmov 1326507024   ;;  %979 = vmatprep.subr.bf16.mxu1 %v934_v54  ;;  %v1321_v27 = vsel %vm1238_vm11, %v1320_v12, %v1319_v52  ;;  %v540_v11 = vor.u32 %v539_v48, %v538_v36 }
 0x147   : > { %v551_v53 = vshrl.u32 %v6393_v39, %v536_v45  ;;  %v1505_v56 = vshll.u32 %v1504_v37, 30  ;;  %v546_v7 = vor.u32 %v545_v21, %v544_v1  ;;  %v1324_v31 = vsel %vm4664_vm13, %v4280_v61, %v1321_v27 }
 0x148   : > { %v543_v0 = vor.u32 %v542_v4, %v541_v43  ;;  %v549_v18 = vor.u32 %v548_v26, %v547_v35  ;;  %v4701_v10 = vsel %vm1144_vm10, %v4565_v13, 0  ;;  %v1323_v49 = vsel %vm1238_vm11, %v1322_v41, %v4562_v16 }
 0x149   : > { %v552_v17 = vor.u32 %v551_v53, %v550_v15  ;;  %v4706_v14 = vsub.s32 %v1502_v25, %v1505_v56  ;;  %v730_v48 = vand.u32 2139095040, %v4658_v30  ;;  %v537_v3 = vshrl.u32 %v3973_v24, %v536_v45 }
 0x14a   : > { %vm553_vm14 = vcmp.lt.s32.totalorder %v4677_v40, 1  ;;  %vm556_vm15 = vcmp.lt.s32.totalorder %v4677_v40, 4  ;;  %v4712_v52 = vshll.u32 %v529_v32, 8  ;;  %3724 = vcosq.f32 %v1324_v31 }
 0x14b   : > { %v1508_v13 = vsub.s32 0, %v4706_v14  ;;  %v1528_v47 = vsub.s32 4, %v1504_v37  ;;  %v558_v21 = vsel %vm556_vm15, %v546_v7, 2102212464  ;;  %v561_v60 = vsel %vm553_vm14, %v540_v11, %v543_v0 }
 0x14c   : > { %v562_v36 = vsel %vm556_vm15, %v549_v18, 920167782  ;;  %v565_v16 = vsel %vm553_vm14, %v543_v0, %v546_v7  ;;  %v566_v41 = vsel %vm556_vm15, %v552_v17, 1326507024  ;;  %3726 = vsinq.f32 %v1324_v31 }
 0x14d   : > { %v3476_v25 = vmin.u32 %v1508_v13, %v4706_v14  ;;  %vm554_vm1 = vcmp.lt.s32.totalorder %v4677_v40, 2  ;;  %vm555_vm2 = vcmp.lt.s32.totalorder %v4677_v40, 3  ;;  %v557_v45 = vsel %vm553_vm14, %v537_v3, %v540_v11 }
 0x14e   : > { %v559_v43 = vsel %vm555_vm2, %v543_v0, %v558_v21  ;;  %v563_v32 = vsel %vm555_vm2, %v546_v7, %v562_v36  ;;  %v567_v4 = vsel %vm555_vm2, %v549_v18, %v566_v41  ;;  %v731_v35 = vshrl.u32 %v730_v48, 23 }
 0x14f   : > { %v1510_v54 = vclz %v3476_v25  ;;  %v564_v12 = vsel %vm554_vm1, %v561_v60, %v563_v32  ;;  %v568_v1 = vsel %vm554_vm1, %v565_v16, %v567_v4  ;;  %v1325_v56 = vsel %vm4664_vm13, 0, %v1323_v49 }
 0x150   : > { %v4723_v26 = vmul.u32.u64.low %v4712_v52, %v568_v1  ;;  %v4724_v15 = vmul.u32.u64.high %v4712_v52, %v568_v1, %v4723_v26  ;;  %v4727_v53 = vmul.u32.u64.low %v4712_v52, %v564_v12  ;;  %v4728_v27 = vmul.u32.u64.high %v4712_v52, %v564_v12, %v4727_v53 }
 0x151   : > { %vm1444_vm3 = vcmp.lt.s32.totalorder %v4462_v9, 0  ;;  %v3477_v11 = vadd.s32 4294967294, %v1510_v54  ;;  %v3444_v7 = vadd.s32 4294967169, %v731_v35  ;;  %v4735_v31 = vand.u32 31, %v4701_v10 }
 0x152   : > { %v4738_v0 = vadd.s32 4294967169, %v4416_v8  ;;  %v1529_v18 = vsel %vm1444_vm3, %v1528_v47, %v1504_v37  ;;  %v6369_v17 = vand.u32 2147483647, %v4658_v30  ;;  %v4744_v48 = vadd.s32 1, %v4572_v50 }
 0x153   : > { %vm3478_vm4 = vcmp.lt.s32.totalorder %v3477_v11, 0  ;;  %v560_v23 = vsel %vm554_vm1, %v557_v45, %v559_v43  ;;  %v737_v49 = vadd.s32 1, %v3444_v7  ;;  %v4748_v3 = vand.u32 3, %v1325_v56 }
 0x154   : > { %v6394_v13 = vand.u32 2147483647, %v4462_v9  ;;  %v1498_v37 = vadd.s32 %v4638_v55, %v4635_v28  ;;  %v1513_v47 = vsel %vm3478_vm4, 0, %v3477_v11  ;;  %v3725_v21 = vpop.eup %3724  ;;  %vm578_vm6 = vc.u32 %v4724_v15, %v4727_v53 }
 0x155   : > { %v1514_v50 = vsub.s32 32, %v1513_v47  ;;  %v1518_v60 = vsub.s32 4294967266, %v1513_v47  ;;  %v576_v36 = vmul.u32 %v4712_v52, %v560_v23  ;;  %v579_v16 = vadd.s32 1, %v4728_v27 }
 0x156   : > { %vm4752_vm5 = vcmp.le.f32.partialorder %v6394_v13, 0.7853982  ;;  %v734_v41 = vand.u32 8388607, %v6369_v17  ;;  %vm738_vm7 = vcmp.gt.s32.totalorder %v737_v49, 0  ;;  %v3727_v25 = vpop.eup %3726  ;;  %v1515_v28 = vshll.u32 %v4706_v14, %v1513_v47 }
 0x157   : > { %v1531_v40 = vsel %vm4752_vm5, 0, %v1529_v18  ;;  %v1516_v55 = vshrl.u32 %v1498_v37, %v1514_v50  ;;  %v1519_v45 = vadd.s32 127, %v1518_v60  ;;  %v739_v43 = vsel %vm738_vm7, %v737_v49, 0 }
 0x158   : > { %vm1331_vm8 = vcmp.eq.s32.totalorder %v4748_v3, 0  ;;  %vm1334_vm9 = vcmp.eq.s32.totalorder %v4748_v3, 2  ;;  %v580_v32 = vsel %vm578_vm6, %v579_v16, %v4728_v27  ;;  %v741_v4 = vand.u32 31, %v739_v43 }
 0x159   : > { %v1517_v52 = vor.u32 %v1516_v55, %v1515_v28  ;;  %v1520_v54 = vshll.u32 %v1519_v45, 23  ;;  %v4770_v12 = vand.u32 3, %v1531_v40  ;;  %v581_v1 = vadd.s32 %v580_v32, %v576_v36 }
 0x15a   : > { %v1335_v35 = vxor.u32 2147483648, %v3725_v21  ;;  %v735_v26 = vor.u32 8388608, %v734_v41  ;;  %v742_v56 = vsub.s32 32, %v741_v4  ;;  %v1332_v11 = vxor.u32 2147483648, %v3727_v25 }
 0x15b   : > { %v1521_v7 = vor.u32 4788187, %v1520_v54  ;;  %v582_v18 = vadd.s32 536870912, %v581_v1  ;;  %v740_v23 = vshrl.u32 %v739_v43, 5  ;;  %v750_v27 = vshll.u32 %v6392_v57, %v741_v4 }
 0x15c   : > { %v745_v49 = vshrl.u32 %v6373_v29, %v742_v56  ;;  %v748_v13 = vshrl.u32 %v6392_v57, %v742_v56  ;;  %v751_v37 = vshrl.u32 %v6371_v33, %v742_v56  ;;  %v1524_v50 = vcvt.s32.f32 %v1517_v52 }
 0x15d   : > { %v1522_v47 = vand.u32 2147483647, %v1521_v7  ;;  %v4777_v60 = vshrl.u32 %v582_v18, 30  ;;  %v754_v40 = vshrl.u32 %v3977_v34, %v742_v56  ;;  %v744_v36 = vshll.u32 %v3973_v24, %v741_v4 }
 0x15e   : > { %v747_v16 = vshll.u32 %v6373_v29, %v741_v4  ;;  %v753_v41 = vshll.u32 %v6371_v33, %v741_v4  ;;  %v757_v28 = vshrl.u32 %v6393_v39, %v742_v56  ;;  %vm1330_vm10 = vcmp.lt.s32.totalorder %v4748_v3, 2 }
 0x15f   : > { %v1336_v55 = vsel %vm1334_vm9, %v1335_v35, %v3727_v25  ;;  %v1525_v45 = vmul.f32 %v1524_v50, %v1522_v47  ;;  %v584_v43 = vshll.u32 %v4777_v60, 30  ;;  %v752_v32 = vor.u32 %v751_v37, %v750_v27 }
 0x160   : > { %v746_v52 = vor.u32 %v745_v49, %v744_v36  ;;  %v749_v54 = vor.u32 %v748_v13, %v747_v16  ;;  %v755_v7 = vor.u32 %v754_v40, %v753_v41  ;;  %v756_v18 = vshll.u32 %v3977_v34, %v741_v4 }
 0x161   : > { %v1333_v17 = vsel %vm1331_vm8, %v3725_v21, %v1332_v11  ;;  %v1526_v58 = vxor.u32 2147483648, %v1525_v45  ;;  %v4791_v33 = vsub.s32 %v581_v1, %v584_v43  ;;  %v4793_v29 = vshll.u32 %v735_v26, 8 }
 0x162   : > { %v743_v14 = vshrl.u32 %v3973_v24, %v742_v56  ;;  %v758_v25 = vor.u32 %v757_v28, %v756_v18  ;;  %vm759_vm11 = vcmp.lt.s32.totalorder %v740_v23, 1  ;;  %vm762_vm12 = vcmp.lt.s32.totalorder %v740_v23, 4 }
 0x163   : > { %v1527_v35 = vsel %vm1444_vm3, %v1526_v58, %v1525_v45  ;;  %v587_v49 = vsub.s32 0, %v4791_v33  ;;  %vm760_vm13 = vcmp.lt.s32.totalorder %v740_v23, 2  ;;  %v764_v4 = vsel %vm762_vm12, %v752_v32, 2102212464 }
 0x164   : > { %v1530_v21 = vsel %vm4752_vm5, %v4462_v9, %v1527_v35  ;;  %vm761_vm14 = vcmp.lt.s32.totalorder %v740_v23, 3  ;;  %v767_v1 = vsel %vm759_vm11, %v746_v52, %v749_v54  ;;  %v768_v26 = vsel %vm762_vm12, %v755_v7, 920167782 }
 0x165   : > { %3728 = vcosq.f32 %v1530_v21  ;;  %v3437_v56 = vmin.u32 %v587_v49, %v4791_v33  ;;  %v763_v11 = vsel %vm759_vm11, %v743_v14, %v746_v52  ;;  %v771_v13 = vsel %vm759_vm11, %v749_v54, %v752_v32 }
 0x166   : > { %3730 = vsinq.f32 %v1530_v21  ;;  %v765_v58 = vsel %vm761_vm14, %v749_v54, %v764_v4  ;;  %v769_v27 = vsel %vm761_vm14, %v752_v32, %v768_v26  ;;  %v772_v37 = vsel %vm762_vm12, %v758_v25, 1326507024 }
 0x167   : > { %v589_v47 = vclz %v3437_v56  ;;  %v770_v50 = vsel %vm760_vm13, %v767_v1, %v769_v27  ;;  %v773_v40 = vsel %vm761_vm14, %v755_v7, %v772_v37  ;;  %v4808_v8 = vsub.s32 32, %v4735_v31 }
 0x168   : > { %v1337_v36 = vsel %vm1330_vm10, %v1333_v17, %v1336_v55  ;;  %v774_v16 = vsel %vm760_vm13, %v771_v13, %v773_v40  ;;  %v4814_v14 = vmul.u32.u64.low %v4793_v29, %v770_v50  ;;  %v4815_v41 = vmul.u32.u64.high %v4793_v29, %v770_v50, %v4814_v14 }
 0x169   : > { %v3438_v28 = vadd.s32 4294967294, %v589_v47  ;;  %v766_v45 = vsel %vm760_vm13, %v763_v11, %v765_v58  ;;  %v4820_v43 = vmul.u32.u64.low %v4793_v29, %v774_v16  ;;  %v4821_v32 = vmul.u32.u64.high %v4793_v29, %v774_v16, %v4820_v43 }
 0x16a   : > { %vm1328_vm15 = vweird.f32 %v4280_v61  ;;  %vm1537_vm1 = vcmp.eq.s32.totalorder %v4770_v12, 0  ;;  %vm1540_vm2 = vcmp.eq.s32.totalorder %v4770_v12, 2  ;;  %v4827_v17 = vshrl.u32 %v4701_v10, 5 }
 0x16b   : > { %v1338_v3 = vsel %vm1328_vm15, nan, %v1337_v36  ;;  %vm1536_vm3 = vcmp.lt.s32.totalorder %v4770_v12, 2  ;;  %v577_v23 = vadd.s32 %v4727_v53, %v4724_v15  ;;  %vm3439_vm4 = vcmp.lt.s32.totalorder %v3438_v28, 0 }
 0x16c   : > { %v1150_v55 = vshll.u32 %v3973_v24, %v4735_v31  ;;  %vm1534_vm5 = vweird.f32 %v4462_v9  ;;  %v592_v61 = vsel %vm3439_vm4, 0, %v3438_v28  ;;  %v782_v52 = vmul.u32 %v4793_v29, %v766_v45 }
 0x16d   : > { %v785_v54 = vadd.s32 1, %v4815_v41  ;;  %v6397_v10 = vand.u32 2147483647, %v4277_v59  ;;  %v593_v18 = vsub.s32 32, %v592_v61  ;;  %v597_v25 = vsub.s32 4294967266, %v592_v61 }
 0x16e   : > { %v6398_v35 = vmov 2475754826   ;;  %vm1350_vm6 = vcmp.gt.s32.totalorder %v4744_v48, 0  ;;  %v594_v49 = vshll.u32 %v4791_v33, %v592_v61  ;;  %vm784_vm7 = vc.u32 %v4821_v32, %v4814_v14 }
 0x16f   : > { %v4839_v7 = vand.u32 8388607, %v6397_v10  ;;  %v1151_v15 = vshrl.u32 %v6398_v35, %v4808_v8  ;;  %v1153_v53 = vshll.u32 %v6398_v35, %v4735_v31  ;;  %v1154_v29 = vshrl.u32 %v6392_v57, %v4808_v8  ;;  %v3729_v1 = vpop.eup %3728 }
 0x170   : > { %v6399_v4 = vmov 2102212464   ;;  %v595_v26 = vshrl.u32 %v577_v23, %v593_v18  ;;  %v598_v56 = vadd.s32 127, %v597_v25  ;;  %v786_v11 = vsel %vm784_vm7, %v785_v54, %v4815_v41  ;;  %v3731_v58 = vpop.eup %3730 }
 0x171   : > { %v1157_v21 = vshrl.u32 %v6399_v4, %v4808_v8  ;;  %v1160_v13 = vshrl.u32 %v3977_v34, %v4808_v8  ;;  %v1541_v27 = vxor.u32 2147483648, %v3729_v1  ;;  %v787_v33 = vadd.s32 %v786_v11, %v782_v52 }
 0x172   : > { %v1156_v37 = vshll.u32 %v6392_v57, %v4735_v31  ;;  %v1163_v47 = vshrl.u32 %v6393_v39, %v4808_v8  ;;  %v1538_v50 = vxor.u32 2147483648, %v3731_v58  ;;  %v596_v40 = vor.u32 %v595_v26, %v594_v49 }
 0x173   : > { %v599_v36 = vshll.u32 %v598_v56, 23  ;;  %v1159_v16 = vshll.u32 %v6399_v4, %v4735_v31  ;;  %v1542_v41 = vsel %vm1540_vm2, %v1541_v27, %v3731_v58  ;;  %v788_v28 = vadd.s32 536870912, %v787_v33 }
 0x174   : > { %v1155_v45 = vor.u32 %v1154_v29, %v1153_v53  ;;  %v1162_v43 = vshll.u32 %v3977_v34, %v4735_v31  ;;  %v1539_v23 = vsel %vm1537_vm1, %v3729_v1, %v1538_v50  ;;  %v1158_v52 = vor.u32 %v1157_v21, %v1156_v37 }
 0x175   : > { %v600_v61 = vor.u32 4788187, %v599_v36  ;;  %v1161_v54 = vor.u32 %v1160_v13, %v1159_v16  ;;  %v1543_v10 = vsel %vm1536_vm3, %v1539_v23, %v1542_v41  ;;  %v4870_v18 = vshrl.u32 %v788_v28, 30 }
 0x176   : > { %v1152_v25 = vor.u32 %v1151_v15, %v1150_v55  ;;  %v1164_v49 = vor.u32 %v1163_v47, %v1162_v43  ;;  %v1544_v26 = vsel %vm1534_vm5, nan, %v1543_v10  ;;  %v603_v29 = vcvt.s32.f32 %v596_v40 }
 0x177   : > { %v601_v53 = vand.u32 2147483647, %v600_v61  ;;  %v1141_v31 = vor.u32 8388608, %v4839_v7  ;;  %v1546_v56 = vpack.c.bf16 %v1544_v26, %v1338_v3  ;;  %v790_v1 = vshll.u32 %v4870_v18, 30 }
 0x178   : > { %vm1165_vm8 = vcmp.lt.s32.totalorder %v4827_v17, 1  ;;  %vm1168_vm9 = vcmp.lt.s32.totalorder %v4827_v17, 4  ;;  %vm1167_vm10 = vcmp.lt.s32.totalorder %v4827_v17, 3  ;;  %v1351_v11 = vsel %vm1350_vm6, %v4744_v48, 0 }
 0x179   : > { %v604_v12 = vmul.f32 %v603_v29, %v601_v53  ;;  %v1174_v55 = vsel %vm1168_vm9, %v1161_v54, 920167782  ;;  %v1177_v9 = vsel %vm1165_vm8, %v1155_v45, %v1158_v52  ;;  %1559 = vmatprep.subr.bf16.mxu0 %v1546_v56  ;;  %v4883_v15 = vsub.s32 %v787_v33, %v790_v1 }
 0x17a   : > { %v1173_v3 = vsel %vm1165_vm8, %v1152_v25, %v1155_v45  ;;  %v1175_v7 = vsel %vm1167_vm10, %v1158_v52, %v1174_v55  ;;  %v1178_v21 = vsel %vm1168_vm9, %v1164_v49, 1326507024  ;;  %vm1166_vm11 = vcmp.lt.s32.totalorder %v4827_v17, 2 }
 0x17b   : > { %v605_v13 = vxor.u32 2147483648, %v604_v12  ;;  %v1179_v58 = vsel %vm1167_vm10, %v1161_v54, %v1178_v21  ;;  %v607_v27 = vsub.s32 4, %v4777_v60  ;;  %v793_v33 = vsub.s32 0, %v4883_v15 }
 0x17c   : > { %v1170_v37 = vsel %vm1168_vm9, %v1158_v52, 2102212464  ;;  %v1180_v47 = vsel %vm1166_vm11, %v1177_v9, %v1179_v58  ;;  %vm523_vm12 = vcmp.lt.s32.totalorder %v4295_v6, 0  ;;  %v1149_v48 = vshrl.u32 %v3973_v24, %v4808_v8 }
 0x17d   : > { %v1176_v50 = vsel %vm1166_vm11, %v1173_v3, %v1175_v7  ;;  %v1181_v40 = vshll.u32 %v1141_v31, 8  ;;  %v1353_v36 = vand.u32 31, %v1351_v11  ;;  %v6400_v16 = vand.u32 2147483647, %v4295_v6 }
 0x17e   : > { %v606_v28 = vsel %vm523_vm12, %v605_v13, %v604_v12  ;;  %v3445_v43 = vmin.u32 %v793_v33, %v4883_v15  ;;  %v1169_v23 = vsel %vm1165_vm8, %v1149_v48, %v1152_v25  ;;  %v1171_v8 = vsel %vm1167_vm10, %v1155_v45, %v1170_v37 }
 0x17f   : > { %vm4910_vm13 = vcmp.le.f32.partialorder %v6400_v16, 0.7853982  ;;  %v4919_v61 = vmul.u32.u64.low %v1181_v40, %v1180_v47  ;;  %v4920_v52 = vmul.u32.u64.high %v1181_v40, %v1180_v47, %v4919_v61  ;;  %v608_v54 = vsel %vm523_vm12, %v607_v27, %v4777_v60 }
 0x180   : > { %v795_v10 = vclz %v3445_v43  ;;  %v4923_v49 = vmul.u32.u64.low %v1181_v40, %v1176_v50  ;;  %v4924_v26 = vmul.u32.u64.high %v1181_v40, %v1176_v50, %v4923_v49  ;;  %v1923_v53 = vand.u32 2139095040, %v4420_v5 }
 0x181   : > { %v2504_v29 = vand.u32 2139095040, %v4438_v22  ;;  %v609_v25 = vsel %vm4910_vm13, %v4295_v6, %v606_v28  ;;  %v1339_v45 = vand.u32 2147483647, %v4349_v38  ;;  %v4934_v31 = vadd.s32 1, %v4560_v2 }
 0x182   : > { %v4937_v60 = vadd.s32 1, %v4738_v0  ;;  %v3446_v56 = vadd.s32 4294967294, %v795_v10  ;;  %v1172_v1 = vsel %vm1166_vm11, %v1169_v23, %v1171_v8  ;;  %v610_v12 = vsel %vm4910_vm13, 0, %v608_v54 }
 0x183   : > { %v783_v55 = vadd.s32 %v4814_v14, %v4821_v32  ;;  %vm1190_vm14 = vc.u32 %v4920_v52, %v4923_v49  ;;  %v1354_v9 = vsub.s32 32, %v1353_v36  ;;  %3732 = vcosq.f32 %v609_v25 }
 0x184   : > { %vm729_vm15 = vcmp.lt.s32.totalorder %v4658_v30, 0  ;;  %vm3447_vm1 = vcmp.lt.s32.totalorder %v3446_v56, 0  ;;  %v813_v2 = vsub.s32 4, %v4870_v18  ;;  %v1191_v0 = vadd.s32 1, %v4924_v26 }
 0x185   : > { %3734 = vsinq.f32 %v609_v25  ;;  %v798_v17 = vsel %vm3447_vm1, 0, %v3446_v56  ;;  %v1188_v3 = vmul.u32 %v1181_v40, %v1172_v1  ;;  %v1346_v7 = vand.u32 8388607, %v1339_v45 }
 0x186   : > { %v799_v21 = vsub.s32 32, %v798_v17  ;;  %v803_v14 = vsub.s32 4294967266, %v798_v17  ;;  %v1192_v32 = vsel %vm1190_vm14, %v1191_v0, %v4924_v26  ;;  %v4953_v13 = vshrl.u32 %v1351_v11, 5 }
 0x187   : > { %v1193_v58 = vadd.s32 %v1192_v32, %v1188_v3  ;;  %v1357_v27 = vshrl.u32 %v6398_v35, %v1354_v9  ;;  %v1360_v33 = vshrl.u32 %v6392_v57, %v1354_v9  ;;  %v1363_v37 = vshrl.u32 %v6399_v4, %v1354_v9 }
 0x188   : > { %v800_v47 = vshll.u32 %v4883_v15, %v798_v17  ;;  %v801_v48 = vshrl.u32 %v783_v55, %v799_v21  ;;  %v804_v50 = vadd.s32 127, %v803_v14  ;;  %v1366_v40 = vshrl.u32 %v3977_v34, %v1354_v9 }
 0x189   : > { %v1194_v16 = vadd.s32 536870912, %v1193_v58  ;;  %v1356_v41 = vshll.u32 %v3973_v24, %v1353_v36  ;;  %v1359_v28 = vshll.u32 %v6398_v35, %v1353_v36  ;;  %v1362_v11 = vshll.u32 %v6392_v57, %v1353_v36 }
 0x18a   : > { %v802_v43 = vor.u32 %v801_v48, %v800_v47  ;;  %v805_v23 = vshll.u32 %v804_v50, 23  ;;  %v1365_v8 = vshll.u32 %v6399_v4, %v1353_v36  ;;  %v1369_v61 = vshrl.u32 %v6393_v39, %v1354_v9 }
 0x18b   : > { %v6403_v54 = vand.u32 2147483647, %v4658_v30  ;;  %v4971_v10 = vshrl.u32 %v1194_v16, 30  ;;  %v1358_v26 = vor.u32 %v1357_v27, %v1356_v41  ;;  %v1361_v25 = vor.u32 %v1360_v33, %v1359_v28 }
 0x18c   : > { %v806_v56 = vor.u32 4788187, %v805_v23  ;;  %v1364_v1 = vor.u32 %v1363_v37, %v1362_v11  ;;  %v1367_v55 = vor.u32 %v1366_v40, %v1365_v8  ;;  %v1368_v0 = vshll.u32 %v3977_v34, %v1353_v36 }
 0x18d   : > { %vm4967_vm2 = vcmp.le.f32.partialorder %v6403_v54, 0.7853982  ;;  %v4974_v17 = vand.u32 3, %v610_v12  ;;  %v814_v3 = vsel %vm729_vm15, %v813_v2, %v4870_v18  ;;  %v1196_v21 = vshll.u32 %v4971_v10, 30  ;;  %v3733_v32 = vpop.eup %3732 }
 0x18e   : > { %v1347_v14 = vor.u32 8388608, %v1346_v7  ;;  %v807_v47 = vand.u32 2147483647, %v806_v56  ;;  %v809_v48 = vcvt.s32.f32 %v802_v43  ;;  %v1370_v50 = vor.u32 %v1369_v61, %v1368_v0 }
 0x18f   : > { %vm1371_vm3 = vcmp.lt.s32.totalorder %v4953_v13, 1  ;;  %v3735_v27 = vpop.eup %3734  ;;  %v4981_v33 = vsub.s32 %v1193_v58, %v1196_v21  ;;  %v1355_v36 = vshrl.u32 %v3973_v24, %v1354_v9  ;;  %vm1374_vm4 = vcmp.lt.s32.totalorder %v4953_v13, 4 }
 0x190   : > { %v1379_v12 = vsel %vm1371_vm3, %v1358_v26, %v1361_v25  ;;  %v810_v18 = vmul.f32 %v809_v48, %v807_v47  ;;  %vm1373_vm5 = vcmp.lt.s32.totalorder %v4953_v13, 3  ;;  %v1376_v2 = vsel %vm1374_vm4, %v1364_v1, 2102212464 }
 0x191   : > { %v1380_v7 = vsel %vm1374_vm4, %v1367_v55, 920167782  ;;  %v1199_v37 = vsub.s32 0, %v4981_v33  ;;  %vm1372_vm6 = vcmp.lt.s32.totalorder %v4953_v13, 2  ;;  %v1383_v9 = vsel %vm1371_vm3, %v1361_v25, %v1364_v1 }
 0x192   : > { %v1381_v58 = vsel %vm1373_vm5, %v1364_v1, %v1380_v7  ;;  %v811_v40 = vxor.u32 2147483648, %v810_v18  ;;  %v1384_v41 = vsel %vm1374_vm4, %v1370_v50, 1326507024  ;;  %v1387_v28 = vshll.u32 %v1347_v14, 8 }
 0x193   : > { %v1382_v16 = vsel %vm1372_vm6, %v1379_v12, %v1381_v58  ;;  %v816_v11 = vsel %vm4967_vm2, 0, %v814_v3  ;;  %v3464_v43 = vmin.u32 %v1199_v37, %v4981_v33  ;;  %v1375_v23 = vsel %vm1371_vm3, %v1355_v36, %v1358_v26 }
 0x194   : > { %v1377_v8 = vsel %vm1373_vm5, %v1361_v25, %v1376_v2  ;;  %v812_v61 = vsel %vm729_vm15, %v811_v40, %v810_v18  ;;  %v1385_v54 = vsel %vm1373_vm5, %v1367_v55, %v1384_v41  ;;  %v620_v0 = vxor.u32 2147483648, %v3733_v32 }
 0x195   : > { %v5007_v56 = vmul.u32.u64.low %v1387_v28, %v1382_v16  ;;  %v5008_v1 = vmul.u32.u64.high %v1387_v28, %v1382_v16, %v5007_v56  ;;  %v815_v3 = vsel %vm4967_vm2, %v4658_v30, %v812_v61  ;;  %v1201_v21 = vclz %v3464_v43 }
 0x196   : > { %v1386_v26 = vsel %vm1372_vm6, %v1383_v9, %v1385_v54  ;;  %v617_v25 = vxor.u32 2147483648, %v3735_v27  ;;  %3736 = vcosq.f32 %v815_v3  ;;  %v1378_v48 = vsel %vm1372_vm6, %v1375_v23, %v1377_v8 }
 0x197   : > { %v5016_v14 = vmul.u32.u64.low %v1387_v28, %v1386_v26  ;;  %v5017_v47 = vmul.u32.u64.high %v1387_v28, %v1386_v26, %v5016_v14  ;;  %3738 = vsinq.f32 %v815_v3  ;;  %v3465_v55 = vadd.s32 4294967294, %v1201_v21 }
 0x198   : > { %v5023_v50 = vadd.f32 %v4251_v42, %v4257_v46  ;;  %v5027_v15 = vshrl.u32 %v1923_v53, 23  ;;  %vm616_vm7 = vcmp.eq.s32.totalorder %v4974_v17, 0  ;;  %vm619_vm8 = vcmp.eq.s32.totalorder %v4974_v17, 2 }
 0x199   : > { %v1397_v36 = vadd.s32 1, %v5008_v1  ;;  %vm613_vm9 = vweird.f32 %v4295_v6  ;;  %v820_v12 = vand.u32 3, %v816_v11  ;;  %v1189_v13 = vadd.s32 %v4923_v49, %v4920_v52 }
 0x19a   : > { %vm3466_vm10 = vcmp.lt.s32.totalorder %v3465_v55, 0  ;;  %v1820_v42 = vand.u32 2139095040, %v5023_v50  ;;  %v621_v18 = vsel %vm619_vm8, %v620_v0, %v3735_v27  ;;  %v1394_v7 = vmul.u32 %v1387_v28, %v1378_v48 }
 0x19b   : > { %v1204_v2 = vsel %vm3466_vm10, 0, %v3465_v55  ;;  %vm1396_vm11 = vc.u32 %v5017_v47, %v5007_v56  ;;  %v618_v53 = vsel %vm616_vm7, %v3733_v32, %v617_v25  ;;  %v5041_v16 = vadd.f32 %v4353_v19, %v4266_v51 }
 0x19c   : > { %v1205_v37 = vsub.s32 32, %v1204_v2  ;;  %v1209_v58 = vsub.s32 4294967266, %v1204_v2  ;;  %v1398_v9 = vsel %vm1396_vm11, %v1397_v36, %v5008_v1  ;;  %v1817_v52 = vand.u32 2147483647, %v5023_v50 }
 0x19d   : > { %v1399_v40 = vadd.s32 %v1398_v9, %v1394_v7  ;;  %v1821_v49 = vshrl.u32 %v1820_v42, 23  ;;  %vm819_vm12 = vweird.f32 %v4658_v30  ;;  %vm1135_vm13 = vcmp.lt.s32.totalorder %v4277_v59, 0 }
 0x19e   : > { %v1206_v27 = vshll.u32 %v4981_v33, %v1204_v2  ;;  %v1207_v41 = vshrl.u32 %v1189_v13, %v1205_v37  ;;  %v1210_v32 = vadd.s32 127, %v1209_v58  ;;  %vm615_vm14 = vcmp.lt.s32.totalorder %v4974_v17, 2 }
 0x19f   : > { %vm821_vm15 = vcmp.lt.s32.totalorder %v820_v12, 2  ;;  %v1400_v28 = vadd.s32 536870912, %v1399_v40  ;;  %v3490_v11 = vadd.s32 4294967169, %v1821_v49  ;;  %v622_v43 = vsel %vm615_vm14, %v618_v53, %v621_v18 }
 0x1a0   : > { %vm822_vm1 = vcmp.eq.s32.totalorder %v820_v12, 0  ;;  %v1208_v19 = vor.u32 %v1207_v41, %v1206_v27  ;;  %v1211_v23 = vshll.u32 %v1210_v32, 23  ;;  %v3737_v8 = vpop.eup %3736  ;;  %vm1341_vm2 = vcmp.lt.s32.totalorder %v4349_v38, 0 }
 0x1a1   : > { %v1401_v61 = vshrl.u32 %v1400_v28, 30  ;;  %v1824_v54 = vand.u32 8388607, %v1817_v52  ;;  %v1827_v1 = vadd.s32 1, %v3490_v11  ;;  %v2026_v33 = vand.u32 2139095040, %v5041_v16  ;;  %v3739_v0 = vpop.eup %3738 }
 0x1a2   : > { %vm825_vm3 = vcmp.eq.s32.totalorder %v820_v12, 2  ;;  %v826_v17 = vxor.u32 2147483648, %v3737_v8  ;;  %v6406_v3 = vand.u32 2147483647, %v4277_v59  ;;  %v1212_v26 = vor.u32 4788187, %v1211_v23 }
 0x1a3   : > { %v1219_v25 = vsub.s32 4, %v4971_v10  ;;  %v623_v14 = vsel %vm613_vm9, nan, %v622_v43  ;;  %v823_v55 = vxor.u32 2147483648, %v3739_v0  ;;  %v1402_v48 = vshll.u32 %v1401_v61, 30  ;;  %v3707_v28 = vld [vmem:[%s4188_s7 + $0x24] ss:$8 sps:$4 sm:$0xff]  }
 0x1a4   : > { %vm5054_vm4 = vcmp.le.f32.partialorder %v6406_v3, 0.7853982  ;;  %vm1828_vm5 = vcmp.gt.s32.totalorder %v1827_v1, 0  ;;  %v827_v36 = vsel %vm825_vm3, %v826_v17, %v3739_v0  ;;  %v1213_v13 = vand.u32 2147483647, %v1212_v26  ;;  %v5082_v23 = vld [vmem:[%s6357_s3 + $0x10] sm:$0xff]  }
 0x1a5   : > { %v1215_v42 = vcvt.s32.f32 %v1208_v19  ;;  %v1829_v18 = vsel %vm1828_vm5, %v1827_v1, 0  ;;  %v824_v2 = vsel %vm822_vm1, %v3737_v8, %v823_v55  ;;  %v5062_v7 = vsub.s32 %v1399_v40, %v1402_v48  ;;  %v3705_v1 = vld [vmem:[%s4188_s7 + $0x20] ss:$8 sps:$4 sm:$0xff]  }
 0x1a6   : > { %v1825_v53 = vor.u32 8388608, %v1824_v54  ;;  %v2027_v37 = vshrl.u32 %v2026_v33, 23  ;;  %v828_v58 = vsel %vm821_vm15, %v824_v2, %v827_v36  ;;  %v1425_v49 = vsub.s32 4, %v1401_v61 }
 0x1a7   : > { %v1216_v9 = vmul.f32 %v1215_v42, %v1213_v13  ;;  %v1831_v6 = vand.u32 31, %v1829_v18  ;;  %v829_v27 = vsel %vm819_vm12, nan, %v828_v58  ;;  %v5070_v41 = vsel %vm1135_vm13, %v1219_v25, %v4971_v10 }
 0x1a8   : > { %v1395_v40 = vadd.s32 %v5007_v56, %v5017_v47  ;;  %v1405_v32 = vsub.s32 0, %v5062_v7  ;;  %v933_v12 = vpack.c.bf16 %v829_v27, %v623_v14  ;;  %v5076_v43 = vshrl.u32 %v1829_v18, 5 }
 0x1a9   : > { %v1217_v11 = vxor.u32 2147483648, %v1216_v9  ;;  %v1832_v19 = vsub.s32 32, %v1831_v6  ;;  %v5084_v10 = vshll.u32 %v1825_v53, 8  ;;  %v2023_v8 = vand.u32 2147483647, %v5041_v16 }
 0x1aa   : > { %v3472_v30 = vmin.u32 %v1405_v32, %v5062_v7  ;;  %v3498_v56 = vadd.s32 4294967169, %v2027_v37  ;;  %980 = vmatpush1.bf16.msra.mxu1 %v933_v12  ;;  %v5091_v54 = vsel %vm1341_vm2, %v1425_v49, %v1401_v61  ;;  %v1834_v33 = vshll.u32 %v3973_v24, %v1831_v6 }
 0x1ab   : > { %v1218_v47 = vsel %vm1135_vm13, %v1217_v11, %v1216_v9  ;;  %v1835_v0 = vshrl.u32 %v6398_v35, %v1832_v19  ;;  %2138 = vmatprep.subr.bf16.mxu1 %v3707_v28  ;;  %v1837_v26 = vshll.u32 %v6398_v35, %v1831_v6  ;;  %v1838_v25 = vshrl.u32 %v6392_v57, %v1832_v19 }
 0x1ac   : > { %v1221_v17 = vsel %vm5054_vm4, %v4277_v59, %v1218_v47  ;;  %v1407_v3 = vclz %v3472_v30  ;;  %v1840_v55 = vshll.u32 %v6392_v57, %v1831_v6  ;;  %v1841_v61 = vshrl.u32 %v6399_v4, %v1832_v19 }
 0x1ad   : > { %v1836_v14 = vor.u32 %v1835_v0, %v1834_v33  ;;  %vm1849_vm6 = vcmp.lt.s32.totalorder %v5076_v43, 1  ;;  %3458 = vmatmul.mubr.msk.bf16.vlgmr.msra.gmra.mrb[0].mxu1 %vm387_vm0, %v5082_v23  ;;  %v1839_v36 = vor.u32 %v1838_v25, %v1837_v26  ;;  %v1843_v13 = vshll.u32 %v6399_v4, %v1831_v6 }
 0x1ae   : > { %v3473_v48 = vadd.s32 4294967294, %v1407_v3  ;;  %v1844_v42 = vshrl.u32 %v3977_v34, %v1832_v19  ;;  %3740 = vcosq.f32 %v1221_v17  ;;  %2139 = vmatpush1.bf16.msra.mxu1 %v3705_v1  ;;  %v1842_v18 = vor.u32 %v1841_v61, %v1840_v55 }
 0x1af   : > { %v1846_v2 = vshll.u32 %v3977_v34, %v1831_v6  ;;  %v1847_v53 = vshrl.u32 %v6393_v39, %v1832_v19  ;;  %v6409_v37 = vmov 0   ;;  %3742 = vsinq.f32 %v1221_v17 }
 0x1b0   : > { %1019 = vmatprep.mubr.bf16.mxu1 %v6409_v37  ;;  %vm3474_vm7 = vcmp.lt.s32.totalorder %v3473_v48, 0  ;;  %v1833_v58 = vshrl.u32 %v3973_v24, %v1832_v19  ;;  %v1845_v9 = vor.u32 %v1844_v42, %v1843_v13  ;;  %vm1850_vm8 = vcmp.lt.s32.totalorder %v5076_v43, 2 }
 0x1b1   : > { %v1410_v49 = vsel %vm3474_vm7, 0, %v3473_v48  ;;  %v1848_v27 = vor.u32 %v1847_v53, %v1846_v2  ;;  %vm1852_vm9 = vcmp.lt.s32.totalorder %v5076_v43, 4  ;;  %vm1851_vm10 = vcmp.lt.s32.totalorder %v5076_v43, 3 }
 0x1b2   : > { %v1411_v32 = vsub.s32 32, %v1410_v49  ;;  %v1415_v28 = vsub.s32 4294967266, %v1410_v49  ;;  %v1854_v6 = vsel %vm1852_vm9, %v1842_v18, 2102212464  ;;  %v1412_v12 = vshll.u32 %v5062_v7, %v1410_v49 }
 0x1b3   : > { %v1857_v11 = vsel %vm1849_vm6, %v1836_v14, %v1839_v36  ;;  %v1858_v30 = vsel %vm1852_vm9, %v1845_v9, 920167782  ;;  %v1861_v19 = vsel %vm1849_vm6, %v1839_v36, %v1842_v18  ;;  %v1862_v0 = vsel %vm1852_vm9, %v1848_v27, 1326507024 }
 0x1b4   : > { %v1413_v47 = vshrl.u32 %v1395_v40, %v1411_v32  ;;  %v1416_v1 = vadd.s32 127, %v1415_v28  ;;  %v1859_v33 = vsel %vm1851_vm10, %v1842_v18, %v1858_v30  ;;  %v1853_v17 = vsel %vm1849_vm6, %v1833_v58, %v1836_v14 }
 0x1b5   : > { %v1860_v3 = vsel %vm1850_vm8, %v1857_v11, %v1859_v33  ;;  %v1863_v7 = vsel %vm1851_vm10, %v1845_v9, %v1862_v0  ;;  %v2033_v26 = vadd.s32 1, %v3498_v56  ;;  %v1855_v40 = vsel %vm1851_vm10, %v1839_v36, %v1854_v6 }
 0x1b6   : > { %v1414_v25 = vor.u32 %v1413_v47, %v1412_v12  ;;  %v1417_v55 = vshll.u32 %v1416_v1, 23  ;;  %v1864_v61 = vsel %vm1850_vm8, %v1861_v19, %v1863_v7  ;;  %v1222_v56 = vsel %vm5054_vm4, 0, %v5070_v41 }
 0x1b7   : > { %v5133_v48 = vmul.u32.u64.low %v5084_v10, %v1864_v61  ;;  %v5134_v13 = vmul.u32.u64.high %v5084_v10, %v1864_v61, %v5133_v48  ;;  %v5137_v14 = vmul.u32.u64.low %v5084_v10, %v1860_v3  ;;  %v5138_v42 = vmul.u32.u64.high %v5084_v10, %v1860_v3, %v5137_v14 }
 0x1b8   : > { %v1418_v18 = vor.u32 4788187, %v1417_v55  ;;  %v5146_v36 = vand.u32 8388607, %v2023_v8  ;;  %vm2034_vm11 = vcmp.gt.s32.totalorder %v2033_v26, 0  ;;  %v5148_v2 = vpop.eup %3740  ;;  %v5152_v53 = vshrl.u32 %v2504_v29, 23 }
 0x1b9   : > { %vm5156_vm12 = vcmp.le.f32.partialorder %v1339_v45, 0.7853982  ;;  %v1856_v21 = vsel %vm1850_vm8, %v1853_v17, %v1855_v40  ;;  %v2035_v41 = vsel %vm2034_vm11, %v2033_v26, 0  ;;  %v5162_v9 = vpop.eup %3742  ;;  %v1421_v27 = vcvt.s32.f32 %v1414_v25 }
 0x1ba   : > { %v1419_v49 = vand.u32 2147483647, %v1418_v18  ;;  %v1428_v32 = vsel %vm5156_vm12, 0, %v5091_v54  ;;  %v2037_v29 = vand.u32 31, %v2035_v41  ;;  %v5167_v28 = vand.u32 3, %v1222_v56 }
 0x1bb   : > { %vm1874_vm13 = vc.u32 %v5134_v13, %v5137_v14  ;;  %v1875_v45 = vadd.s32 1, %v5138_v42  ;;  %v5174_v43 = vadd.f32 %v4255_v44, %v4257_v46  ;;  %v1872_v12 = vmul.u32 %v5084_v10, %v1856_v21 }
 0x1bc   : > { %v1422_v6 = vmul.f32 %v1421_v27, %v1419_v49  ;;  %v2031_v11 = vor.u32 8388608, %v5146_v36  ;;  %v2038_v30 = vsub.s32 32, %v2037_v29  ;;  %v5178_v19 = vand.u32 3, %v1428_v32 }
 0x1bd   : > { %v1876_v54 = vsel %vm1874_vm13, %v1875_v45, %v5138_v42  ;;  %v2040_v47 = vshll.u32 %v3973_v24, %v2037_v29  ;;  %v2043_v1 = vshll.u32 %v6398_v35, %v2037_v29  ;;  %v2046_v44 = vshll.u32 %v6392_v57, %v2037_v29 }
 0x1be   : > { %v1423_v33 = vxor.u32 2147483648, %v1422_v6  ;;  %v1877_v0 = vadd.s32 %v1876_v54, %v1872_v12  ;;  %v2041_v17 = vshrl.u32 %v6398_v35, %v2038_v30  ;;  %v2044_v46 = vshrl.u32 %v6392_v57, %v2038_v30 }
 0x1bf   : > { %v2047_v10 = vshrl.u32 %v6399_v4, %v2038_v30  ;;  %v2049_v3 = vshll.u32 %v6399_v4, %v2037_v29  ;;  %v2050_v7 = vshrl.u32 %v3977_v34, %v2038_v30  ;;  %v2036_v55 = vshrl.u32 %v2035_v41, 5 }
 0x1c0   : > { %v1424_v26 = vsel %vm1341_vm2, %v1423_v33, %v1422_v6  ;;  %v1878_v25 = vadd.s32 536870912, %v1877_v0  ;;  %v2042_v40 = vor.u32 %v2041_v17, %v2040_v47  ;;  %vm1228_vm14 = vcmp.eq.s32.totalorder %v5167_v28, 0 }
 0x1c1   : > { %vm1231_vm15 = vcmp.eq.s32.totalorder %v5167_v28, 2  ;;  %v1427_v61 = vsel %vm5156_vm12, %v4349_v38, %v1424_v26  ;;  %v2045_v48 = vor.u32 %v2044_v46, %v2043_v1  ;;  %v2048_v42 = vor.u32 %v2047_v10, %v2046_v44 }
 0x1c2   : > { %v2051_v56 = vor.u32 %v2050_v7, %v2049_v3  ;;  %3744 = vcosq.f32 %v1427_v61  ;;  %v5196_v18 = vshrl.u32 %v1878_v25, 30  ;;  %v2052_v36 = vshll.u32 %v3977_v34, %v2037_v29 }
 0x1c3   : > { %v2053_v21 = vshrl.u32 %v6393_v39, %v2038_v30  ;;  %v1229_v41 = vxor.u32 2147483648, %v5162_v9  ;;  %v1232_v49 = vxor.u32 2147483648, %v5148_v2  ;;  %3746 = vsinq.f32 %v1427_v61 }
 0x1c4   : > { %v2039_v27 = vshrl.u32 %v3973_v24, %v2038_v30  ;;  %vm1227_vm1 = vcmp.lt.s32.totalorder %v5167_v28, 2  ;;  %v1880_v58 = vshll.u32 %v5196_v18, 30  ;;  %vm2055_vm2 = vcmp.lt.s32.totalorder %v2036_v55, 1 }
 0x1c5   : > { %v2054_v32 = vor.u32 %v2053_v21, %v2052_v36  ;;  %vm2058_vm3 = vcmp.lt.s32.totalorder %v2036_v55, 4  ;;  %vm2057_vm4 = vcmp.lt.s32.totalorder %v2036_v55, 3  ;;  %v2063_v29 = vsel %vm2055_vm2, %v2042_v40, %v2045_v48 }
 0x1c6   : > { %v2060_v45 = vsel %vm2058_vm3, %v2048_v42, 2102212464  ;;  %v2064_v6 = vsel %vm2058_vm3, %v2051_v56, 920167782  ;;  %v5206_v12 = vsub.s32 %v1877_v0, %v1880_v58  ;;  %vm2056_vm5 = vcmp.lt.s32.totalorder %v2036_v55, 2 }
 0x1c7   : > { %v2065_v54 = vsel %vm2057_vm4, %v2048_v42, %v2064_v6  ;;  %v2067_v47 = vsel %vm2055_vm2, %v2045_v48, %v2048_v42  ;;  %vm1225_vm6 = vweird.f32 %v4277_v59  ;;  %v2068_v1 = vsel %vm2058_vm3, %v2054_v32, 1326507024 }
 0x1c8   : > { %v2066_v30 = vsel %vm2056_vm5, %v2063_v29, %v2065_v54  ;;  %v2071_v33 = vshll.u32 %v2031_v11, 8  ;;  %v5214_v17 = vadd.f32 %v4429_v20, %v4266_v51  ;;  %v1883_v44 = vsub.s32 0, %v5206_v12 }
 0x1c9   : > { %v2059_v0 = vsel %vm2055_vm2, %v2039_v27, %v2042_v40  ;;  %v2061_v46 = vsel %vm2057_vm4, %v2045_v48, %v2060_v45  ;;  %v2069_v10 = vsel %vm2057_vm4, %v2051_v56, %v2068_v1  ;;  %vm1431_vm7 = vweird.f32 %v4349_v38  ;;  %v3708_v38 = vld [vmem:[%s4188_s7 + $0x30] ss:$8 sps:$4 sm:$0xff]  }
 0x1ca   : > { %vm1433_vm8 = vcmp.lt.s32.totalorder %v5178_v19, 2  ;;  %vm1819_vm9 = vcmp.lt.s32.totalorder %v5023_v50, 0  ;;  %v2070_v11 = vsel %vm2056_vm5, %v2067_v47, %v2069_v10  ;;  %v1230_v51 = vsel %vm1228_vm14, %v5148_v2, %v1229_v41 }
 0x1cb   : > { %v5224_v3 = vmul.u32.u64.low %v2071_v33, %v2066_v30  ;;  %v5225_v7 = vmul.u32.u64.high %v2071_v33, %v2066_v30, %v5224_v3  ;;  %v1233_v20 = vsel %vm1231_vm15, %v1232_v49, %v5162_v9  ;;  %v3491_v26 = vmin.u32 %v1883_v44, %v5206_v12 }
 0x1cc   : > { %v2398_v25 = vand.u32 2147483647, %v5174_v43  ;;  %v2062_v40 = vsel %vm2056_vm5, %v2059_v0, %v2061_v46  ;;  %v5237_v61 = vmul.u32.u64.low %v2071_v33, %v2070_v11  ;;  %v5238_v48 = vmul.u32.u64.high %v2071_v33, %v2070_v11, %v5237_v61  ;;  %v3745_v56 = vpop.eup %3744  ;;  %v3710_v0 = vld [vmem:[%s4188_s7 + $0x34] ss:$8 sps:$4 sm:$0xff]   ;;  %s3309_s7 = sshll.u32 %s298_s25, 4  ;;  %s6305_s7 = int_to_ptr.vmem [resolvable:$true] %s3309_s7 }
 0x1cd   : > { %v2401_v42 = vand.u32 2139095040, %v5174_v43  ;;  %vm1725_vm10 = vcmp.gt.s32.totalorder %v4934_v31, 0  ;;  %vm1434_vm11 = vcmp.eq.s32.totalorder %v5178_v19, 0  ;;  %vm1437_vm12 = vcmp.eq.s32.totalorder %v5178_v19, 2  ;;  %v3747_v36 = vpop.eup %3746  ;;  %s3891_s29 = scalar_lea.vmem %s6305_s7, 1024  ;;  %p3898_p8 = scmp.lt.s32.totalorder %s6305_s7, %s3896_s23 }
 0x1ce   : > { %v1873_v2 = vadd.s32 %v5137_v14, %v5134_v13  ;;  %v1885_v9 = vclz %v3491_v26  ;;  %v1234_v55 = vsel %vm1227_vm1, %v1230_v51, %v1233_v20  ;;  %v1438_v21 = vxor.u32 2147483648, %v3745_v56  ;;  %p3892_p2 = scmp.ne.s32.totalorder %s6305_s7, %s3891_s29  ;;  %p3899_p9 = scmp.lt.s32.totalorder %s3897_s16, %s3891_s29 }
 0x1cf   : > { %v2081_v41 = vadd.s32 1, %v5225_v7  ;;  %v2402_v49 = vshrl.u32 %v2401_v42, 23  ;;  %v1435_v27 = vxor.u32 2147483648, %v3747_v36  ;;  %v1903_v32 = vsub.s32 4, %v5196_v18 }
 0x1d0   : > { %v3492_v58 = vadd.s32 4294967294, %v1885_v9  ;;  %v2078_v45 = vmul.u32 %v2071_v33, %v2062_v40  ;;  %v1439_v29 = vsel %vm1437_vm12, %v1438_v21, %v3747_v36  ;;  %vm2080_vm13 = vc.u32 %v5238_v48, %v5224_v3  ;;  %p3893_p10 = pnand %p3892_p2, %p6440_p12  ;;  %p3900_p11 = por %p3899_p9, %p3898_p8 }
 0x1d1   : > { %v3513_v13 = vadd.s32 4294967169, %v2402_v49  ;;  %v2405_v14 = vand.u32 8388607, %v2398_v25  ;;  %v1235_v28 = vsel %vm1225_vm6, nan, %v1234_v55  ;;  %v1436_v6 = vsel %vm1434_vm11, %v3745_v56, %v1435_v27 }
 0x1d2   : > { %vm3493_vm14 = vcmp.lt.s32.totalorder %v3492_v58, 0  ;;  %v2082_v54 = vsel %vm2080_vm13, %v2081_v41, %v5225_v7  ;;  %v1440_v47 = vsel %vm1433_vm8, %v1436_v6, %v1439_v29  ;;  %v5267_v10 = vsel %vm1819_vm9, %v1903_v32, %v5196_v18  ;;  %p3894_p7 = pneg %p3893_p10 }
 0x1d3   : > { %v1888_v30 = vsel %vm3493_vm14, 0, %v3492_v58  ;;  %v2083_v1 = vadd.s32 %v2082_v54, %v2078_v45  ;;  %v2408_v33 = vadd.s32 1, %v3513_v13  ;;  %v1441_v44 = vsel %vm1431_vm7, nan, %v1440_v47 }
 0x1d4   : > { %v1889_v46 = vsub.s32 32, %v1888_v30  ;;  %v1893_v59 = vsub.s32 4294967266, %v1888_v30  ;;  %v1545_v11 = vpack.c.bf16 %v1441_v44, %v1235_v28  ;;  %v2406_v51 = vor.u32 8388608, %v2405_v14  ;;  %p3901_p0 = pnand %p3900_p11, %p3894_p7 }
 0x1d5   : > { %v2084_v7 = vadd.s32 536870912, %v2083_v1  ;;  %vm2409_vm15 = vcmp.gt.s32.totalorder %v2408_v33, 0  ;;  %v1890_v19 = vshll.u32 %v5206_v12, %v1888_v30  ;;  %v2604_v56 = vand.u32 2147483647, %v5214_v17 }
 0x1d6   : > { %v1891_v20 = vshrl.u32 %v1873_v2, %v1889_v46  ;;  %v1894_v26 = vadd.s32 127, %v1893_v59  ;;  %v2410_v40 = vsel %vm2409_vm15, %v2408_v33, 0  ;;  %1560 = vmatpush1.bf16.msra.mxu0 %v1545_v11  ;;  %v5275_v9 = vadd.s32 4294967169, %v5027_v15 }
 0x1d7   : > { %v5271_v61 = vshrl.u32 %v2084_v7, 30  ;;  %v2412_v42 = vand.u32 31, %v2410_v40  ;;  %2719 = vmatprep.subr.bf16.mxu0 %v3710_v0  ;;  %vm5279_vm1 = vcmp.le.f32.partialorder %v1817_v52, 0.7853982  ;;  %v5286_v36 = vsel %vm1725_vm10, %v4934_v31, 0 }
 0x1d8   : > { %v1892_v12 = vor.u32 %v1891_v20, %v1890_v19  ;;  %v1895_v2 = vshll.u32 %v1894_v26, 23  ;;  %v1906_v55 = vsel %vm5279_vm1, 0, %v5267_v10  ;;  %v2079_v41 = vadd.s32 %v5224_v3, %v5238_v48 }
 0x1d9   : > { %v2086_v15 = vshll.u32 %v5271_v61, 30  ;;  %v2413_v21 = vsub.s32 32, %v2412_v42  ;;  %3481 = vmatmul.mubr.msk.bf16.vlgmr.msra.gmra.mrb[8].mxu0 %vm387_vm0, %v5082_v23  ;;  %v5296_v49 = vshll.u32 %v2406_v51, 8  ;;  %v2607_v27 = vand.u32 2139095040, %v5214_v17 }
 0x1da   : > { %v1896_v52 = vor.u32 4788187, %v1895_v2  ;;  %2720 = vmatpush1.bf16.msra.mxu0 %v3708_v38  ;;  %v5301_v58 = vshrl.u32 %v2410_v40, 5  ;;  %v5306_v45 = vand.u32 8388607, %v2604_v56  ;;  %v1899_v29 = vcvt.s32.f32 %v1892_v12  ;;  %1599 = vmatprep.mubr.bf16.mxu0 %v6409_v37 }
 0x1db   : > { %v5299_v31 = vsub.s32 %v2083_v1, %v2086_v15  ;;  %v2416_v32 = vshrl.u32 %v6398_v35, %v2413_v21  ;;  %v2419_v13 = vshrl.u32 %v6392_v57, %v2413_v21  ;;  %v2422_v3 = vshrl.u32 %v6399_v4, %v2413_v21 }
 0x1dc   : > { %v1897_v23 = vand.u32 2147483647, %v1896_v52  ;;  %v2415_v14 = vshll.u32 %v3973_v24, %v2412_v42  ;;  %v2418_v28 = vshll.u32 %v6398_v35, %v2412_v42  ;;  %v2421_v6 = vshll.u32 %v6392_v57, %v2412_v42 }
 0x1dd   : > { %v2089_v48 = vsub.s32 0, %v5299_v31  ;;  %v2424_v47 = vshll.u32 %v6399_v4, %v2412_v42  ;;  %v2425_v30 = vshrl.u32 %v3977_v34, %v2413_v21  ;;  %v2608_v1 = vshrl.u32 %v2607_v27, 23 }
 0x1de   : > { %v1900_v54 = vmul.f32 %v1899_v29, %v1897_v23  ;;  %v2417_v44 = vor.u32 %v2416_v32, %v2415_v14  ;;  %v2420_v0 = vor.u32 %v2419_v13, %v2418_v28  ;;  %v2423_v46 = vor.u32 %v2422_v3, %v2421_v6 }
 0x1df   : > { %v3499_v33 = vmin.u32 %v2089_v48, %v5299_v31  ;;  %v2426_v11 = vor.u32 %v2425_v30, %v2424_v47  ;;  %v2427_v7 = vshll.u32 %v3977_v34, %v2412_v42  ;;  %v2428_v51 = vshrl.u32 %v6393_v39, %v2413_v21 }
 0x1e0   : > { %v1901_v59 = vxor.u32 2147483648, %v1900_v54  ;;  %vm2025_vm2 = vcmp.lt.s32.totalorder %v5041_v16, 0  ;;  %v2109_v20 = vsub.s32 4, %v5271_v61  ;;  %v2414_v26 = vshrl.u32 %v3973_v24, %v2413_v21 }
 0x1e1   : > { %v2091_v19 = vclz %v3499_v33  ;;  %vm2430_vm3 = vcmp.lt.s32.totalorder %v5301_v58, 1  ;;  %v2429_v38 = vor.u32 %v2428_v51, %v2427_v7  ;;  %vm2431_vm4 = vcmp.lt.s32.totalorder %v5301_v58, 2 }
 0x1e2   : > { %v1902_v40 = vsel %vm1819_vm9, %v1901_v59, %v1900_v54  ;;  %vm2433_vm5 = vcmp.lt.s32.totalorder %v5301_v58, 4  ;;  %v2438_v15 = vsel %vm2430_vm3, %v2417_v44, %v2420_v0  ;;  %vm2432_vm6 = vcmp.lt.s32.totalorder %v5301_v58, 3 }
 0x1e3   : > { %v1905_v42 = vsel %vm5279_vm1, %v5023_v50, %v1902_v40  ;;  %v3500_v12 = vadd.s32 4294967294, %v2091_v19  ;;  %v2435_v2 = vsel %vm2433_vm5, %v2423_v46, 2102212464  ;;  %v2434_v21 = vsel %vm2430_vm3, %v2414_v26, %v2417_v44 }
 0x1e4   : > { %3748 = vcosq.f32 %v1905_v42  ;;  %v2439_v52 = vsel %vm2433_vm5, %v2426_v11, 920167782  ;;  %v2442_v32 = vsel %vm2430_vm3, %v2420_v0, %v2423_v46  ;;  %v2436_v29 = vsel %vm2432_vm6, %v2420_v0, %v2435_v2 }
 0x1e5   : > { %3750 = vsinq.f32 %v1905_v42  ;;  %vm3501_vm7 = vcmp.lt.s32.totalorder %v3500_v12, 0  ;;  %v2440_v27 = vsel %vm2432_vm6, %v2423_v46, %v2439_v52  ;;  %v2443_v3 = vsel %vm2433_vm5, %v2429_v38, 1326507024 }
 0x1e6   : > { %v2094_v23 = vsel %vm3501_vm7, 0, %v3500_v12  ;;  %v2441_v13 = vsel %vm2431_vm4, %v2438_v15, %v2440_v27  ;;  %v2444_v6 = vsel %vm2432_vm6, %v2426_v11, %v2443_v3  ;;  %v3521_v33 = vadd.s32 4294967169, %v2608_v1 }
 0x1e7   : > { %v2095_v48 = vsub.s32 32, %v2094_v23  ;;  %v2096_v14 = vshll.u32 %v5299_v31, %v2094_v23  ;;  %v2099_v28 = vsub.s32 4294967266, %v2094_v23  ;;  %v2445_v54 = vsel %vm2431_vm4, %v2442_v32, %v2444_v6 }
 0x1e8   : > { %v5350_v47 = vmul.u32.u64.low %v5296_v49, %v2441_v13  ;;  %v5351_v30 = vmul.u32.u64.high %v5296_v49, %v2441_v13, %v5350_v47  ;;  %v5354_v46 = vmul.u32.u64.low %v5296_v49, %v2445_v54  ;;  %v5355_v59 = vmul.u32.u64.high %v5296_v49, %v2445_v54, %v5354_v46 }
 0x1e9   : > { %v2097_v44 = vshrl.u32 %v2079_v41, %v2095_v48  ;;  %v2100_v0 = vadd.s32 127, %v2099_v28  ;;  %v5361_v31 = vand.u32 3, %v1906_v55  ;;  %v2110_v11 = vsel %vm2025_vm2, %v2109_v20, %v5271_v61 }
 0x1ea   : > { %v2437_v7 = vsel %vm2431_vm4, %v2434_v21, %v2436_v29  ;;  %v2614_v1 = vadd.s32 1, %v3521_v33  ;;  %v5369_v41 = vand.u32 31, %v5286_v36  ;;  %v1714_v26 = vand.u32 2147483647, %v4283_v62 }
 0x1eb   : > { %v2098_v51 = vor.u32 %v2097_v44, %v2096_v14  ;;  %v2101_v19 = vshll.u32 %v2100_v0, 23  ;;  %vm5374_vm8 = vcmp.le.f32.partialorder %v2023_v8, 0.7853982  ;;  %v2456_v18 = vadd.s32 1, %v5351_v30 }
 0x1ec   : > { %v2612_v61 = vor.u32 8388608, %v5306_v45  ;;  %vm2615_vm9 = vcmp.gt.s32.totalorder %v2614_v1, 0  ;;  %v2112_v58 = vsel %vm5374_vm8, 0, %v2110_v11  ;;  %v2453_v20 = vmul.u32 %v5296_v49, %v2437_v7 }
 0x1ed   : > { %v2102_v55 = vor.u32 4788187, %v2101_v19  ;;  %vm2455_vm10 = vc.u32 %v5355_v59, %v5350_v47  ;;  %v5385_v38 = vadd.s32 1, %v5275_v9  ;;  %vm1912_vm11 = vcmp.eq.s32.totalorder %v5361_v31, 0 }
 0x1ee   : > { %v3749_v40 = vpop.eup %3748  ;;  %v2457_v8 = vsel %vm2455_vm10, %v2456_v18, %v5351_v30  ;;  %v2616_v42 = vsel %vm2615_vm9, %v2614_v1, 0  ;;  %vm1915_vm12 = vcmp.eq.s32.totalorder %v5361_v31, 2  ;;  %v2105_v2 = vcvt.s32.f32 %v2098_v51 }
 0x1ef   : > { %v3751_v12 = vpop.eup %3750  ;;  %v2103_v45 = vand.u32 2147483647, %v2102_v55  ;;  %v2458_v15 = vadd.s32 %v2457_v8, %v2453_v20  ;;  %v5390_v21 = vand.u32 3, %v2112_v58  ;;  %v2618_v49 = vand.u32 31, %v2616_v42 }
 0x1f0   : > { %v5392_v52 = vshll.u32 %v2612_v61, 8  ;;  %v5395_v27 = vsub.s32 32, %v5369_v41  ;;  %vm1911_vm13 = vcmp.lt.s32.totalorder %v5361_v31, 2  ;;  %v5400_v23 = vand.u32 8388607, %v1714_v26 }
 0x1f1   : > { %v2106_v9 = vmul.f32 %v2105_v2, %v2103_v45  ;;  %v2459_v32 = vadd.s32 536870912, %v2458_v15  ;;  %v5403_v29 = vshrl.u32 %v5286_v36, 5  ;;  %v1913_v13 = vxor.u32 2147483648, %v3751_v12 }
 0x1f2   : > { %v1916_v3 = vxor.u32 2147483648, %v3749_v40  ;;  %v2619_v48 = vsub.s32 32, %v2618_v49  ;;  %v1731_v14 = vshll.u32 %v3973_v24, %v5369_v41  ;;  %v5408_v6 = vadd.s32 %v5350_v47, %v5355_v59 }
 0x1f3   : > { %v2107_v28 = vxor.u32 2147483648, %v2106_v9  ;;  %v5410_v54 = vshrl.u32 %v2459_v32, 30  ;;  %v2617_v30 = vshrl.u32 %v2616_v42, 5  ;;  %v2621_v33 = vshll.u32 %v3973_v24, %v2618_v49 }
 0x1f4   : > { %v2622_v44 = vshrl.u32 %v6398_v35, %v2619_v48  ;;  %v2625_v36 = vshrl.u32 %v6392_v57, %v2619_v48  ;;  %v1732_v0 = vshrl.u32 %v6398_v35, %v5395_v27  ;;  %v2624_v47 = vshll.u32 %v6398_v35, %v2618_v49 }
 0x1f5   : > { %v2108_v46 = vsel %vm2025_vm2, %v2107_v28, %v2106_v9  ;;  %v2461_v11 = vshll.u32 %v5410_v54, 30  ;;  %v2628_v59 = vshrl.u32 %v6399_v4, %v2619_v48  ;;  %v1914_v7 = vsel %vm1912_vm11, %v3749_v40, %v1913_v13 }
 0x1f6   : > { %v1917_v1 = vsel %vm1915_vm12, %v1916_v3, %v3751_v12  ;;  %v2111_v51 = vsel %vm5374_vm8, %v5041_v16, %v2108_v46  ;;  %v2627_v19 = vshll.u32 %v6392_v57, %v2618_v49  ;;  %vm1909_vm14 = vweird.f32 %v5023_v50 }
 0x1f7   : > { %3752 = vcosq.f32 %v2111_v51  ;;  %v5431_v18 = vsub.s32 %v2458_v15, %v2461_v11  ;;  %v2623_v61 = vor.u32 %v2622_v44, %v2621_v33  ;;  %v2626_v55 = vor.u32 %v2625_v36, %v2624_v47 }
 0x1f8   : > { %3754 = vsinq.f32 %v2111_v51  ;;  %v2629_v58 = vor.u32 %v2628_v59, %v2627_v19  ;;  %v2630_v20 = vshll.u32 %v6399_v4, %v2618_v49  ;;  %v2631_v40 = vshrl.u32 %v3977_v34, %v2619_v48 }
 0x1f9   : > { %v2464_v8 = vsub.s32 0, %v5431_v18  ;;  %v2620_v10 = vshrl.u32 %v3973_v24, %v2619_v48  ;;  %v2634_v42 = vshrl.u32 %v6393_v39, %v2619_v48  ;;  %vm2636_vm15 = vcmp.lt.s32.totalorder %v2617_v30, 1 }
 0x1fa   : > { %v1918_v12 = vsel %vm1911_vm13, %v1914_v7, %v1917_v1  ;;  %v2632_v45 = vor.u32 %v2631_v40, %v2630_v20  ;;  %v2633_v2 = vshll.u32 %v3977_v34, %v2618_v49  ;;  %vm2637_vm1 = vcmp.lt.s32.totalorder %v2617_v30, 2 }
 0x1fb   : > { %vm2121_vm2 = vcmp.eq.s32.totalorder %v5390_v21, 2  ;;  %v3514_v15 = vmin.u32 %v2464_v8, %v5431_v18  ;;  %vm2638_vm3 = vcmp.lt.s32.totalorder %v2617_v30, 3  ;;  %vm2639_vm4 = vcmp.lt.s32.totalorder %v2617_v30, 4 }
 0x1fc   : > { %v2640_v9 = vsel %vm2636_vm15, %v2620_v10, %v2623_v61  ;;  %vm2118_vm5 = vcmp.eq.s32.totalorder %v5390_v21, 0  ;;  %v2635_v32 = vor.u32 %v2634_v42, %v2633_v2  ;;  %v2641_v13 = vsel %vm2639_vm4, %v2629_v58, 2102212464 }
 0x1fd   : > { %v2644_v3 = vsel %vm2636_vm15, %v2623_v61, %v2626_v55  ;;  %v2645_v31 = vsel %vm2639_vm4, %v2632_v45, 920167782  ;;  %vm2117_vm6 = vcmp.lt.s32.totalorder %v5390_v21, 2  ;;  %v2466_v48 = vclz %v3514_v15 }
 0x1fe   : > { %v2642_v49 = vsel %vm2638_vm3, %v2626_v55, %v2641_v13  ;;  %v2646_v28 = vsel %vm2638_vm3, %v2629_v58, %v2645_v31  ;;  %v2648_v33 = vsel %vm2636_vm15, %v2626_v55, %v2629_v58  ;;  %vm2115_vm7 = vweird.f32 %v5041_v16 }
 0x1ff   : > { %v2643_v44 = vsel %vm2637_vm1, %v2640_v9, %v2642_v49  ;;  %v2647_v36 = vsel %vm2637_vm1, %v2644_v3, %v2646_v28  ;;  %v2649_v46 = vsel %vm2639_vm4, %v2635_v32, 1326507024  ;;  %v1734_v11 = vshll.u32 %v6398_v35, %v5369_v41 }
 0x200   : > { %v3515_v47 = vadd.s32 4294967294, %v2466_v48  ;;  %v2650_v59 = vsel %vm2638_vm3, %v2632_v45, %v2649_v46  ;;  %v5457_v7 = vmul.u32.u64.low %v5392_v52, %v2647_v36  ;;  %v5458_v1 = vmul.u32.u64.high %v5392_v52, %v2647_v36, %v5457_v7 }
 0x201   : > { %v1919_v51 = vsel %vm1909_vm14, nan, %v1918_v12  ;;  %v2651_v19 = vsel %vm2637_vm1, %v2648_v33, %v2650_v59  ;;  %v5464_v61 = vor.u32 %v1732_v0, %v1731_v14  ;;  %v1735_v55 = vshrl.u32 %v6392_v57, %v5395_v27  ;;  %v3753_v58 = vpop.eup %3752 }
 0x202   : > { %vm3516_vm8 = vcmp.lt.s32.totalorder %v3515_v47, 0  ;;  %v5469_v20 = vmul.u32.u64.low %v5392_v52, %v2651_v19  ;;  %v5470_v40 = vmul.u32.u64.high %v5392_v52, %v2651_v19, %v5469_v20  ;;  %v2659_v8 = vmul.u32 %v5392_v52, %v2643_v44  ;;  %v3755_v10 = vpop.eup %3754 }
 0x203   : > { %v2122_v42 = vxor.u32 2147483648, %v3753_v58  ;;  %v2469_v45 = vsel %vm3516_vm8, 0, %v3515_v47  ;;  %v1737_v50 = vshll.u32 %v6392_v57, %v5369_v41  ;;  %v1738_v14 = vshrl.u32 %v6399_v4, %v5395_v27 }
 0x204   : > { %v2119_v30 = vxor.u32 2147483648, %v3755_v10  ;;  %v2470_v0 = vsub.s32 32, %v2469_v45  ;;  %v2474_v12 = vsub.s32 4294967266, %v2469_v45  ;;  %v1736_v2 = vor.u32 %v1735_v55, %v1734_v11 }
 0x205   : > { %v2123_v15 = vsel %vm2121_vm2, %v2122_v42, %v3755_v10  ;;  %v2662_v9 = vadd.s32 1, %v5458_v1  ;;  %v1740_v52 = vshll.u32 %v6399_v4, %v5369_v41  ;;  %v1741_v32 = vshrl.u32 %v3977_v34, %v5395_v27 }
 0x206   : > { %v2120_v13 = vsel %vm2118_vm5, %v3753_v58, %v2119_v30  ;;  %v2471_v3 = vshll.u32 %v5431_v18, %v2469_v45  ;;  %v2472_v31 = vshrl.u32 %v5408_v6, %v2470_v0  ;;  %v2475_v48 = vadd.s32 127, %v2474_v12 }
 0x207   : > { %vm1931_vm9 = vcmp.gt.s32.totalorder %v5385_v38, 0  ;;  %v2124_v49 = vsel %vm2117_vm6, %v2120_v13, %v2123_v15  ;;  %vm2661_vm10 = vc.u32 %v5470_v40, %v5457_v7  ;;  %v1739_v28 = vor.u32 %v1738_v14, %v1737_v50 }
 0x208   : > { %v1742_v33 = vor.u32 %v1741_v32, %v1740_v52  ;;  %v2125_v44 = vsel %vm2115_vm7, nan, %v2124_v49  ;;  %v2473_v36 = vor.u32 %v2472_v31, %v2471_v3  ;;  %v2476_v46 = vshll.u32 %v2475_v48, 23 }
 0x209   : > { %v2663_v18 = vsel %vm2661_vm10, %v2662_v9, %v5458_v1  ;;  %v2127_v11 = vpack.c.bf16 %v2125_v44, %v1919_v51  ;;  %v1743_v47 = vshll.u32 %v3977_v34, %v5369_v41  ;;  %v1744_v21 = vshrl.u32 %v6393_v39, %v5395_v27 }
 0x20a   : > { %v2664_v6 = vadd.s32 %v2663_v18, %v2659_v8  ;;  %vm2306_vm11 = vcmp.gt.s32.totalorder %v4937_v60, 0  ;;  %v2477_v59 = vor.u32 4788187, %v2476_v46  ;;  %v1722_v19 = vor.u32 8388608, %v5400_v23 }
 0x20b   : > { %v1730_v16 = vshrl.u32 %v3973_v24, %v5395_v27  ;;  %vm1746_vm12 = vcmp.lt.s32.totalorder %v5403_v29, 1  ;;  %2140 = vmatprep.subr.bf16.mxu1 %v2127_v11  ;;  %v2480_v1 = vcvt.s32.f32 %v2473_v36  ;;  %v1745_v55 = vor.u32 %v1744_v21, %v1743_v47 }
 0x20c   : > { %v2665_v51 = vadd.s32 536870912, %v2664_v6  ;;  %vm1749_vm13 = vcmp.lt.s32.totalorder %v5403_v29, 4  ;;  %v2478_v41 = vand.u32 2147483647, %v2477_v59  ;;  %vm1748_vm14 = vcmp.lt.s32.totalorder %v5403_v29, 3 }
 0x20d   : > { %v1754_v58 = vsel %vm1746_vm12, %v5464_v61, %v1736_v2  ;;  %v1755_v20 = vsel %vm1749_vm13, %v1742_v33, 920167782  ;;  %v2484_v23 = vsub.s32 4, %v5410_v54  ;;  %v1758_v10 = vsel %vm1746_vm12, %v1736_v2, %v1739_v28 }
 0x20e   : > { %v2666_v8 = vshrl.u32 %v2665_v51, 30  ;;  %v1756_v27 = vsel %vm1748_vm14, %v1739_v28, %v1755_v20  ;;  %v2481_v42 = vmul.f32 %v2480_v1, %v2478_v41  ;;  %vm1747_vm15 = vcmp.lt.s32.totalorder %v5403_v29, 2 }
 0x20f   : > { %v1751_v45 = vsel %vm1749_vm13, %v1739_v28, 2102212464  ;;  %v1759_v50 = vsel %vm1749_vm13, %v1745_v55, 1326507024  ;;  %v1757_v30 = vsel %vm1747_vm15, %v1754_v58, %v1756_v27  ;;  %v1762_v12 = vshll.u32 %v1722_v19, 8 }
 0x210   : > { %v2667_v14 = vshll.u32 %v2666_v8, 30  ;;  %v1760_v0 = vsel %vm1748_vm14, %v1742_v33, %v1759_v50  ;;  %vm2400_vm1 = vcmp.lt.s32.totalorder %v5174_v43, 0  ;;  %v2482_v15 = vxor.u32 2147483648, %v2481_v42 }
 0x211   : > { %v1750_v9 = vsel %vm1746_vm12, %v1730_v16, %v5464_v61  ;;  %v1761_v52 = vsel %vm1747_vm15, %v1758_v10, %v1760_v0  ;;  %v1752_v13 = vsel %vm1748_vm14, %v1736_v2, %v1751_v45  ;;  %v1932_v48 = vsel %vm1931_vm9, %v5385_v38, 0 }
 0x212   : > { %v5526_v32 = vsub.s32 %v2664_v6, %v2667_v14  ;;  %v5530_v3 = vmul.u32.u64.low %v1762_v12, %v1761_v52  ;;  %v5531_v31 = vmul.u32.u64.high %v1762_v12, %v1761_v52, %v5530_v3  ;;  %v2483_v49 = vsel %vm2400_vm1, %v2482_v15, %v2481_v42 }
 0x213   : > { %v5536_v28 = vmul.u32.u64.low %v1762_v12, %v1757_v30  ;;  %v5537_v33 = vmul.u32.u64.high %v1762_v12, %v1757_v30, %v5536_v28  ;;  %vm5542_vm2 = vcmp.le.f32.partialorder %v2398_v25, 0.7853982  ;;  %v2485_v2 = vsel %vm2400_vm1, %v2484_v23, %v5410_v54 }
 0x214   : > { %v2670_v44 = vsub.s32 0, %v5526_v32  ;;  %v2486_v36 = vsel %vm5542_vm2, %v5174_v43, %v2483_v49  ;;  %v1753_v38 = vsel %vm1747_vm15, %v1750_v9, %v1752_v13  ;;  %v1920_v46 = vand.u32 2147483647, %v4420_v5  ;;  %v5610_v9 = vld [vmem:[%s6357_s3 + $0x20] sm:$0xff]  }
 0x215   : > { %v5557_v25 = vsel %vm2306_vm11, %v4937_v60, 0  ;;  %v1934_v18 = vand.u32 31, %v1932_v48  ;;  %v3517_v54 = vadd.s32 4294967169, %v5152_v53  ;;  %v2487_v6 = vsel %vm5542_vm2, 0, %v2485_v2  ;;  %v5574_v53 = vld [vmem:[%s6357_s3 + $0x18] sm:$0xff]  }
 0x216   : > { %v3522_v11 = vmin.u32 %v2670_v44, %v5526_v32  ;;  %vm1771_vm3 = vc.u32 %v5531_v31, %v5536_v28  ;;  %v1772_v29 = vadd.s32 1, %v5537_v33  ;;  %3756 = vcosq.f32 %v2486_v36  ;;  %3459 = vmatmul.mubr.msk.bf16.gmra.mrb[4].mxu1 %vm387_vm0, %v5574_v53  ;;  %3482 = vmatmul.mubr.msk.bf16.gmra.mrb[12].mxu0 %vm387_vm0, %v5574_v53 }
 0x217   : > { %v2690_v21 = vsub.s32 4, %v2666_v8  ;;  %v1769_v59 = vmul.u32 %v1762_v12, %v1753_v38  ;;  %v5569_v19 = vand.u32 8388607, %v1920_v46  ;;  %v5577_v16 = vand.u32 31, %v5557_v25  ;;  %1029 = vmatprep.mubr.bf16.mxu1 %v6409_v37  ;;  %1609 = vmatprep.mubr.bf16.mxu0 %v6409_v37 }
 0x218   : > { %v2672_v47 = vclz %v3522_v11  ;;  %v1773_v60 = vsel %vm1771_vm3, %v1772_v29, %v5537_v33  ;;  %v1935_v55 = vsub.s32 32, %v1934_v18  ;;  %v5579_v41 = vadd.s32 1, %v3517_v54 }
 0x219   : > { %v1774_v51 = vadd.s32 %v1773_v60, %v1769_v59  ;;  %3758 = vsinq.f32 %v2486_v36  ;;  %v5581_v58 = vand.u32 3, %v2487_v6  ;;  %vm2606_vm4 = vcmp.lt.s32.totalorder %v5214_v17, 0 }
 0x21a   : > { %v3523_v1 = vadd.s32 4294967294, %v2672_v47  ;;  %v2660_v20 = vadd.s32 %v5457_v7, %v5470_v40  ;;  %v5590_v23 = vsel %vm2606_vm4, %v2690_v21, %v2666_v8  ;;  %v1928_v42 = vor.u32 8388608, %v5569_v19 }
 0x21b   : > { %v1775_v27 = vadd.s32 536870912, %v1774_v51  ;;  %v5596_v45 = vshrl.u32 %v1932_v48, 5  ;;  %v1943_v50 = vshll.u32 %v6392_v57, %v1934_v18  ;;  %v1944_v8 = vshrl.u32 %v6399_v4, %v1935_v55 }
 0x21c   : > { %vm3524_vm5 = vcmp.lt.s32.totalorder %v3523_v1, 0  ;;  %v1938_v30 = vshrl.u32 %v6398_v35, %v1935_v55  ;;  %v1941_v0 = vshrl.u32 %v6392_v57, %v1935_v55  ;;  %v1947_v12 = vshrl.u32 %v3977_v34, %v1935_v55 }
 0x21d   : > { %v2675_v10 = vsel %vm3524_vm5, 0, %v3523_v1  ;;  %v5600_v14 = vshrl.u32 %v1775_v27, 30  ;;  %v1950_v15 = vshrl.u32 %v6393_v39, %v1935_v55  ;;  %v1937_v49 = vshll.u32 %v3973_v24, %v1934_v18  ;;  %v5644_v1 = vld [vmem:[%s6358_s4 + $0x18] sm:$0xff] }
 0x21e   : > { %v2676_v7 = vsub.s32 32, %v2675_v10  ;;  %v2680_v40 = vsub.s32 4294967266, %v2675_v10  ;;  %v2677_v52 = vshll.u32 %v5526_v32, %v2675_v10  ;;  %v1940_v33 = vshll.u32 %v6398_v35, %v1934_v18  ;;  %3460 = vmatmul.mubr.msk.bf16.gmra.mrb[8].mxu1 %vm387_vm0, %v5610_v9  ;;  %3483 = vmatmul.mubr.msk.bf16.gmra.mrb[16].mxu0 %vm387_vm0, %v5610_v9 }
 0x21f   : > { %v1777_v48 = vshll.u32 %v5600_v14, 30  ;;  %v1946_v61 = vshll.u32 %v6399_v4, %v1934_v18  ;;  %v1949_v2 = vshll.u32 %v3977_v34, %v1934_v18  ;;  %v1945_v54 = vor.u32 %v1944_v8, %v1943_v50  ;;  %1039 = vmatprep.mubr.bf16.mxu1 %v6409_v37  ;;  %1619 = vmatprep.mubr.bf16.mxu0 %v6409_v37 }
 0x220   : > { %v2678_v13 = vshrl.u32 %v2660_v20, %v2676_v7  ;;  %v2681_v3 = vadd.s32 127, %v2680_v40  ;;  %v5618_v44 = vpop.eup %3756  ;;  %vm5624_vm6 = vcmp.le.f32.partialorder %v2604_v56, 0.7853982  ;;  %v1939_v6 = vor.u32 %v1938_v30, %v1937_v49  ;;  %v5639_v56 = vld [vmem:[%s6358_s4 + $0x10] sm:$0xff]  ;;  %374 = vperm.xlu0 %3682, %v5644_v1  }
 0x221   : > { %v5620_v11 = vsub.s32 %v1774_v51, %v1777_v48  ;;  %v1942_v29 = vor.u32 %v1941_v0, %v1940_v33  ;;  %v1948_v47 = vor.u32 %v1947_v12, %v1946_v61  ;;  %v1951_v21 = vor.u32 %v1950_v15, %v1949_v2  ;;  %369 = vperm.xlu1 %3683, %v5639_v56   ;;  %v5662_v0 = vld [vmem:[%s6357_s3 + $0x28] sm:$0xff]  }
 0x222   : > { %v2679_v36 = vor.u32 %v2678_v13, %v2677_v52  ;;  %v2682_v38 = vshll.u32 %v2681_v3, 23  ;;  %v1936_v60 = vshrl.u32 %v3973_v24, %v1935_v55  ;;  %vm1952_vm7 = vcmp.lt.s32.totalorder %v5596_v45, 1 }
 0x223   : > { %v1780_v59 = vsub.s32 0, %v5620_v11  ;;  %v3759_v51 = vpop.eup %3758  ;;  %v2497_v55 = vxor.u32 2147483648, %v5618_v44  ;;  %vm1953_vm8 = vcmp.lt.s32.totalorder %v5596_v45, 2  ;;  %vm1954_vm9 = vcmp.lt.s32.totalorder %v5596_v45, 3 }
 0x224   : > { %v2683_v18 = vor.u32 4788187, %v2682_v38  ;;  %vm1955_vm10 = vcmp.lt.s32.totalorder %v5596_v45, 4  ;;  %vm2493_vm11 = vcmp.eq.s32.totalorder %v5581_v58, 0  ;;  %v2686_v27 = vcvt.s32.f32 %v2679_v36 }
 0x225   : > { %v3487_v10 = vmin.u32 %v1780_v59, %v5620_v11  ;;  %v1957_v50 = vsel %vm1955_vm10, %v1945_v54, 2102212464  ;;  %v1960_v7 = vsel %vm1952_vm7, %v1939_v6, %v1942_v29  ;;  %v1961_v40 = vsel %vm1955_vm10, %v1948_v47, 920167782 }
 0x226   : > { %v2684_v20 = vand.u32 2147483647, %v2683_v18  ;;  %v1964_v8 = vsel %vm1952_vm7, %v1942_v29, %v1945_v54  ;;  %v1965_v30 = vsel %vm1955_vm10, %v1951_v21, 1326507024  ;;  %vm2512_vm12 = vcmp.gt.s32.totalorder %v5579_v41, 0  ;;  %3461 = vmatmul.mubr.msk.bf16.gmra.mrb[12].mxu1 %vm387_vm0, %v5662_v0  ;;  %3484 = vmatmul.mubr.msk.bf16.gmra.mrb[20].mxu0 %vm387_vm0, %v5662_v0 }
 0x227   : > { %v2494_v12 = vxor.u32 2147483648, %v3759_v51  ;;  %v1782_v52 = vclz %v3487_v10  ;;  %v1956_v13 = vsel %vm1952_vm7, %v1936_v60, %v1939_v6  ;;  %v1958_v3 = vsel %vm1954_vm9, %v1942_v29, %v1957_v50  ;;  %2170 = vmatprep.mubr.bf16.mxu1 %v6409_v37  ;;  %2751 = vmatprep.mubr.bf16.mxu0 %v6409_v37 }
 0x228   : > { %v2687_v15 = vmul.f32 %v2686_v27, %v2684_v20  ;;  %v1962_v48 = vsel %vm1954_vm9, %v1945_v54, %v1961_v40  ;;  %v1966_v49 = vsel %vm1954_vm9, %v1948_v47, %v1965_v30  ;;  %v1968_v33 = vshll.u32 %v1928_v42, 8 }
 0x229   : > { %v3488_v2 = vadd.s32 4294967294, %v1782_v52  ;;  %v1963_v36 = vsel %vm1953_vm8, %v1960_v7, %v1962_v48  ;;  %v1967_v38 = vsel %vm1953_vm8, %v1964_v8, %v1966_v49  ;;  %vm2496_vm13 = vcmp.eq.s32.totalorder %v5581_v58, 2  ;;  %v5725_v48 = vpop.f32.mrb[0].mxu0 }
 0x22a   : > { %v2688_v61 = vxor.u32 2147483648, %v2687_v15  ;;  %v5679_v6 = vmul.u32.u64.low %v1968_v33, %v1967_v38  ;;  %v5680_v21 = vmul.u32.u64.high %v1968_v33, %v1967_v38, %v5679_v6  ;;  %v2693_v42 = vsel %vm5624_vm6, 0, %v5590_v23 }
 0x22b   : > { %v5682_v29 = vmul.u32.u64.low %v1968_v33, %v1963_v36  ;;  %v5683_v18 = vmul.u32.u64.high %v1968_v33, %v1963_v36, %v5682_v29  ;;  %vm3489_vm14 = vcmp.lt.s32.totalorder %v3488_v2, 0  ;;  %v1770_v47 = vadd.s32 %v5536_v28, %v5531_v31 }
 0x22c   : > { %v2689_v19 = vsel %vm2606_vm4, %v2688_v61, %v2687_v15  ;;  %v1785_v59 = vsel %vm3489_vm14, 0, %v3488_v2  ;;  %v1959_v60 = vsel %vm1953_vm8, %v1956_v13, %v1958_v3  ;;  %v2498_v23 = vsel %vm2496_vm13, %v2497_v55, %v3759_v51  ;;  %v5734_v61 = vpop.f32.mrb[1].mxu0 }
 0x22d   : > { %v2692_v54 = vsel %vm5624_vm6, %v5214_v17, %v2689_v19  ;;  %v1786_v20 = vsub.s32 32, %v1785_v59  ;;  %v1790_v27 = vsub.s32 4294967266, %v1785_v59  ;;  %v2495_v10 = vsel %vm2493_vm11, %v5618_v44, %v2494_v12 }
 0x22e   : > { %3760 = vcosq.f32 %v2692_v54  ;;  %vm1977_vm15 = vc.u32 %v5680_v21, %v5682_v29  ;;  %v1978_v31 = vadd.s32 1, %v5683_v18  ;;  %v2697_v28 = vand.u32 3, %v2693_v42 }
 0x22f   : > { %3762 = vsinq.f32 %v2692_v54  ;;  %v1788_v32 = vshrl.u32 %v1770_v47, %v1786_v20  ;;  %v1791_v45 = vadd.s32 127, %v1790_v27  ;;  %v1975_v50 = vmul.u32 %v1968_v33, %v1959_v60 }
 0x230   : > { %vm2492_vm1 = vcmp.lt.s32.totalorder %v5581_v58, 2  ;;  %v1979_v51 = vsel %vm1977_vm15, %v1978_v31, %v5683_v18  ;;  %v2310_v55 = vsub.s32 32, %v5577_v16  ;;  %v1787_v40 = vshll.u32 %v5620_v11, %v1785_v59  ;;  %v5742_v18 = vpop.f32.mrb[2].mxu0 }
 0x231   : > { %v2499_v7 = vsel %vm2492_vm1, %v2495_v10, %v2498_v23  ;;  %v1792_v44 = vshll.u32 %v1791_v45, 23  ;;  %v1980_v8 = vadd.s32 %v1979_v51, %v1975_v50  ;;  %v5718_v30 = vsel %vm2512_vm12, %v5579_v41, 0  ;;  %v5749_v59 = vpop.f32.mrb[3].mxu0 }
 0x232   : > { %vm2490_vm2 = vweird.f32 %v5174_v43  ;;  %v2295_v12 = vand.u32 2147483647, %v4286_v63  ;;  %vm2698_vm3 = vcmp.lt.s32.totalorder %v2697_v28, 2  ;;  %vm2699_vm4 = vcmp.eq.s32.totalorder %v2697_v28, 0 }
 0x233   : > { %v1789_v58 = vor.u32 %v1788_v32, %v1787_v40  ;;  %v1793_v15 = vor.u32 4788187, %v1792_v44  ;;  %v1981_v52 = vadd.s32 536870912, %v1980_v8  ;;  %v2500_v13 = vsel %vm2490_vm2, nan, %v2499_v7 }
 0x234   : > { %vm2696_vm5 = vweird.f32 %v5214_v17  ;;  %vm2702_vm6 = vcmp.eq.s32.totalorder %v2697_v28, 2  ;;  %v2313_v11 = vshrl.u32 %v6398_v35, %v2310_v55  ;;  %v2322_v3 = vshrl.u32 %v3977_v34, %v2310_v55 }
 0x235   : > { %v5727_v41 = vshrl.u32 %v1981_v52, 30  ;;  %v5730_v43 = vshrl.u32 %v5557_v25, 5  ;;  %v2316_v49 = vshrl.u32 %v6392_v57, %v2310_v55  ;;  %v2319_v33 = vshrl.u32 %v6399_v4, %v2310_v55 }
 0x236   : > { %v1794_v2 = vand.u32 2147483647, %v1793_v15  ;;  %v2302_v36 = vand.u32 8388607, %v2295_v12  ;;  %v2312_v38 = vshll.u32 %v3973_v24, %v5577_v16  ;;  %v2321_v6 = vshll.u32 %v6399_v4, %v5577_v16 }
 0x237   : > { %v1796_v19 = vcvt.s32.f32 %v1789_v58  ;;  %v1983_v42 = vshll.u32 %v5727_v41, 30  ;;  %v2315_v54 = vshll.u32 %v6398_v35, %v5577_v16  ;;  %v2318_v47 = vshll.u32 %v6392_v57, %v5577_v16 }
 0x238   : > { %v3761_v25 = vpop.eup %3760  ;;  %v2314_v20 = vor.u32 %v2313_v11, %v2312_v38  ;;  %v2323_v27 = vor.u32 %v2322_v3, %v2321_v6  ;;  %v2325_v10 = vshrl.u32 %v6393_v39, %v2310_v55  ;;  %v2303_v40 = vor.u32 8388608, %v2302_v36 }
 0x239   : > { %v3763_v60 = vpop.eup %3762  ;;  %v2703_v23 = vxor.u32 2147483648, %v3761_v25  ;;  %v1984_v32 = vsub.s32 %v1980_v8, %v1983_v42  ;;  %v2317_v45 = vor.u32 %v2316_v49, %v2315_v54  ;;  %v2320_v50 = vor.u32 %v2319_v33, %v2318_v47 }
 0x23a   : > { %v2700_v31 = vxor.u32 2147483648, %v3763_v60  ;;  %v1797_v7 = vmul.f32 %v1796_v19, %v1794_v2  ;;  %v2324_v44 = vshll.u32 %v3977_v34, %v5577_v16  ;;  %v2311_v52 = vshrl.u32 %v3973_v24, %v2310_v55 }
 0x23b   : > { %v2704_v51 = vsel %vm2702_vm6, %v2703_v23, %v3763_v60  ;;  %v1986_v15 = vsub.s32 0, %v1984_v32  ;;  %vm2330_vm7 = vcmp.lt.s32.totalorder %v5730_v43, 4  ;;  %vm2327_vm8 = vcmp.lt.s32.totalorder %v5730_v43, 1 }
 0x23c   : > { %v2701_v58 = vsel %vm2699_vm4, %v3761_v25, %v2700_v31  ;;  %v2326_v3 = vor.u32 %v2325_v10, %v2324_v44  ;;  %v2336_v8 = vsel %vm2330_vm7, %v2323_v27, 920167782  ;;  %v2332_v16 = vsel %vm2330_vm7, %v2320_v50, 2102212464 }
 0x23d   : > { %v2705_v11 = vsel %vm2698_vm3, %v2701_v58, %v2704_v51  ;;  %v3495_v33 = vmin.u32 %v1986_v15, %v1984_v32  ;;  %v2335_v2 = vsel %vm2327_vm8, %v2314_v20, %v2317_v45  ;;  %v1798_v55 = vxor.u32 2147483648, %v1797_v7 }
 0x23e   : > { %v2706_v49 = vsel %vm2696_vm5, nan, %v2705_v11  ;;  %vm2328_vm9 = vcmp.lt.s32.totalorder %v5730_v43, 2  ;;  %vm2329_vm10 = vcmp.lt.s32.totalorder %v5730_v43, 3  ;;  %v2331_v38 = vsel %vm2327_vm8, %v2311_v52, %v2314_v20 }
 0x23f   : > { %v2708_v36 = vpack.c.bf16 %v2706_v49, %v2500_v13  ;;  %v1988_v28 = vclz %v3495_v33  ;;  %v2337_v6 = vsel %vm2329_vm10, %v2320_v50, %v2336_v8  ;;  %v2339_v25 = vsel %vm2327_vm8, %v2317_v45, %v2320_v50 }
 0x240   : > { %v2333_v19 = vsel %vm2329_vm10, %v2317_v45, %v2332_v16  ;;  %v2338_v17 = vsel %vm2328_vm9, %v2335_v2, %v2337_v6  ;;  %v2340_v42 = vsel %vm2330_vm7, %v2326_v3, 1326507024  ;;  %v2343_v54 = vshll.u32 %v2303_v40, 8 }
 0x241   : > { %2721 = vmatprep.subr.bf16.mxu0 %v2708_v36  ;;  %v2515_v13 = vand.u32 31, %v5718_v30  ;;  %vm1716_vm11 = vcmp.lt.s32.totalorder %v4283_v62, 0  ;;  %v3496_v47 = vadd.s32 4294967294, %v1988_v28  ;;  %v2341_v60 = vsel %vm2329_vm10, %v2323_v27, %v2340_v42 }
 0x242   : > { %v1799_v23 = vsel %vm1716_vm11, %v1798_v55, %v1797_v7  ;;  %v2342_v20 = vsel %vm2328_vm9, %v2339_v25, %v2341_v60  ;;  %v5778_v10 = vmul.u32.u64.low %v2343_v54, %v2338_v17  ;;  %v5779_v31 = vmul.u32.u64.high %v2343_v54, %v2338_v17, %v5778_v10 }
 0x243   : > { %vm3497_vm12 = vcmp.lt.s32.totalorder %v3496_v47, 0  ;;  %v2334_v45 = vsel %vm2328_vm9, %v2331_v38, %v2333_v19  ;;  %v5784_v50 = vmul.u32.u64.low %v2343_v54, %v2342_v20  ;;  %v5785_v51 = vmul.u32.u64.high %v2343_v54, %v2342_v20, %v5784_v50 }
 0x244   : > { %vm5789_vm13 = vcmp.le.f32.partialorder %v1714_v26, 0.7853982  ;;  %v1800_v7 = vsub.s32 4, %v5600_v14  ;;  %v1991_v40 = vsel %vm3497_vm12, 0, %v3496_v47  ;;  %v1976_v43 = vadd.s32 %v5682_v29, %v5680_v21 }
 0x245   : > { %v1802_v44 = vsel %vm5789_vm13, %v4283_v62, %v1799_v23  ;;  %v1992_v58 = vsub.s32 32, %v1991_v40  ;;  %v1996_v15 = vsub.s32 4294967266, %v1991_v40  ;;  %v2350_v52 = vmul.u32 %v2343_v54, %v2334_v45 }
 0x246   : > { %v2353_v11 = vadd.s32 1, %v5779_v31  ;;  %v2501_v26 = vand.u32 2147483647, %v4438_v22  ;;  %v2516_v3 = vsub.s32 32, %v2515_v13  ;;  %v1993_v8 = vshll.u32 %v1984_v32, %v1991_v40 }
 0x247   : > { %v1994_v49 = vshrl.u32 %v1976_v43, %v1992_v58  ;;  %v1997_v33 = vadd.s32 127, %v1996_v15  ;;  %vm2352_vm14 = vc.u32 %v5785_v51, %v5778_v10  ;;  %3764 = vcosq.f32 %v1802_v44 }
 0x248   : > { %v2354_v16 = vsel %vm2352_vm14, %v2353_v11, %v5779_v31  ;;  %v5807_v29 = vsel %vm1716_vm11, %v1800_v7, %v5600_v14  ;;  %3766 = vsinq.f32 %v1802_v44  ;;  %v2508_v32 = vand.u32 8388607, %v2501_v26 }
 0x249   : > { %v1995_v2 = vor.u32 %v1994_v49, %v1993_v8  ;;  %v1998_v36 = vshll.u32 %v1997_v33, 23  ;;  %v2355_v21 = vadd.s32 %v2354_v16, %v2350_v52  ;;  %v2519_v55 = vshrl.u32 %v6398_v35, %v2516_v3 }
 0x24a   : > { %v5813_v6 = vshrl.u32 %v5718_v30, 5  ;;  %v2522_v25 = vshrl.u32 %v6392_v57, %v2516_v3  ;;  %v2518_v17 = vshll.u32 %v3973_v24, %v2515_v13  ;;  %v2521_v42 = vshll.u32 %v6398_v35, %v2515_v13 }
 0x24b   : > { %v1999_v28 = vor.u32 4788187, %v1998_v36  ;;  %v2356_v38 = vadd.s32 536870912, %v2355_v21  ;;  %v2002_v19 = vcvt.s32.f32 %v1995_v2  ;;  %v2525_v14 = vshrl.u32 %v6399_v4, %v2516_v3 }
 0x24c   : > { %v2527_v60 = vshll.u32 %v6399_v4, %v2515_v13  ;;  %v2528_v23 = vshrl.u32 %v3977_v34, %v2516_v3  ;;  %v2520_v20 = vor.u32 %v2519_v55, %v2518_v17  ;;  %v2524_v30 = vshll.u32 %v6392_v57, %v2515_v13 }
 0x24d   : > { %v2000_v54 = vand.u32 2147483647, %v1999_v28  ;;  %v5819_v47 = vshrl.u32 %v2356_v38, 30  ;;  %v2530_v31 = vshll.u32 %v3977_v34, %v2515_v13  ;;  %v2531_v45 = vshrl.u32 %v6393_v39, %v2516_v3 }
 0x24e   : > { %v2523_v35 = vor.u32 %v2522_v25, %v2521_v42  ;;  %v2529_v40 = vor.u32 %v2528_v23, %v2527_v60  ;;  %vm5829_vm15 = vcmp.le.f32.partialorder %v1920_v46, 0.7853982  ;;  %vm1922_vm1 = vcmp.lt.s32.totalorder %v4420_v5, 0 }
 0x24f   : > { %v2003_v50 = vmul.f32 %v2002_v19, %v2000_v54  ;;  %v2358_v7 = vshll.u32 %v5819_v47, 30  ;;  %v2526_v4 = vor.u32 %v2525_v14, %v2524_v30  ;;  %v2532_v43 = vor.u32 %v2531_v45, %v2530_v31  ;;  %v5895_v31 = vld [vmem:[%s6358_s4 + $0x8] sm:$0xff] }
 0x250   : > { %v2006_v34 = vsub.s32 4, %v5727_v41  ;;  %vm2536_vm2 = vcmp.lt.s32.totalorder %v5813_v6, 4  ;;  %v1803_v39 = vsel %vm5789_vm13, 0, %v5807_v29  ;;  %v2509_v58 = vor.u32 8388608, %v2508_v32 }
 0x251   : > { %v2004_v57 = vxor.u32 2147483648, %v2003_v50  ;;  %v5835_v13 = vsub.s32 %v2355_v21, %v2358_v7  ;;  %vm2533_vm3 = vcmp.lt.s32.totalorder %v5813_v6, 1  ;;  %v2542_v46 = vsel %vm2536_vm2, %v2529_v40, 920167782  ;;  %v3765_v15 = vpop.eup %3764 }
 0x252   : > { %vm2535_vm4 = vcmp.lt.s32.totalorder %v5813_v6, 3  ;;  %v2541_v8 = vsel %vm2533_vm3, %v2520_v20, %v2523_v35  ;;  %v3767_v49 = vpop.eup %3766  ;;  %v2545_v16 = vsel %vm2533_vm3, %v2523_v35, %v2526_v4  ;;  %v2546_v2 = vsel %vm2536_vm2, %v2532_v43, 1326507024 }
 0x253   : > { %v2005_v52 = vsel %vm1922_vm1, %v2004_v57, %v2003_v50  ;;  %v2361_v11 = vsub.s32 0, %v5835_v13  ;;  %v2543_v33 = vsel %vm2535_vm4, %v2526_v4, %v2542_v46  ;;  %v2007_v36 = vsel %vm1922_vm1, %v2006_v34, %v5727_v41 }
 0x254   : > { %v2008_v27 = vsel %vm5829_vm15, %v4420_v5, %v2005_v52  ;;  %v2517_v29 = vshrl.u32 %v3973_v24, %v2516_v3  ;;  %vm2534_vm5 = vcmp.lt.s32.totalorder %v5813_v6, 2  ;;  %v2538_v32 = vsel %vm2536_vm2, %v2526_v4, 2102212464 }
 0x255   : > { %3768 = vcosq.f32 %v2008_v27  ;;  %v3510_v21 = vmin.u32 %v2361_v11, %v5835_v13  ;;  %v2547_v55 = vsel %vm2535_vm4, %v2529_v40, %v2546_v2  ;;  %v2544_v38 = vsel %vm2534_vm5, %v2541_v8, %v2543_v33 }
 0x256   : > { %3770 = vsinq.f32 %v2008_v27  ;;  %v2548_v41 = vsel %vm2534_vm5, %v2545_v16, %v2547_v55  ;;  %v2549_v25 = vshll.u32 %v2509_v58, 8  ;;  %v2537_v24 = vsel %vm2533_vm3, %v2517_v29, %v2520_v20  ;;  %v5889_v20 = vld [vmem:[%s6358_s4] sm:$0xff] }
 0x257   : > { %v2363_v28 = vclz %v3510_v21  ;;  %v2539_v19 = vsel %vm2535_vm4, %v2523_v35, %v2538_v32  ;;  %v3979_v14 = vmov 1   ;;  %v1807_v54 = vand.u32 3, %v1803_v39 }
 0x258   : > { %v5877_v17 = vmul.u32.u64.low %v2549_v25, %v2548_v41  ;;  %v5878_v42 = vmul.u32.u64.high %v2549_v25, %v2548_v41, %v5877_v17  ;;  %3684 = vset.pattern.permute.xlu1 %v3979_v14  ;;  %3685 = vset.pattern.permute.xlu0 %v3979_v14  ;;  %v2009_v60 = vsel %vm5829_vm15, 0, %v2007_v36  ;;  %v1810_v45 = vxor.u32 2147483648, %v3767_v49 }
 0x259   : > { %v3511_v3 = vadd.s32 4294967294, %v2363_v28  ;;  %v5882_v23 = vmul.u32.u64.low %v2549_v25, %v2544_v38  ;;  %v5883_v30 = vmul.u32.u64.high %v2549_v25, %v2544_v38, %v5882_v23  ;;  %448 = vperm.xlu1 %3684, %v5889_v20   ;;  %452 = vperm.xlu0 %3685, %v5895_v31   ;;  %v1813_v50 = vxor.u32 2147483648, %v3765_v15 }
 0x25a   : > { %v2540_v35 = vsel %vm2534_vm5, %v2537_v24, %v2539_v19  ;;  %v2013_v40 = vand.u32 3, %v2009_v60  ;;  %vm1809_vm7 = vcmp.eq.s32.totalorder %v1807_v54, 0  ;;  %vm1812_vm8 = vcmp.eq.s32.totalorder %v1807_v54, 2 }
 0x25b   : > { %vm3512_vm6 = vcmp.lt.s32.totalorder %v3511_v3, 0  ;;  %vm2558_vm9 = vc.u32 %v5878_v42, %v5882_v23  ;;  %v2559_v4 = vadd.s32 1, %v5883_v30  ;;  %v3980_v43 = vmov 2  }
 0x25c   : > { %v2366_v7 = vsel %vm3512_vm6, 0, %v3511_v3  ;;  %v1811_v34 = vsel %vm1809_vm7, %v3765_v15, %v1810_v45  ;;  %v1814_v39 = vsel %vm1812_vm8, %v1813_v50, %v3767_v49  ;;  %v2556_v46 = vmul.u32 %v2549_v25, %v2540_v35 }
 0x25d   : > { %v2371_v44 = vsub.s32 4294967266, %v2366_v7  ;;  %456 = vperm.xlu1 %3684, %v5639_v56   ;;  %3686 = vset.pattern.permute.xlu0 %v3980_v43  ;;  %vm1808_vm10 = vcmp.lt.s32.totalorder %v1807_v54, 2  ;;  %v2560_v11 = vsel %vm2558_vm9, %v2559_v4, %v5883_v30  ;;  %vm2018_vm11 = vcmp.eq.s32.totalorder %v2013_v40, 2 }
 0x25e   : > { %3034 = vperm.xlu0 %3686, %v5889_v20   ;;  %v2367_v27 = vsub.s32 32, %v2366_v7  ;;  %v2561_v33 = vadd.s32 %v2560_v11, %v2556_v46  ;;  %v1815_v16 = vsel %vm1808_vm10, %v1811_v34, %v1814_v39  ;;  %vm2014_vm12 = vcmp.lt.s32.totalorder %v2013_v40, 2 }
 0x25f   : > { %v3769_v57 = vpop.eup %3768  ;;  %v2372_v58 = vadd.s32 127, %v2371_v44  ;;  %vm2015_vm13 = vcmp.eq.s32.totalorder %v2013_v40, 0  ;;  %v2351_v49 = vadd.s32 %v5778_v10, %v5785_v51  ;;  %vm1806_vm14 = vweird.f32 %v4283_v62  ;;  %v5917_v51 = vpop.f32.mrb[4].mxu0 }
 0x260   : > { %v3771_v6 = vpop.eup %3770  ;;  %v2019_v52 = vxor.u32 2147483648, %v3769_v57  ;;  %v2562_v21 = vadd.s32 536870912, %v2561_v33  ;;  %vm2012_vm15 = vweird.f32 %v4420_v5  ;;  %v1816_v32 = vsel %vm1806_vm14, nan, %v1815_v16  ;;  %v5919_v3 = vpop.f32.mrb[5].mxu0 }
 0x261   : > { %v2016_v8 = vxor.u32 2147483648, %v3771_v6  ;;  %460 = vperm.xlu1 %3684, %v5644_v1   ;;  %v2373_v36 = vshll.u32 %v2372_v58, 23  ;;  %v2369_v28 = vshrl.u32 %v2351_v49, %v2367_v27  ;;  %v2368_v25 = vshll.u32 %v5835_v13, %v2366_v7  ;;  %v5921_v19 = vpop.f32.mrb[6].mxu0  ;;  %v5926_v13 = vld [vmem:[%s6357_s3 + $0x10] sm:$0xff]   ;;  %v361_v16 = vpop.permute.xlu0 %360 }
 0x262   : > { %v2020_v2 = vsel %vm2018_vm11, %v2019_v52, %v3771_v6  ;;  %3046 = vperm.xlu0 %3686, %v5644_v1   ;;  %v5912_v38 = vshrl.u32 %v2562_v21, 30  ;;  %v5931_v54 = vpop.f32.mrb[7].mxu0  ;;  %v2557_v44 = vadd.s32 %v5882_v23, %v5878_v42  ;;  %vm2297_vm2 = vcmp.lt.s32.totalorder %v4286_v63, 0 }
 0x263   : > { %v2017_v15 = vsel %vm2015_vm13, %v3769_v57, %v2016_v8  ;;  %v2374_v24 = vor.u32 4788187, %v2373_v36  ;;  %v2370_v62 = vor.u32 %v2369_v28, %v2368_v25  ;;  %vm5944_vm3 = vcmp.le.f32.partialorder %v2295_v12, 0.7853982 }
 0x264   : > { %v2021_v29 = vsel %vm2014_vm12, %v2017_v15, %v2020_v2  ;;  %v2564_v10 = vshll.u32 %v5912_v38, 30  ;;  %v2381_v27 = vsub.s32 4, %v5819_v47  ;;  %vm2503_vm4 = vcmp.lt.s32.totalorder %v4438_v22, 0 }
 0x265   : > { %v2022_v55 = vsel %vm2012_vm15, nan, %v2021_v29  ;;  %3687 = vset.pattern.permute.xlu1 %v3980_v43  ;;  %v2375_v17 = vand.u32 2147483647, %v2374_v24  ;;  %v2377_v60 = vcvt.s32.f32 %v2370_v62  ;;  %vm5958_vm5 = vcmp.le.f32.partialorder %v2501_v26, 0.7853982  ;;  %v365_v29 = vpop.permute.xlu1 %364 }
 0x266   : > { %v2126_v41 = vpack.c.bf16 %v2022_v55, %v1816_v32  ;;  %3038 = vperm.xlu1 %3687, %v5895_v31   ;;  %v2565_v5 = vsub.s32 %v2561_v33, %v2564_v10  ;;  %v2587_v49 = vsub.s32 4, %v5912_v38  ;;  %v5968_v36 = vadd.f32 %v5725_v48, %v361_v16 }
 0x267   : > { %v2378_v45 = vmul.f32 %v2377_v60, %v2375_v17  ;;  %v2382_v21 = vsel %vm2297_vm2, %v2381_v27, %v5819_v47  ;;  %v5977_v32 = vadd.f32 %v5734_v61, %v361_v16  ;;  %v5981_v28 = vadd.f32 %v5742_v18, %v365_v29 }
 0x268   : > { %2141 = vmatpush1.bf16.msra.mxu1 %v2126_v41  ;;  %v2567_v14 = vsub.s32 0, %v2565_v5  ;;  %v5985_v47 = vadd.f32 %v5749_v59, %v365_v29  ;;  %v2384_v61 = vsel %vm5944_vm3, 0, %v2382_v21  ;;  %v2588_v62 = vsel %vm2503_vm4, %v2587_v49, %v5912_v38 }
 0x269   : > { %v2379_v35 = vxor.u32 2147483648, %v2378_v45  ;;  %v3981_v59 = vmov 4   ;;  %vm2387_vm12 = vweird.f32 %v4286_v63  ;;  %vm2593_vm13 = vweird.f32 %v4438_v22 }
 0x26a   : > { %3042 = vperm.xlu1 %3687, %v5639_v56   ;;  %v3518_v30 = vmin.u32 %v2567_v14, %v2565_v5  ;;  %3689 = vset.pattern.permute.xlu0 %v3981_v59 }
 0x26b   : > { %3504 = vmatmul.mubr.msk.bf16.vlgmr.msra.gmra.mrb[16].mxu1 %vm387_vm0, %v5926_v13  ;;  %v2380_v57 = vsel %vm2297_vm2, %v2379_v35, %v2378_v45  ;;  %v2590_v45 = vsel %vm5958_vm5, 0, %v2588_v62  ;;  %3147 = vperm.xlu0 %3689, %v5895_v31  }
 0x26c   : > { %2180 = vmatprep.mubr.bf16.mxu1 %v6409_v37  ;;  %v2569_v50 = vclz %v3518_v30  ;;  %v2383_v42 = vsel %vm5944_vm3, %v4286_v63, %v2380_v57  ;;  %v2388_v30 = vand.u32 3, %v2384_v61  ;;  %v2594_v35 = vand.u32 3, %v2590_v45 }
 0x26d   : > { %3772 = vcosq.f32 %v2383_v42 }
 0x26e   : > { %v3519_v7 = vadd.s32 4294967294, %v2569_v50  ;;  %3774 = vsinq.f32 %v2383_v42  ;;  %3688 = vset.pattern.permute.xlu1 %v3981_v59  ;;  %vm2390_vm6 = vcmp.eq.s32.totalorder %v2388_v30, 0  ;;  %vm2393_vm7 = vcmp.eq.s32.totalorder %v2388_v30, 2 }
 0x26f   : > { %3143 = vperm.xlu1 %3688, %v5889_v20   ;;  %3151 = vperm.xlu0 %3689, %v5639_v56   ;;  %vm2389_vm8 = vcmp.lt.s32.totalorder %v2388_v30, 2  ;;  %vm2599_vm9 = vcmp.eq.s32.totalorder %v2594_v35, 2  ;;  %vm2596_vm10 = vcmp.eq.s32.totalorder %v2594_v35, 0  ;;  %vm2595_vm11 = vcmp.lt.s32.totalorder %v2594_v35, 2 }
 0x270   : > { %vm3520_vm1 = vcmp.lt.s32.totalorder %v3519_v7, 0 }
 0x271   : > { %v2572_v40 = vsel %vm3520_vm1, 0, %v3519_v7 }
 0x272   : > { %v2573_v4 = vsub.s32 32, %v2572_v40  ;;  %v2577_v43 = vsub.s32 4294967266, %v2572_v40  ;;  %v2574_v34 = vshll.u32 %v2565_v5, %v2572_v40  ;;  %v3982_v40 = vmov 5  }
 0x273   : > { %3505 = vmatmul.mubr.msk.bf16.gmra.mrb[20].mxu1 %vm387_vm0, %v5574_v53  ;;  %3690 = vset.pattern.permute.xlu1 %v3982_v40 }
 0x274   : > { %2190 = vmatprep.mubr.bf16.mxu1 %v6409_v37  ;;  %v2575_v39 = vshrl.u32 %v2557_v44, %v2573_v4  ;;  %v2578_v58 = vadd.s32 127, %v2577_v43  ;;  %3167 = vperm.xlu1 %3690, %v5889_v20  }
 0x275   : > { %3692 = vset.pattern.permute.xlu0 %v3982_v40 }
 0x276   : > { %v2576_v6 = vor.u32 %v2575_v39, %v2574_v34  ;;  %v2579_v52 = vshll.u32 %v2578_v58, 23  ;;  %3175 = vperm.xlu0 %3692, %v5639_v56  }
 0x277   : > { %v3773_v10 = vpop.eup %3772 }
 0x278   : > { %v2580_v23 = vor.u32 4788187, %v2579_v52  ;;  %v2583_v8 = vcvt.s32.f32 %v2576_v6  ;;  %v3775_v17 = vpop.eup %3774  ;;  %v2394_v7 = vxor.u32 2147483648, %v3773_v10  ;;  %3171 = vperm.xlu1 %3690, %v5895_v31  }
 0x279   : > { %v2391_v38 = vxor.u32 2147483648, %v3775_v17 }
 0x27a   : > { %v2581_v11 = vand.u32 2147483647, %v2580_v23  ;;  %v2395_v43 = vsel %vm2393_vm7, %v2394_v7, %v3775_v17 }
 0x27b   : > { %3506 = vmatmul.mubr.msk.bf16.gmra.mrb[24].mxu1 %vm387_vm0, %v5610_v9  ;;  %v2392_v4 = vsel %vm2390_vm6, %v3773_v10, %v2391_v38 }
 0x27c   : > { %2200 = vmatprep.mubr.bf16.mxu1 %v6409_v37  ;;  %v2584_v12 = vmul.f32 %v2583_v8, %v2581_v11  ;;  %v2396_v58 = vsel %vm2389_vm8, %v2392_v4, %v2395_v43  ;;  %3691 = vset.pattern.permute.xlu1 %v3981_v59 }
 0x27d   : > { %v2397_v52 = vsel %vm2387_vm12, nan, %v2396_v58  ;;  %3155 = vperm.xlu1 %3691, %v5644_v1  }
 0x27e   : > { %v2585_v33 = vxor.u32 2147483648, %v2584_v12 }
 0x280   : > { %v2586_v15 = vsel %vm2503_vm4, %v2585_v33, %v2584_v12  ;;  %v1011_v55 = vpop.f32.mrb[0].mxu1 }
 0x281   : > { %v2589_v26 = vsel %vm5958_vm5, %v4438_v22, %v2586_v15  ;;  %v1058_v48 = vmul.f32 %v1011_v55, %v5968_v36  ;;  %v1013_v41 = vpop.f32.mrb[1].mxu1  ;;  %3693 = vset.pattern.permute.xlu1 %v3982_v40 }
 0x282   : > { %3776 = vcosq.f32 %v2589_v26  ;;  %v1059_v25 = vmul.f32 %v1013_v41, %v5977_v32  ;;  %v1015_v24 = vpop.f32.mrb[2].mxu1  ;;  %3179 = vperm.xlu1 %3693, %v5644_v1  }
 0x283   : > { %3507 = vmatmul.mubr.msk.bf16.gmra.mrb[28].mxu1 %vm387_vm0, %v5662_v0  ;;  %3778 = vsinq.f32 %v2589_v26  ;;  %v1060_v18 = vmul.f32 %v1015_v24, %v5981_v28  ;;  %v1017_v5 = vpop.f32.mrb[3].mxu1 }
 0x284   : > { %3258 = vmatprep.mubr.bf16.mxu1 %v6409_v37  ;;  %v1061_v14 = vmul.f32 %v1017_v5, %v5985_v47 }
 0x285   : > { %v5995_v60 = vadd.f32 %v1060_v18, %v1058_v48 }
 0x286   : > { %v5999_v50 = vadd.f32 %v1061_v14, %v1059_v25 }
 0x288   : > { %v1074_v2 = vrot.slane %v5999_v50, 4 }
 0x28a   : > { %v1075_v26 = vadd.f32 %v1074_v2, %v5999_v50 }
 0x28c   : > { %v3777_v44 = vpop.eup %3776  ;;  %v1076_v62 = vrot.slane %v1075_v26, 2 }
 0x28d   : > { %v3779_v57 = vpop.eup %3778  ;;  %v2600_v34 = vxor.u32 2147483648, %v3777_v44 }
 0x28e   : > { %v2597_v39 = vxor.u32 2147483648, %v3779_v57  ;;  %v1077_v40 = vadd.f32 %v1076_v62, %v1075_v26 }
 0x28f   : > { %v2601_v46 = vsel %vm2599_vm9, %v2600_v34, %v3779_v57 }
 0x290   : > { %v2598_v6 = vsel %vm2596_vm10, %v3777_v44, %v2597_v39 }
 0x291   : > { %v2602_v20 = vsel %vm2595_vm11, %v2598_v6, %v2601_v46 }
 0x292   : > { %v2603_v42 = vsel %vm2593_vm13, nan, %v2602_v20  ;;  %v1078_v20 = vrot.slane %v1077_v40, 1 }
 0x293   : > { %v2707_v23 = vpack.c.bf16 %v2603_v42, %v2397_v52 }
 0x295   : > { %2722 = vmatpush1.bf16.msra.mxu0 %v2707_v23 }
 0x298   : > { %3527 = vmatmul.mubr.msk.bf16.vlgmr.msra.gmra.mrb[24].mxu0 %vm387_vm0, %v5926_v13 }
 0x299   : > { %2761 = vmatprep.mubr.bf16.mxu0 %v6409_v37 }
 0x29f   : > { %v375_v16 = vpop.permute.xlu0 %374 }
 0x2a0   : > { %3528 = vmatmul.mubr.msk.bf16.gmra.mrb[28].mxu0 %vm387_vm0, %v5574_v53  ;;  %v370_v33 = vpop.permute.xlu1 %369  ;;  %v6041_v7 = vadd.f32 %v5921_v19, %v375_v16  ;;  %v6044_v35 = vadd.f32 %v5931_v54, %v375_v16 }
 0x2a1   : > { %2771 = vmatprep.mubr.bf16.mxu0 %v6409_v37  ;;  %v6035_v14 = vadd.f32 %v5917_v51, %v370_v33 }
 0x2a8   : > { %3529 = vmatmul.mubr.msk.bf16.gmra.mrb[32].mxu0 %vm387_vm0, %v5610_v9  ;;  %v1067_v9 = vrot.slane %v5995_v60, 4 }
 0x2a9   : > { %2781 = vmatprep.mubr.bf16.mxu0 %v6409_v37 }
 0x2aa   : > { %v1068_v49 = vadd.f32 %v1067_v9, %v5995_v60  ;;  %v6038_v60 = vadd.f32 %v5919_v3, %v370_v33 }
 0x2ac   : > { %v1591_v63 = vpop.f32.mrb[8].mxu0  ;;  %v1069_v41 = vrot.slane %v1068_v49, 2 }
 0x2ad   : > { %v1639_v22 = vmul.f32 %v1591_v63, %v5968_v36  ;;  %v1593_v56 = vpop.f32.mrb[9].mxu0 }
 0x2ae   : > { %v1640_v31 = vmul.f32 %v1593_v56, %v5977_v32  ;;  %v1595_v13 = vpop.f32.mrb[10].mxu0  ;;  %v1070_v30 = vadd.f32 %v1069_v41, %v1068_v49 }
 0x2af   : > { %v1641_v11 = vmul.f32 %v1595_v13, %v5981_v28  ;;  %v1597_v1 = vpop.f32.mrb[11].mxu0 }
 0x2b0   : > { %v1642_v8 = vmul.f32 %v1597_v1, %v5985_v47  ;;  %3530 = vmatmul.mubr.msk.bf16.gmra.mrb[36].mxu0 %vm387_vm0, %v5662_v0  ;;  %v1071_v34 = vrot.slane %v1070_v30, 1 }
 0x2b1   : > { %v1647_v53 = vadd.f32 %v1641_v11, %v1639_v22  ;;  %v1079_v11 = vadd.f32 %v1078_v20, %v1077_v40 }
 0x2b2   : > { %v1654_v12 = vadd.f32 %v1642_v8, %v1640_v31  ;;  %v1072_v31 = vadd.f32 %v1071_v34, %v1070_v30 }
 0x2b3   : > { %v1648_v27 = vrot.slane %v1647_v53, 4 }
 0x2b4   : > { %v1655_v15 = vrot.slane %v1654_v12, 4 }
 0x2b5   : > { %v1649_v21 = vadd.f32 %v1648_v27, %v1647_v53 }
 0x2b6   : > { %v1656_v29 = vadd.f32 %v1655_v15, %v1654_v12 }
 0x2b7   : > { %v1650_v0 = vrot.slane %v1649_v21, 2 }
 0x2b8   : > { %v1657_v18 = vrot.slane %v1656_v29, 2 }
 0x2b9   : > { %v1651_v45 = vadd.f32 %v1650_v0, %v1649_v21 }
 0x2ba   : > { %v1658_v44 = vadd.f32 %v1657_v18, %v1656_v29 }
 0x2bb   : > { %v1652_v39 = vrot.slane %v1651_v45, 1 }
 0x2bc   : > { %v1659_v54 = vrot.slane %v1658_v44, 1 }
 0x2bd   : > { %v1653_v13 = vadd.f32 %v1652_v39, %v1651_v45 }
 0x2be   : > { %v1660_v1 = vadd.f32 %v1659_v54, %v1658_v44 }
 0x2d8   : > { %v449_v55 = vpop.permute.xlu1 %448  ;;  %v453_v48 = vpop.permute.xlu0 %452 }
 0x2d9   : > { %v463_v25 = vmul.f32 %v449_v55, %v5968_v36  ;;  %v464_v24 = vmul.f32 %v449_v55, %v5977_v32  ;;  %v465_v10 = vmul.f32 %v453_v48, %v5981_v28  ;;  %v466_v61 = vmul.f32 %v453_v48, %v5985_v47 }
 0x2db   : > { %v471_v5 = vadd.f32 %v465_v10, %v463_v25  ;;  %v478_v17 = vadd.f32 %v466_v61, %v464_v24 }
 0x2dc   : > { %v457_v59 = vpop.permute.xlu1 %456 }
 0x2dd   : > { %v472_v50 = vrot.slane %v471_v5, 4  ;;  %v479_v38 = vrot.slane %v478_v17, 4  ;;  %v467_v51 = vmul.f32 %v457_v59, %v6035_v14  ;;  %v468_v3 = vmul.f32 %v457_v59, %v6038_v60 }
 0x2df   : > { %v473_v4 = vadd.f32 %v472_v50, %v471_v5  ;;  %v480_v43 = vadd.f32 %v479_v38, %v478_v17 }
 0x2e0   : > { %v461_v57 = vpop.permute.xlu1 %460 }
 0x2e1   : > { %v474_v58 = vrot.slane %v473_v4, 2  ;;  %v481_v46 = vrot.slane %v480_v43, 2  ;;  %v469_v6 = vmul.f32 %v461_v57, %v6041_v7  ;;  %v470_v19 = vmul.f32 %v461_v57, %v6044_v35 }
 0x2e3   : > { %v475_v52 = vadd.f32 %v474_v58, %v473_v4  ;;  %v482_v42 = vadd.f32 %v481_v46, %v480_v43  ;;  %v485_v23 = vadd.f32 %v469_v6, %v467_v51  ;;  %v492_v63 = vadd.f32 %v470_v19, %v468_v3 }
 0x2e5   : > { %v476_v22 = vrot.slane %v475_v52, 1  ;;  %v483_v56 = vrot.slane %v482_v42, 1  ;;  %v486_v12 = vrot.slane %v485_v23, 4  ;;  %v493_v2 = vrot.slane %v492_v63, 4 }
 0x2e7   : > { %v6050_v8 = vadd.f32 %v476_v22, %v475_v52  ;;  %v6052_v53 = vadd.f32 %v483_v56, %v482_v42  ;;  %v487_v26 = vadd.f32 %v486_v12, %v485_v23  ;;  %v494_v62 = vadd.f32 %v493_v2, %v492_v63 }
 0x2e9   : > { %v1094_v9 = vadd.f32 %v1072_v31, %v6050_v8  ;;  %v1675_v27 = vadd.f32 %v1653_v13, %v6050_v8  ;;  %v1095_v33 = vadd.f32 %v1079_v11, %v6052_v53  ;;  %v1676_v16 = vadd.f32 %v1660_v1, %v6052_v53  ;;  %v1021_v55 = vpop.f32.mrb[4].mxu1  ;;  %v1601_v48 = vpop.f32.mrb[12].mxu0 }
 0x2ea   : > { %v1062_v24 = vmul.f32 %v1021_v55, %v6035_v14  ;;  %v1023_v10 = vpop.f32.mrb[5].mxu1  ;;  %v1603_v61 = vpop.f32.mrb[13].mxu0  ;;  %v1643_v5 = vmul.f32 %v1601_v48, %v6035_v14  ;;  %v488_v57 = vrot.slane %v487_v26, 2  ;;  %v495_v39 = vrot.slane %v494_v62, 2 }
 0x2eb   : > { %vm1098_vm14 = vcmp.gt.f32.partialorder %v1094_v9, 0.0  ;;  %v1102_v15 = vmul.f32 0.2, %v1094_v9  ;;  %vm1679_vm15 = vcmp.gt.f32.partialorder %v1675_v27, 0.0  ;;  %v1683_v49 = vmul.f32 0.2, %v1675_v27 }
 0x2ec   : > { %vm1099_vm1 = vcmp.gt.f32.partialorder %v1095_v33, 0.0  ;;  %v1103_v21 = vmul.f32 0.2, %v1095_v33  ;;  %vm1680_vm2 = vcmp.gt.f32.partialorder %v1676_v16, 0.0  ;;  %v1684_v25 = vmul.f32 0.2, %v1676_v16 }
 0x2ed   : > { %v6058_v29 = vsel %vm1098_vm14, %v1094_v9, %v1102_v15  ;;  %v6060_v41 = vsel %vm1679_vm15, %v1675_v27, %v1683_v49  ;;  %v1025_v17 = vpop.f32.mrb[6].mxu1  ;;  %v1605_v59 = vpop.f32.mrb[14].mxu0  ;;  %v1063_v45 = vmul.f32 %v1023_v10, %v6038_v60  ;;  %v1644_v50 = vmul.f32 %v1603_v61, %v6038_v60 }
 0x2ee   : > { %v6062_v0 = vsel %vm1099_vm1, %v1095_v33, %v1103_v21  ;;  %v2853_v18 = vmax.f32 %v6058_v29, %v6060_v41  ;;  %v6068_v30 = vsel %vm1680_vm2, %v1676_v16, %v1684_v25  ;;  %v1064_v38 = vmul.f32 %v1025_v17, %v6041_v7  ;;  %v1027_v40 = vpop.f32.mrb[7].mxu1  ;;  %v1607_v44 = vpop.f32.mrb[15].mxu0 }
 0x2ef   : > { %v2854_v4 = vmax.f32 %v6062_v0, %v6068_v30  ;;  %v1645_v43 = vmul.f32 %v1605_v59, %v6041_v7  ;;  %v1065_v51 = vmul.f32 %v1027_v40, %v6044_v35  ;;  %v1646_v3 = vmul.f32 %v1607_v44, %v6044_v35 }
 0x2f0   : > { %v1080_v34 = vadd.f32 %v1064_v38, %v1062_v24  ;;  %v489_v22 = vadd.f32 %v488_v57, %v487_v26  ;;  %v496_v11 = vadd.f32 %v495_v39, %v494_v62 }
 0x2f1   : > { %v1661_v58 = vadd.f32 %v1645_v43, %v1643_v5  ;;  %v1087_v46 = vadd.f32 %v1065_v51, %v1063_v45  ;;  %v1668_v6 = vadd.f32 %v1646_v3, %v1644_v50  ;;  %v6078_v20 = vpop.f32.mrb[8].mxu1  ;;  %v6080_v23 = vpop.f32.mrb[16].mxu0 }
 0x2f2   : > { %v1081_v19 = vrot.slane %v1080_v34, 4  ;;  %v6082_v63 = vpop.f32.mrb[9].mxu1  ;;  %v6084_v31 = vpop.f32.mrb[17].mxu0  ;;  %v490_v26 = vrot.slane %v489_v22, 1  ;;  %v497_v48 = vrot.slane %v496_v11, 1 }
 0x2f3   : > { %v1662_v54 = vrot.slane %v1661_v58, 4  ;;  %v1088_v52 = vrot.slane %v1087_v46, 4  ;;  %v1669_v42 = vrot.slane %v1668_v6, 4  ;;  %v6086_v13 = vpop.f32.mrb[10].mxu1  ;;  %v6088_v27 = vpop.f32.mrb[18].mxu0 }
 0x2f4   : > { %v1082_v56 = vadd.f32 %v1081_v19, %v1080_v34  ;;  %v6090_v33 = vpop.f32.mrb[11].mxu1  ;;  %v6092_v2 = vpop.f32.mrb[19].mxu0  ;;  %v6100_v38 = vadd.f32 %v490_v26, %v489_v22  ;;  %v6106_v51 = vadd.f32 %v497_v48, %v496_v11 }
 0x2f5   : > { %v1663_v1 = vadd.f32 %v1662_v54, %v1661_v58  ;;  %v1089_v12 = vadd.f32 %v1088_v52, %v1087_v46  ;;  %v1670_v9 = vadd.f32 %v1669_v42, %v1668_v6 }
 0x2f6   : > { %v1083_v16 = vrot.slane %v1082_v56, 2 }
 0x2f7   : > { %v1664_v15 = vrot.slane %v1663_v1, 2  ;;  %v1090_v49 = vrot.slane %v1089_v12, 2  ;;  %v1671_v21 = vrot.slane %v1670_v9, 2 }
 0x2f8   : > { %v1084_v55 = vadd.f32 %v1083_v16, %v1082_v56 }
 0x2f9   : > { %v1665_v25 = vadd.f32 %v1664_v15, %v1663_v1  ;;  %v1091_v24 = vadd.f32 %v1090_v49, %v1089_v12  ;;  %v1672_v10 = vadd.f32 %v1671_v21, %v1670_v9  ;;  %v6094_v62 = vpop.f32.mrb[12].mxu1  ;;  %v6096_v45 = vpop.f32.mrb[20].mxu0 }
 0x2fa   : > { %v1085_v61 = vrot.slane %v1084_v55, 1  ;;  %v6098_v50 = vpop.f32.mrb[13].mxu1  ;;  %v6102_v44 = vpop.f32.mrb[21].mxu0 }
 0x2fb   : > { %v1666_v5 = vrot.slane %v1665_v25, 1  ;;  %v1092_v17 = vrot.slane %v1091_v24, 1  ;;  %v1673_v59 = vrot.slane %v1672_v10, 1  ;;  %v6104_v43 = vpop.f32.mrb[14].mxu1  ;;  %v6108_v39 = vpop.f32.mrb[22].mxu0 }
 0x2fc   : > { %v1086_v40 = vadd.f32 %v1085_v61, %v1084_v55  ;;  %6428 = vst [vmem:[#allocation12_spill] sm:$0xff] %v6108_v39  ;;  %v6110_v58 = vpop.f32.mrb[15].mxu1  ;;  %v6113_v6 = vpop.f32.mrb[23].mxu0 }
 0x2fd   : > { %v1667_v3 = vadd.f32 %v1666_v5, %v1665_v25  ;;  %v1093_v57 = vadd.f32 %v1092_v17, %v1091_v24  ;;  %v1674_v34 = vadd.f32 %v1673_v59, %v1672_v10  ;;  %6429 = vst [vmem:[#allocation13_spill] sm:$0xff] %v6110_v58  ;;  %6430 = vst [vmem:[#allocation14_spill] sm:$0xff] %v6113_v6 }
 0x2fe   : > { %v1096_v46 = vadd.f32 %v1086_v40, %v6100_v38 }
 0x2ff   : > { %v1677_v19 = vadd.f32 %v1667_v3, %v6100_v38  ;;  %v1097_v54 = vadd.f32 %v1093_v57, %v6106_v51  ;;  %v1678_v52 = vadd.f32 %v1674_v34, %v6106_v51 }
 0x300   : > { %vm1100_vm3 = vcmp.gt.f32.partialorder %v1096_v46, 0.0  ;;  %v1104_v42 = vmul.f32 0.2, %v1096_v46 }
 0x301   : > { %vm1681_vm4 = vcmp.gt.f32.partialorder %v1677_v19, 0.0  ;;  %v1685_v22 = vmul.f32 0.2, %v1677_v19  ;;  %vm1101_vm5 = vcmp.gt.f32.partialorder %v1097_v54, 0.0  ;;  %v1105_v56 = vmul.f32 0.2, %v1097_v54 }
 0x302   : > { %v6118_v11 = vsel %vm1100_vm3, %v1096_v46, %v1104_v42  ;;  %vm1682_vm6 = vcmp.gt.f32.partialorder %v1678_v52, 0.0  ;;  %v1686_v1 = vmul.f32 0.2, %v1678_v52 }
 0x303   : > { %v6120_v12 = vsel %vm1681_vm4, %v1677_v19, %v1685_v22  ;;  %v6122_v9 = vsel %vm1101_vm5, %v1097_v54, %v1105_v56 }
 0x304   : > { %v2855_v16 = vmax.f32 %v6118_v11, %v6120_v12  ;;  %v6126_v15 = vsel %vm1682_vm6, %v1678_v52, %v1686_v1 }
 0x33e   : > { %v2172_v21 = vpop.f32.mrb[16].mxu1 }
 0x33f   : > { %v2220_v26 = vmul.f32 %v2172_v21, %v5968_v36  ;;  %v2174_v55 = vpop.f32.mrb[17].mxu1 }
 0x340   : > { %v2221_v48 = vmul.f32 %v2174_v55, %v5977_v32  ;;  %v2176_v25 = vpop.f32.mrb[18].mxu1 }
 0x341   : > { %v2222_v24 = vmul.f32 %v2176_v25, %v5981_v28  ;;  %v2178_v10 = vpop.f32.mrb[19].mxu1 }
 0x342   : > { %v2223_v61 = vmul.f32 %v2178_v10, %v5985_v47 }
 0x343   : > { %v2228_v5 = vadd.f32 %v2222_v24, %v2220_v26 }
 0x344   : > { %v2235_v17 = vadd.f32 %v2223_v61, %v2221_v48 }
 0x345   : > { %v2229_v59 = vrot.slane %v2228_v5, 4 }
 0x346   : > { %v2236_v40 = vrot.slane %v2235_v17, 4  ;;  %v2182_v3 = vpop.f32.mrb[20].mxu1 }
 0x347   : > { %v2230_v57 = vadd.f32 %v2229_v59, %v2228_v5  ;;  %v2224_v34 = vmul.f32 %v2182_v3, %v6035_v14  ;;  %v2184_v46 = vpop.f32.mrb[21].mxu1 }
 0x348   : > { %v2237_v19 = vadd.f32 %v2236_v40, %v2235_v17  ;;  %v2225_v54 = vmul.f32 %v2184_v46, %v6038_v60  ;;  %v2186_v52 = vpop.f32.mrb[22].mxu1 }
 0x349   : > { %v2231_v42 = vrot.slane %v2230_v57, 2  ;;  %v2226_v22 = vmul.f32 %v2186_v52, %v6041_v7  ;;  %v2188_v56 = vpop.f32.mrb[23].mxu1 }
 0x34a   : > { %v2238_v1 = vrot.slane %v2237_v19, 2  ;;  %v2227_v21 = vmul.f32 %v2188_v56, %v6044_v35 }
 0x34b   : > { %v2232_v26 = vadd.f32 %v2231_v42, %v2230_v57  ;;  %v2242_v55 = vadd.f32 %v2226_v22, %v2224_v34 }
 0x34c   : > { %v2239_v48 = vadd.f32 %v2238_v1, %v2237_v19  ;;  %v2249_v25 = vadd.f32 %v2227_v21, %v2225_v54 }
 0x34d   : > { %v2233_v24 = vrot.slane %v2232_v26, 1  ;;  %v2243_v10 = vrot.slane %v2242_v55, 4 }
 0x34e   : > { %v2240_v61 = vrot.slane %v2239_v48, 1  ;;  %v2250_v5 = vrot.slane %v2249_v25, 4  ;;  %v6138_v59 = vpop.f32.mrb[24].mxu1 }
 0x34f   : > { %v2234_v17 = vadd.f32 %v2233_v24, %v2232_v26  ;;  %v2244_v40 = vadd.f32 %v2243_v10, %v2242_v55  ;;  %v6140_v3 = vpop.f32.mrb[25].mxu1 }
 0x350   : > { %v2241_v46 = vadd.f32 %v2240_v61, %v2239_v48  ;;  %v2251_v52 = vadd.f32 %v2250_v5, %v2249_v25  ;;  %v6142_v49 = vpop.f32.mrb[26].mxu1 }
 0x351   : > { %v2256_v56 = vadd.f32 %v2234_v17, %v6050_v8  ;;  %v2245_v57 = vrot.slane %v2244_v40, 2  ;;  %v6145_v34 = vpop.f32.mrb[27].mxu1 }
 0x352   : > { %v2257_v19 = vadd.f32 %v2241_v46, %v6052_v53  ;;  %v2252_v54 = vrot.slane %v2251_v52, 2 }
 0x353   : > { %vm2260_vm7 = vcmp.gt.f32.partialorder %v2256_v56, 0.0  ;;  %v2264_v42 = vmul.f32 0.2, %v2256_v56  ;;  %v2246_v22 = vadd.f32 %v2245_v57, %v2244_v40 }
 0x354   : > { %vm2261_vm8 = vcmp.gt.f32.partialorder %v2257_v19, 0.0  ;;  %v2265_v1 = vmul.f32 0.2, %v2257_v19  ;;  %v2253_v21 = vadd.f32 %v2252_v54, %v2251_v52 }
 0x355   : > { %v6148_v26 = vsel %vm2260_vm7, %v2256_v56, %v2264_v42  ;;  %v2247_v55 = vrot.slane %v2246_v22, 1 }
 0x356   : > { %v6154_v48 = vmax.f32 %v2853_v18, %v6148_v26  ;;  %v6156_v25 = vsel %vm2261_vm8, %v2257_v19, %v2265_v1  ;;  %v2254_v24 = vrot.slane %v2253_v21, 1  ;;  %v6158_v10 = vpop.f32.mrb[28].mxu1 }
 0x357   : > { %v6164_v61 = vmax.f32 %v2854_v4, %v6156_v25  ;;  %v2248_v5 = vadd.f32 %v2247_v55, %v2246_v22  ;;  %v6166_v17 = vpop.f32.mrb[29].mxu1  ;;  %v6433_v22 = vmax.f32 %v6122_v9, %v6126_v15 }
 0x358   : > { %v2255_v40 = vadd.f32 %v2254_v24, %v2253_v21  ;;  %v6168_v46 = vpop.f32.mrb[30].mxu1 }
 0x359   : > { %6431 = vst [vmem:[#allocation15_spill] sm:$0xff] %v6168_v46  ;;  %v2258_v18 = vadd.f32 %v2248_v5, %v6100_v38  ;;  %v6171_v52 = vpop.f32.mrb[31].mxu1 }
 0x35a   : > { %6432 = vst [vmem:[#allocation16_spill] sm:$0xff] %v6171_v52  ;;  %v2259_v56 = vadd.f32 %v2255_v40, %v6106_v51 }
 0x35b   : > { %vm2262_vm9 = vcmp.gt.f32.partialorder %v2258_v18, 0.0  ;;  %v2266_v57 = vmul.f32 0.2, %v2258_v18 }
 0x35c   : > { %vm2263_vm10 = vcmp.gt.f32.partialorder %v2259_v56, 0.0  ;;  %v2267_v19 = vmul.f32 0.2, %v2259_v56 }
 0x35d   : > { %v6174_v54 = vsel %vm2262_vm9, %v2258_v18, %v2266_v57 }
 0x35e   : > { %v6180_v4 = vmax.f32 %v2855_v16, %v6174_v54  ;;  %v6182_v42 = vsel %vm2263_vm10, %v2259_v56, %v2267_v19 }
 0x35f   : > { %v6188_v1 = vmax.f32 %v6433_v22, %v6182_v42 }
 0x36b   : > { %v2753_v21 = vpop.f32.mrb[24].mxu0 }
 0x36c   : > { %v2801_v55 = vmul.f32 %v2753_v21, %v5968_v36  ;;  %v2755_v24 = vpop.f32.mrb[25].mxu0 }
 0x36d   : > { %v2802_v5 = vmul.f32 %v2755_v24, %v5977_v32  ;;  %v2757_v40 = vpop.f32.mrb[26].mxu0 }
 0x36e   : > { %v2803_v18 = vmul.f32 %v2757_v40, %v5981_v28  ;;  %v2759_v57 = vpop.f32.mrb[27].mxu0 }
 0x36f   : > { %v2804_v16 = vmul.f32 %v2759_v57, %v5985_v47 }
 0x370   : > { %v2809_v56 = vadd.f32 %v2803_v18, %v2801_v55 }
 0x371   : > { %v2816_v19 = vadd.f32 %v2804_v16, %v2802_v5 }
 0x372   : > { %v2810_v37 = vrot.slane %v2809_v56, 4 }
 0x373   : > { %v2817_v52 = vrot.slane %v2816_v19, 4  ;;  %v2763_v6 = vpop.f32.mrb[28].mxu0 }
 0x374   : > { %v2811_v58 = vadd.f32 %v2810_v37, %v2809_v56  ;;  %v2805_v22 = vmul.f32 %v2763_v6, %v6035_v14  ;;  %v2765_v46 = vpop.f32.mrb[29].mxu0 }
 0x375   : > { %v2818_v39 = vadd.f32 %v2817_v52, %v2816_v19  ;;  %v2806_v36 = vmul.f32 %v2765_v46, %v6038_v60  ;;  %v2767_v21 = vpop.f32.mrb[30].mxu0 }
 0x376   : > { %v2812_v32 = vrot.slane %v2811_v58, 2  ;;  %v2807_v24 = vmul.f32 %v2767_v21, %v6041_v7  ;;  %v2769_v28 = vpop.f32.mrb[31].mxu0 }
 0x377   : > { %v2819_v40 = vrot.slane %v2818_v39, 2  ;;  %v2808_v47 = vmul.f32 %v2769_v28, %v6044_v35 }
 0x378   : > { %v2813_v55 = vadd.f32 %v2812_v32, %v2811_v58  ;;  %v2823_v5 = vadd.f32 %v2807_v24, %v2805_v22 }
 0x379   : > { %v2820_v18 = vadd.f32 %v2819_v40, %v2818_v39  ;;  %v2830_v57 = vadd.f32 %v2808_v47, %v2806_v36 }
 0x37a   : > { %v2814_v16 = vrot.slane %v2813_v55, 1  ;;  %v2824_v37 = vrot.slane %v2823_v5, 4 }
 0x37b   : > { %v2821_v56 = vrot.slane %v2820_v18, 1  ;;  %v2831_v14 = vrot.slane %v2830_v57, 4  ;;  %v6198_v6 = vpop.f32.mrb[32].mxu0 }
 0x37c   : > { %v2815_v52 = vadd.f32 %v2814_v16, %v2813_v55  ;;  %v2825_v60 = vadd.f32 %v2824_v37, %v2823_v5  ;;  %v6200_v46 = vpop.f32.mrb[33].mxu0 }
 0x37d   : > { %v2822_v19 = vadd.f32 %v2821_v56, %v2820_v18  ;;  %v2832_v7 = vadd.f32 %v2831_v14, %v2830_v57  ;;  %v6202_v21 = vpop.f32.mrb[34].mxu0 }
 0x37e   : > { %v2837_v35 = vadd.f32 %v2815_v52, %v6050_v8  ;;  %v2826_v58 = vrot.slane %v2825_v60, 2  ;;  %v6205_v22 = vpop.f32.mrb[35].mxu0 }
 0x37f   : > { %v2838_v39 = vadd.f32 %v2822_v19, %v6052_v53  ;;  %v2833_v36 = vrot.slane %v2832_v7, 2 }
 0x380   : > { %vm2841_vm11 = vcmp.gt.f32.partialorder %v2837_v35, 0.0  ;;  %v2845_v32 = vmul.f32 0.2, %v2837_v35  ;;  %v2827_v24 = vadd.f32 %v2826_v58, %v2825_v60 }
 0x381   : > { %vm2842_vm12 = vcmp.gt.f32.partialorder %v2838_v39, 0.0  ;;  %v2846_v28 = vmul.f32 0.2, %v2838_v39  ;;  %v2834_v40 = vadd.f32 %v2833_v36, %v2832_v7 }
 0x382   : > { %v2849_v47 = vsel %vm2841_vm11, %v2837_v35, %v2845_v32  ;;  %v2828_v55 = vrot.slane %v2827_v24, 1 }
 0x383   : > { %v2861_v5 = vmax.f32 %v6154_v48, %v2849_v47  ;;  %v2850_v18 = vsel %vm2842_vm12, %v2838_v39, %v2846_v28  ;;  %v2835_v57 = vrot.slane %v2834_v40, 1  ;;  %v6209_v16 = vpop.f32.mrb[36].mxu0 }
 0x384   : > { %v2862_v8 = vmax.f32 %v6164_v61, %v2850_v18  ;;  %v2829_v37 = vadd.f32 %v2828_v55, %v2827_v24  ;;  %v6212_v56 = vpop.f32.mrb[37].mxu0 }
 0x385   : > { %v2901_v53 = vsub.f32 %v2849_v47, %v2861_v5  ;;  %v2836_v14 = vadd.f32 %v2835_v57, %v2834_v40  ;;  %v2865_v52 = vsub.f32 %v6058_v29, %v2861_v5  ;;  %v2877_v60 = vsub.f32 %v6060_v41, %v2861_v5  ;;  %v6216_v19 = vpop.f32.mrb[38].mxu0 }
 0x386   : > { %v2902_v7 = vsub.f32 %v2850_v18, %v2862_v8  ;;  %v2839_v48 = vadd.f32 %v2829_v37, %v6100_v38  ;;  %v2889_v35 = vsub.f32 %v6148_v26, %v2861_v5  ;;  %v2866_v58 = vsub.f32 %v6062_v0, %v2862_v8  ;;  %v6221_v39 = vpop.f32.mrb[39].mxu0 }
 0x387   : > { %v2840_v61 = vadd.f32 %v2836_v14, %v6106_v51  ;;  %v2869_v36 = vmul.f32 1.442695, %v2865_v52  ;;  %v2881_v24 = vmul.f32 1.442695, %v2877_v60  ;;  %v2878_v29 = vsub.f32 %v6068_v30, %v2862_v8 }
 0x388   : > { %vm2843_vm13 = vcmp.gt.f32.partialorder %v2839_v48, 0.0  ;;  %v2847_v32 = vmul.f32 0.2, %v2839_v48  ;;  %v2893_v28 = vmul.f32 1.442695, %v2889_v35  ;;  %v2890_v0 = vsub.f32 %v6156_v25, %v2862_v8 }
 0x389   : > { %vm2844_vm14 = vcmp.gt.f32.partialorder %v2840_v61, 0.0  ;;  %v2848_v41 = vmul.f32 0.2, %v2840_v61  ;;  %v2871_v47 = vmul.f32 1.442695, %v2866_v58  ;;  %3780 = vpow2.f32 %v2869_v36  ;;  %v3827_v58 = vld [vmem:[%s6358_s4] sm:$0xff] }
 0x38a   : > { %v2851_v40 = vsel %vm2843_vm13, %v2839_v48, %v2847_v32  ;;  %v2883_v38 = vmul.f32 1.442695, %v2878_v29  ;;  %v2905_v5 = vmul.f32 1.442695, %v2901_v53  ;;  %v2907_v51 = vmul.f32 1.442695, %v2902_v7 }
 0x38b   : > { %v2863_v26 = vmax.f32 %v6180_v4, %v2851_v40  ;;  %v2852_v55 = vsel %vm2844_vm14, %v2840_v61, %v2848_v41  ;;  %3782 = vpow2.f32 %v2881_v24  ;;  %v2895_v30 = vmul.f32 1.442695, %v2890_v0 }
 0x38c   : > { %v2864_v18 = vmax.f32 %v6188_v1, %v2852_v55  ;;  %3784 = vpow2.f32 %v2893_v28  ;;  %v3829_v28 = vld [vmem:[%s6358_s4 + $0x10] sm:$0xff] }
 0x38d   : > { %v2903_v57 = vsub.f32 %v2851_v40, %v2863_v26  ;;  %v2867_v37 = vsub.f32 %v6118_v11, %v2863_v26  ;;  %3786 = vpow2.f32 %v2871_v47  ;;  %v2879_v52 = vsub.f32 %v6120_v12, %v2863_v26 }
 0x38e   : > { %v2904_v14 = vsub.f32 %v2852_v55, %v2864_v18  ;;  %v2891_v4 = vsub.f32 %v6174_v54, %v2863_v26  ;;  %3788 = vpow2.f32 %v2883_v38  ;;  %v2868_v25 = vsub.f32 %v6122_v9, %v2864_v18 }
 0x38f   : > { %v2873_v60 = vmul.f32 1.442695, %v2867_v37  ;;  %3790 = vpow2.f32 %v2905_v5  ;;  %v2885_v8 = vmul.f32 1.442695, %v2879_v52  ;;  %v2880_v53 = vsub.f32 %v6126_v15, %v2864_v18  ;;  %v3828_v15 = vld [vmem:[%s6358_s4 + $0x8] sm:$0xff] }
 0x390   : > { %3792 = vpow2.f32 %v2895_v30  ;;  %v2897_v1 = vmul.f32 1.442695, %v2891_v4  ;;  %v2892_v7 = vsub.f32 %v6182_v42, %v2864_v18  ;;  %v2875_v11 = vmul.f32 1.442695, %v2868_v25 }
 0x391   : > { %3794 = vpow2.f32 %v2907_v51  ;;  %v2887_v48 = vmul.f32 1.442695, %v2880_v53  ;;  %v2909_v35 = vmul.f32 1.442695, %v2903_v57  ;;  %v3983_v12 = vmov 3   ;;  %v3830_v51 = vld [vmem:[%s6358_s4 + $0x18] sm:$0xff] }
 0x392   : > { %3796 = vpow2.f32 %v2873_v60  ;;  %3694 = vset.pattern.permute.xlu1 %v3983_v12  ;;  %3695 = vset.pattern.permute.xlu0 %v3983_v12  ;;  %v2899_v9 = vmul.f32 1.442695, %v2892_v7  ;;  %v2911_v36 = vmul.f32 1.442695, %v2904_v14 }
 0x393   : > { %3798 = vpow2.f32 %v2885_v8  ;;  %v3781_v54 = vpop.eup %3780  ;;  %3195 = vperm.xlu1 %3694, %v3827_v58   ;;  %3199 = vperm.xlu0 %3695, %v3828_v15  }
 0x394   : > { %3800 = vpow2.f32 %v2897_v1 }
 0x395   : > { %v3783_v42 = vpop.eup %3782  ;;  %3802 = vpow2.f32 %v2875_v11 }
 0x396   : > { %v3785_v61 = vpop.eup %3784  ;;  %v2913_v32 = vadd.f32 %v3783_v42, %v3781_v54  ;;  %3804 = vpow2.f32 %v2887_v48 }
 0x397   : > { %v3787_v24 = vpop.eup %3786  ;;  %3806 = vpow2.f32 %v2909_v35  ;;  %3203 = vperm.xlu1 %3694, %v3829_v28  }
 0x398   : > { %v3789_v29 = vpop.eup %3788  ;;  %v2917_v41 = vadd.f32 %v3785_v61, %v2913_v32  ;;  %3808 = vpow2.f32 %v2899_v9 }
 0x399   : > { %v3791_v40 = vpop.eup %3790  ;;  %v2914_v47 = vadd.f32 %v3789_v29, %v3787_v24  ;;  %3810 = vpow2.f32 %v2911_v36 }
 0x39a   : > { %v3793_v38 = vpop.eup %3792  ;;  %v2921_v26 = vadd.f32 %v3791_v40, %v2917_v41 }
 0x39b   : > { %v3795_v55 = vpop.eup %3794  ;;  %v2918_v0 = vadd.f32 %v3793_v38, %v2914_v47  ;;  %3207 = vperm.xlu1 %3694, %v3830_v51  }
 0x39c   : > { %v3797_v5 = vpop.eup %3796  ;;  %3812 = vrcp.f32 %v2921_v26 }
 0x39d   : > { %v3799_v18 = vpop.eup %3798  ;;  %v2922_v57 = vadd.f32 %v3795_v55, %v2918_v0 }
 0x39e   : > { %v3801_v30 = vpop.eup %3800  ;;  %v2915_v37 = vadd.f32 %v3799_v18, %v3797_v5 }
 0x39f   : > { %v6246_v14 = vpop.eup %3802  ;;  %3814 = vrcp.f32 %v2922_v57 }
 0x3a0   : > { %v6248_v52 = vpop.eup %3804  ;;  %v2919_v4 = vadd.f32 %v3801_v30, %v2915_v37  ;;  %v3035_v37 = vpop.permute.xlu0 %3034 }
 0x3a1   : > { %v3807_v60 = vpop.eup %3806  ;;  %v2916_v25 = vadd.f32 %v6248_v52, %v6246_v14 }
 0x3a2   : > { %v3809_v8 = vpop.eup %3808  ;;  %v2923_v1 = vadd.f32 %v3807_v60, %v2919_v4 }
 0x3a3   : > { %v2920_v53 = vadd.f32 %v3809_v8, %v2916_v25  ;;  %v3811_v7 = vpop.eup %3810 }
 0x3a4   : > { %3816 = vrcp.f32 %v2923_v1 }
 0x3a5   : > { %v2924_v11 = vadd.f32 %v3811_v7, %v2920_v53 }
 0x3a6   : > { %v3813_v48 = vpop.eup %3812 }
 0x3a7   : > { %v2929_v35 = vmul.f32 %v3813_v48, %v3781_v54  ;;  %v2933_v12 = vmul.f32 %v3813_v48, %v3783_v42  ;;  %v2937_v9 = vmul.f32 %v3813_v48, %v3785_v61  ;;  %v2941_v58 = vmul.f32 %v3813_v48, %v3791_v40  ;;  %v3039_v48 = vpop.permute.xlu1 %3038 }
 0x3a8   : > { %3818 = vrcp.f32 %v2924_v11 }
 0x3a9   : > { %v3815_v15 = vpop.eup %3814  ;;  %v2953_v36 = vmul.f32 %v2929_v35, %v6078_v20  ;;  %v2969_v32 = vmul.f32 %v2933_v12, %v6080_v23  ;;  %v2993_v41 = vmul.f32 %v2937_v9, %v6138_v59  ;;  %v3017_v28 = vmul.f32 %v2941_v58, %v6198_v6 }
 0x3aa   : > { %v2930_v47 = vmul.f32 %v3815_v15, %v3787_v24  ;;  %v2934_v26 = vmul.f32 %v3815_v15, %v3789_v29  ;;  %v2938_v0 = vmul.f32 %v3815_v15, %v3793_v38  ;;  %v2942_v51 = vmul.f32 %v3815_v15, %v3795_v55  ;;  %v3057_v15 = vld [vmem:[%s4180_s9] sm:$0xff] }
 0x3ab   : > { %v2973_v57 = vadd.f32 %v2969_v32, %v2953_v36  ;;  %v2955_v54 = vmul.f32 %v2929_v35, %v6086_v13  ;;  %v2971_v42 = vmul.f32 %v2933_v12, %v6088_v27  ;;  %v2995_v61 = vmul.f32 %v2937_v9, %v6142_v49 }
 0x3ac   : > { %v2954_v40 = vmul.f32 %v2930_v47, %v6082_v63  ;;  %v2970_v20 = vmul.f32 %v2934_v26, %v6084_v31  ;;  %v2994_v23 = vmul.f32 %v2938_v0, %v6140_v3  ;;  %v3018_v59 = vmul.f32 %v2942_v51, %v6200_v46 }
 0x3ad   : > { %v2997_v6 = vadd.f32 %v2993_v41, %v2973_v57  ;;  %v2975_v24 = vadd.f32 %v2971_v42, %v2955_v54  ;;  %v3019_v29 = vmul.f32 %v2941_v58, %v6202_v21  ;;  %v2956_v38 = vmul.f32 %v2930_v47, %v6090_v33  ;;  %v3058_v41 = vld [vmem:[%s4180_s9 + $0x8] sm:$0xff] }
 0x3ae   : > { %v3817_v55 = vpop.eup %3816  ;;  %v2974_v13 = vadd.f32 %v2970_v20, %v2954_v40  ;;  %v2972_v27 = vmul.f32 %v2934_v26, %v6092_v2  ;;  %v2996_v49 = vmul.f32 %v2938_v0, %v6145_v34  ;;  %v3020_v63 = vmul.f32 %v2942_v51, %v6205_v22  ;;  %v3060_v0 = vld [vmem:[%s4180_s9 + $0x18] sm:$0xff]  ;;  %v6434_v20 = vld [vmem:[#allocation12_spill] sm:$0xff] }
 0x3af   : > { %v3021_v31 = vadd.f32 %v3017_v28, %v2997_v6  ;;  %v2999_v4 = vadd.f32 %v2995_v61, %v2975_v24  ;;  %v2931_v3 = vmul.f32 %v3817_v55, %v3797_v5  ;;  %v2935_v25 = vmul.f32 %v3817_v55, %v3799_v18  ;;  %v6437_v24 = vld [vmem:[#allocation14_spill] sm:$0xff] }
 0x3b0   : > { %v2998_v46 = vadd.f32 %v2994_v23, %v2974_v13  ;;  %v2976_v1 = vadd.f32 %v2972_v27, %v2956_v38  ;;  %v2939_v53 = vmul.f32 %v3817_v55, %v3801_v30  ;;  %v2943_v21 = vmul.f32 %v3817_v55, %v3807_v60  ;;  %v6435_v23 = vld [vmem:[#allocation15_spill] sm:$0xff]  ;;  %v6438_v13 = vld [vmem:[#allocation16_spill] sm:$0xff] }
 0x3b1   : > { %v3023_v33 = vadd.f32 %v3019_v29, %v2999_v4  ;;  %v2957_v11 = vmul.f32 %v2931_v3, %v6094_v62  ;;  %v2977_v2 = vmul.f32 %v2935_v25, %v6096_v45  ;;  %v3049_v34 = vadd.f32 %v3035_v37, %v3021_v31  ;;  %v3059_v62 = vld [vmem:[%s4180_s9 + $0x10] sm:$0xff] }
 0x3b2   : > { %v3819_v22 = vpop.eup %3818  ;;  %v3022_v35 = vadd.f32 %v3018_v59, %v2998_v46  ;;  %v3000_v12 = vadd.f32 %v2996_v49, %v2976_v1  ;;  %v3001_v5 = vmul.f32 %v2939_v53, %v6158_v10  ;;  %v3025_v18 = vmul.f32 %v2943_v21, %v6209_v16  ;;  %v3061_v49 = vld [vmem:[%s4180_s9 + $0x20] sm:$0xff] }
 0x3b3   : > { %v2981_v30 = vadd.f32 %v2977_v2, %v2957_v11  ;;  %v2932_v60 = vmul.f32 %v3819_v22, %v6246_v14  ;;  %v2936_v9 = vmul.f32 %v3819_v22, %v6248_v52  ;;  %v2940_v58 = vmul.f32 %v3819_v22, %v3809_v8 }
 0x3b4   : > { %v3024_v45 = vadd.f32 %v3020_v63, %v3000_v12  ;;  %v2944_v36 = vmul.f32 %v3819_v22, %v3811_v7  ;;  %v3051_v32 = vadd.f32 %v3039_v48, %v3023_v33  ;;  %v3050_v28 = vadd.f32 %v3035_v37, %v3022_v35  ;;  %v3043_v63 = vpop.permute.xlu1 %3042 }
 0x3b5   : > { %v3005_v47 = vadd.f32 %v3001_v5, %v2981_v30  ;;  %v2958_v26 = vmul.f32 %v2932_v60, %v6098_v50  ;;  %v2978_v10 = vmul.f32 %v2936_v9, %v6102_v44  ;;  %v3002_v16 = vmul.f32 %v2940_v58, %v6166_v17 }
 0x3b6   : > { %v3026_v14 = vmul.f32 %v2944_v36, %v6212_v56  ;;  %v3052_v51 = vadd.f32 %v3039_v48, %v3024_v45  ;;  %v3067_v52 = vadd.f32 %v3059_v62, %v3051_v32  ;;  %v3065_v8 = vadd.f32 %v3057_v15, %v3049_v34  ;;  %v6436_v56 = vld [vmem:[#allocation13_spill] sm:$0xff]  ;;  %v3063_v48 = vld [vmem:[%s4180_s9 + $0x30] sm:$0xff]  ;;  %v3064_v34 = vld [vmem:[%s4180_s9 + $0x38] sm:$0xff] }
 0x3b7   : > { %v3029_v57 = vadd.f32 %v3025_v18, %v3005_v47  ;;  %v2982_v54 = vadd.f32 %v2978_v10, %v2958_v26  ;;  %v3066_v7 = vadd.f32 %v3058_v41, %v3050_v28  ;;  %v2959_v42 = vmul.f32 %v2931_v3, %v6104_v43 }
 0x3b8   : > { %v3068_v61 = vadd.f32 %v3060_v0, %v3052_v51  ;;  %v3073_v40 = vadd.f32 %v3067_v52, %v3065_v8  ;;  %v2979_v50 = vmul.f32 %v2935_v25, %v6434_v20  ;;  %v3003_v44 = vmul.f32 %v2939_v53, %v6435_v23  ;;  %v3062_v25 = vld [vmem:[%s4180_s9 + $0x28] sm:$0xff]  ;;  %v3047_v53 = vpop.permute.xlu0 %3046 }
 0x3b9   : > { %v3006_v17 = vadd.f32 %v3002_v16, %v2982_v54  ;;  %v3027_v59 = vmul.f32 %v2943_v21, %v6216_v19  ;;  %v2960_v6 = vmul.f32 %v2932_v60, %v6436_v56  ;;  %v2980_v29 = vmul.f32 %v2936_v9, %v6437_v24 }
 0x3ba   : > { %v3082_v38 = vadd.f32 %v3068_v61, %v3066_v7  ;;  %v2983_v55 = vadd.f32 %v2979_v50, %v2959_v42  ;;  %v3004_v27 = vmul.f32 %v2940_v58, %v6438_v13  ;;  %v3028_v43 = vmul.f32 %v2944_v36, %v6221_v39 }
 0x3bb   : > { %v3030_v37 = vadd.f32 %v3026_v14, %v3006_v17  ;;  %v2984_v31 = vadd.f32 %v2980_v29, %v2960_v6  ;;  %v3053_v4 = vadd.f32 %v3043_v63, %v3029_v57 }
 0x3bc   : > { %v3007_v3 = vadd.f32 %v3003_v44, %v2983_v55 }
 0x3bd   : > { %v3008_v19 = vadd.f32 %v3004_v27, %v2984_v31  ;;  %v3054_v46 = vadd.f32 %v3043_v63, %v3030_v37  ;;  %v3069_v1 = vadd.f32 %v3061_v49, %v3053_v4 }
 0x3be   : > { %v3031_v21 = vadd.f32 %v3027_v59, %v3007_v3 }
 0x3bf   : > { %v3032_v33 = vadd.f32 %v3028_v43, %v3008_v19  ;;  %v3070_v11 = vadd.f32 %v3062_v25, %v3054_v46  ;;  %v3074_v2 = vadd.f32 %v3073_v40, %v3069_v1 }
 0x3c0   : > { %v3055_v39 = vadd.f32 %v3047_v53, %v3031_v21 }
 0x3c1   : > { %v3083_v22 = vadd.f32 %v3082_v38, %v3070_v11  ;;  %v3056_v35 = vadd.f32 %v3047_v53, %v3032_v33 }
 0x3c2   : > { %v3071_v12 = vadd.f32 %v3063_v48, %v3055_v39  ;;  %v3148_v48 = vpop.permute.xlu0 %3147 }
 0x3c3   : > { %v3072_v5 = vadd.f32 %v3064_v34, %v3056_v35 }
 0x3c4   : > { %v3075_v18 = vadd.f32 %v3074_v2, %v3071_v12 }
 0x3c5   : > { %v3084_v30 = vadd.f32 %v3083_v22, %v3072_v5 }
 0x3c6   : > { %v3076_v60 = vrot.slane %v3075_v18, 4  ;;  %v3152_v39 = vpop.permute.xlu0 %3151 }
 0x3c7   : > { %v3085_v9 = vrot.slane %v3084_v30, 4 }
 0x3c8   : > { %v3077_v58 = vadd.f32 %v3076_v60, %v3075_v18 }
 0x3c9   : > { %v3086_v62 = vadd.f32 %v3085_v9, %v3084_v30 }
 0x3ca   : > { %v3078_v15 = vrot.slane %v3077_v58, 2 }
 0x3cb   : > { %v3087_v45 = vrot.slane %v3086_v62, 2 }
 0x3cc   : > { %v3079_v36 = vadd.f32 %v3078_v15, %v3077_v58 }
 0x3cd   : > { %v3088_v32 = vadd.f32 %v3087_v45, %v3086_v62  ;;  %v3176_v45 = vpop.permute.xlu0 %3175 }
 0x3ce   : > { %v3080_v41 = vrot.slane %v3079_v36, 1 }
 0x3cf   : > { %v3089_v28 = vrot.slane %v3088_v32, 1 }
 0x3d0   : > { %v3081_v47 = vadd.f32 %v3080_v41, %v3079_v36 }
 0x3d1   : > { %v3090_v26 = vadd.f32 %v3089_v28, %v3088_v32 }
 0x3d2   : > { %v3092_v10 = vmul.f32 0.03125, %v3081_v47 }
 0x3d3   : > { %v3093_v16 = vmul.f32 0.03125, %v3090_v26 }
 0x3d4   : > { %v3100_v0 = vsub.f32 %v3071_v12, %v3092_v10  ;;  %v3094_v14 = vsub.f32 %v3065_v8, %v3092_v10  ;;  %v3096_v51 = vsub.f32 %v3067_v52, %v3092_v10  ;;  %v3098_v57 = vsub.f32 %v3069_v1, %v3092_v10 }
 0x3d5   : > { %v3101_v54 = vsub.f32 %v3072_v5, %v3093_v16  ;;  %v3095_v42 = vsub.f32 %v3066_v7, %v3093_v16  ;;  %v3097_v40 = vsub.f32 %v3068_v61, %v3093_v16  ;;  %v3099_v20 = vsub.f32 %v3070_v11, %v3093_v16  ;;  %v3144_v61 = vpop.permute.xlu1 %3143 }
 0x3d6   : > { %v3102_v50 = vmul.f32 %v3094_v14, %v3094_v14  ;;  %v3104_v23 = vmul.f32 %v3096_v51, %v3096_v51  ;;  %v3106_v59 = vmul.f32 %v3098_v57, %v3098_v57  ;;  %v3108_v29 = vmul.f32 %v3100_v0, %v3100_v0 }
 0x3d7   : > { %v3103_v44 = vmul.f32 %v3095_v42, %v3095_v42  ;;  %v3105_v17 = vmul.f32 %v3097_v40, %v3097_v40  ;;  %v3107_v6 = vmul.f32 %v3099_v20, %v3099_v20  ;;  %v3109_v55 = vmul.f32 %v3101_v54, %v3101_v54 }
 0x3d8   : > { %v3110_v56 = vadd.f32 %v3104_v23, %v3102_v50 }
 0x3d9   : > { %v3119_v24 = vadd.f32 %v3105_v17, %v3103_v44  ;;  %v3168_v46 = vpop.permute.xlu1 %3167 }
 0x3da   : > { %v3111_v38 = vadd.f32 %v3110_v56, %v3106_v59  ;;  %v3714_v59 = vld [vmem:[%s6357_s3 + $0x30] sm:$0xff]   ;;  %v6439_v56 = vmov 0  }
 0x3db   : > { %v3120_v13 = vadd.f32 %v3119_v24, %v3107_v6  ;;  %v3715_v6 = vld [vmem:[%s6357_s3 + $0x38] sm:$0xff]  }
 0x3dc   : > { %v3112_v27 = vadd.f32 %v3111_v38, %v3108_v29 }
 0x3dd   : > { %v3121_v8 = vadd.f32 %v3120_v13, %v3109_v55  ;;  %v3172_v2 = vpop.permute.xlu1 %3171 }
 0x3de   : > { %v3113_v52 = vrot.slane %v3112_v27, 4 }
 0x3df   : > { %v3122_v43 = vrot.slane %v3121_v8, 4 }
 0x3e0   : > { %v3114_v49 = vadd.f32 %v3113_v52, %v3112_v27 }
 0x3e1   : > { %v3123_v7 = vadd.f32 %v3122_v43, %v3121_v8  ;;  %v3156_v34 = vpop.permute.xlu1 %3155 }
 0x3e2   : > { %v3115_v63 = vrot.slane %v3114_v49, 2 }
 0x3e3   : > { %v3124_v37 = vrot.slane %v3123_v7, 2 }
 0x3e4   : > { %v3116_v31 = vadd.f32 %v3115_v63, %v3114_v49 }
 0x3e5   : > { %v3125_v4 = vadd.f32 %v3124_v37, %v3123_v7  ;;  %v3180_v15 = vpop.permute.xlu1 %3179 }
 0x3e6   : > { %v3117_v3 = vrot.slane %v3116_v31, 1 }
 0x3e7   : > { %v3126_v25 = vrot.slane %v3125_v4, 1 }
 0x3e8   : > { %v3118_v19 = vadd.f32 %v3117_v3, %v3116_v31 }
 0x3e9   : > { %v3127_v1 = vadd.f32 %v3126_v25, %v3125_v4 }
 0x3ea   : > { %v3128_v53 = vmul.f32 0.03125, %v3118_v19 }
 0x3eb   : > { %v3129_v21 = vmul.f32 0.03125, %v3127_v1 }
 0x3ec   : > { %v3130_v33 = vadd.f32 1e-05, %v3128_v53 }
 0x3ed   : > { %v3131_v11 = vadd.f32 1e-05, %v3129_v21 }
 0x3ee   : > { %3820 = vrsqrt.f32 %v3130_v33 }
 0x3ef   : > { %3822 = vrsqrt.f32 %v3131_v11 }
 0x3f8   : > { %v3821_v22 = vpop.eup %3820 }
 0x3f9   : > { %v3823_v35 = vpop.eup %3822  ;;  %v3134_v12 = vmul.f32 %v3821_v22, %v3094_v14  ;;  %v3136_v5 = vmul.f32 %v3821_v22, %v3096_v51  ;;  %v3140_v18 = vmul.f32 %v3821_v22, %v3100_v0  ;;  %v3138_v30 = vmul.f32 %v3821_v22, %v3098_v57 }
 0x3fa   : > { %v3135_v60 = vmul.f32 %v3823_v35, %v3095_v42  ;;  %v3137_v9 = vmul.f32 %v3823_v35, %v3097_v40  ;;  %v3141_v58 = vmul.f32 %v3823_v35, %v3101_v54  ;;  %v3139_v62 = vmul.f32 %v3823_v35, %v3099_v20 }
 0x3fb   : > { %v3158_v36 = vmul.f32 %v3144_v61, %v3134_v12  ;;  %v3160_v32 = vmul.f32 %v3148_v48, %v3136_v5  ;;  %v3164_v41 = vmul.f32 %v3156_v34, %v3140_v18  ;;  %v3162_v28 = vmul.f32 %v3152_v39, %v3138_v30 }
 0x3fc   : > { %v3159_v47 = vmul.f32 %v3144_v61, %v3135_v60  ;;  %v3161_v26 = vmul.f32 %v3148_v48, %v3137_v9  ;;  %v3165_v10 = vmul.f32 %v3156_v34, %v3141_v58  ;;  %v3163_v16 = vmul.f32 %v3152_v39, %v3139_v62 }
 0x3fd   : > { %v3182_v50 = vadd.f32 %v3168_v46, %v3158_v36  ;;  %v3184_v23 = vadd.f32 %v3172_v2, %v3160_v32  ;;  %v3188_v14 = vadd.f32 %v3180_v15, %v3164_v41  ;;  %v3186_v51 = vadd.f32 %v3176_v45, %v3162_v28 }
 0x3fe   : > { %v3183_v0 = vadd.f32 %v3168_v46, %v3159_v47  ;;  %v3185_v57 = vadd.f32 %v3172_v2, %v3161_v26  ;;  %v3189_v42 = vadd.f32 %v3180_v15, %v3165_v10  ;;  %v3187_v40 = vadd.f32 %v3176_v45, %v3163_v16 }
 0x3ff   : > { %v3190_v54 = vpack.c.bf16 %v3184_v23, %v3182_v50  ;;  %v3192_v20 = vpack.c.bf16 %v3188_v14, %v3186_v51 }
 0x400   : > { %v3193_v44 = vpack.c.bf16 %v3189_v42, %v3187_v40  ;;  %v3191_v17 = vpack.c.bf16 %v3185_v57, %v3183_v0 }
 0x402   : > { %3226 = vmatprep.subr.bf16.mxu1 %v3191_v17 }
 0x403   : > { %3227 = vmatpush1.bf16.msra.mxu1 %v3190_v54 }
 0x404   : > { %3228 = vmatprep.subr.bf16.mxu1 %v3193_v44 }
 0x407   : > { %3229 = vmatpush1.bf16.msra.mxu1 %v3192_v20 }
 0x40a   : > { %3533 = vmatmul.mubr.msk.bf16.vlgmr.msra.gmra.mrb[32].mxu1 %vm387_vm0, %v3714_v59 }
 0x40b   : > { %3268 = vmatprep.mubr.bf16.mxu1 %v6439_v56 }
 0x412   : > { %3534 = vmatmul.mubr.msk.bf16.gmra.mrb[36].mxu1 %vm387_vm0, %v3715_v6  ;;  %v3196_v24 = vpop.permute.xlu1 %3195  ;;  %v3200_v38 = vpop.permute.xlu0 %3199 }
 0x416   : > { %v3204_v61 = vpop.permute.xlu1 %3203 }
 0x41a   : > { %v3208_v1 = vpop.permute.xlu1 %3207 }
 0x4dd   : > { %v3260_v29 = vpop.f32.mrb[32].mxu1 }
 0x4de   : > { %v3261_v55 = vadd.f32 %v3260_v29, %v3196_v24  ;;  %v3262_v13 = vpop.f32.mrb[33].mxu1 }
 0x4df   : > { %v3263_v27 = vadd.f32 %v3262_v13, %v3196_v24  ;;  %v3264_v8 = vpop.f32.mrb[34].mxu1 }
 0x4e0   : > { %v3279_v52 = vmax.f32 %v3261_v55, 0.0  ;;  %v3266_v43 = vpop.f32.mrb[35].mxu1  ;;  %v3265_v49 = vadd.f32 %v3264_v8, %v3200_v38 }
 0x4e1   : > { %v3280_v7 = vmax.f32 %v3263_v27, 0.0  ;;  %v3267_v63 = vadd.f32 %v3266_v43, %v3200_v38 }
 0x4e2   : > { %3287 = vst [vmem:[%s298_s25] sm:$0xff] %v3279_v52  ;;  %v3281_v37 = vmax.f32 %v3265_v49, 0.0 }
 0x4e3   : > { %3288 = vst [vmem:[%s298_s25 + $0x8] sm:$0xff] %v3280_v7  ;;  %v3282_v31 = vmax.f32 %v3267_v63, 0.0 }
 0x4e4   : > { %3289 = vst [vmem:[%s298_s25 + $0x10] sm:$0xff] %v3281_v37 }
 0x4e5   : > { %3290 = vst [vmem:[%s298_s25 + $0x18] sm:$0xff] %v3282_v31  ;;  %v3270_v4 = vpop.f32.mrb[36].mxu1 }
 0x4e6   : > { %v3271_v3 = vadd.f32 %v3270_v4, %v3204_v61  ;;  %v3272_v25 = vpop.f32.mrb[37].mxu1 }
 0x4e7   : > { %v3273_v19 = vadd.f32 %v3272_v25, %v3204_v61  ;;  %v3274_v46 = vpop.f32.mrb[38].mxu1 }
 0x4e8   : > { %v3283_v53 = vmax.f32 %v3271_v3, 0.0  ;;  %v3275_v21 = vadd.f32 %v3274_v46, %v3208_v1  ;;  %v3276_v33 = vpop.f32.mrb[39].mxu1 }
 0x4e9   : > { %v3284_v11 = vmax.f32 %v3273_v19, 0.0  ;;  %v3277_v2 = vadd.f32 %v3276_v33, %v3208_v1 }
 0x4ea   : > { %3291 = vst [vmem:[%s298_s25 + $0x20] sm:$0xff] %v3283_v53  ;;  %v3285_v48 = vmax.f32 %v3275_v21, 0.0 }
 0x4eb   : > { %3292 = vst [vmem:[%s298_s25 + $0x28] sm:$0xff] %v3284_v11  ;;  %v3286_v34 = vmax.f32 %v3277_v2, 0.0 }
 0x4ec   : > { %3293 = vst [vmem:[%s298_s25 + $0x30] sm:$0xff] %v3285_v48 }
 0x4ed   : > { %3294 = vst [vmem:[%s298_s25 + $0x38] sm:$0xff] %v3286_v34 }
 0x4ee   : > { %3904 = shalt.err (!%p3901_p0)
}
 0x4ef   : > { %s3905_s14 = scalar_lea.hbm %s6310_s12, 1024  ;;  %s3909_s10 = scalar_lea.hbm %s6359_s5, 2048 }
 0x4f0   : > { %p3906_p4 = scmp.ne.s32.totalorder %s6310_s12, %s3905_s14  ;;  %p3910_p5 = scmp.lt.u32.totalorder %s6310_s12, %s6359_s5 }
 0x4f1   : > { %p3911_p6 = scmp.lt.u32.totalorder %s3909_s10, %s3905_s14  ;;  %p3913_p2 = scmp.lt.u32.totalorder %s3905_s14, %s6310_s12 }
 0x4f2   : > { %p3907_p1 = pnand %p3906_p4, %p6440_p12 }
 0x4f3   : > { %p3912_p13 = por %p3911_p6, %p3910_p5 }
 0x4f4   : > { %p3908_p3 = pneg %p3907_p1 }
 0x4f5   : > { %p3914_p10 = por %p3913_p2, %p3912_p13 }
 0x4f7   : > { %p3915_p7 = pnand %p3914_p10, %p3908_p3 }
 0x4f9   : > { %3918 = shalt.err (!%p3915_p7)
}
 0x4fa   : > { %s3985_s25 = smov 256   ;;  %s3986_s8 = smov 512  }
 0x4fb   : > { %s3987_s28 = smov 16  }
 0x4fc   : > { %3611 = dma.vmem_to_hbm [thread:$0]  (%p6440_p12), %s6305_s7, 1024, %s6310_s12, %s3296_s22, %s3985_s25, %s3986_s8, %s3987_s28  }
 0x4fd PF: > { %s3324_s13 = sand.u32 1, %s3949_s18   ;;  %p6441_p8 = scmp.ne.s32.totalorder %s6380_s6, 0 }
 0x4fe   : > { %p6442_p9 = scmp.ge.s32.totalorder %s3961_s21, 2  ;;  %s3325_s29 = scalar_lea.sflag [#allocation5], %s3324_s13 }
 0x500   : > { %p3621_p11 = pnand %p6442_p9, %p6441_p8 }
 0x502   : > { %3944 = dma.done.wait (!%p3621_p11), %s3325_s29, 1024  }
 0x503   : > { %3946 = vsyncadd (!%p3621_p11), %s3325_s29, 4294966272  ;;  %p21_p0 = scmp.ge.s32.totalorder %s4043_s24, 4   ;;  %s6443_s18 = smov %s3953_s19 }
 0x504   : > { %s6444_s19 = smov %s3957_s20  ;;  %s6445_s20 = smov %s4055_s27 }
 0x505   : > { %s6446_s21 = smov %s4043_s24  ;;  %23 = sbr.rel (!%p21_p0) target bundleno = 9 (0x9), region = 107 }
 0x50c   :  { %3330 = vsyncpa [#allocation4], 1 }
 0x50d   :  { %3332 = vsyncpa [#allocation4 + $0x1], 1 }
 0x50e   :  { %3333 = vsyncpa [#allocation7], 1 }
 0x50f   :  { %3335 = vsyncpa [#allocation7 + $0x1], 1 }
 0x510   :  { %3336 = vsyncpa [#allocation5], 1 }
 0x511   :  { %3338 = vsyncpa [#allocation5 + $0x1], 1 }

</bundles_post_ra>
